<compile_context>
chip_gen: v7x
topology: tpu7x:2x2x1
jax: 0.10.0
libtpu: 0.0.40
codegen_flags: <defaults>
</compile_context>

<pallas_src>
import jax
import jax.numpy as jnp
from jax.experimental import pallas as pl
from jax.experimental.pallas import tpu as pltpu

IN_FEATURES = 3072   # 3 * 32 * 32
HIDDEN = 768
OUT_FEATURES = 10
OUT_PAD = 128        # lane-dense fc2 output width


def cifar1_kernel(x_ref, w1_ref, b1_ref, w2_ref, b2_ref, o_ref):
    # x arrives in f32; cast to bf16 in-kernel (VPU), MXU accumulates in f32.
    x_bf16 = x_ref[...].astype(jnp.bfloat16)
    h = jnp.dot(x_bf16, w1_ref[...], preferred_element_type=jnp.float32)
    h = jnp.tanh(h + b1_ref[...])                       # f32 bias add + tanh (EUP)
    # fc2: cast activations to bf16 for the MXU; lane-padded N=128 output.
    o = jnp.dot(h.astype(jnp.bfloat16), w2_ref[...],
                preferred_element_type=jnp.float32)
    o_ref[...] = o + b2_ref[...]


def prepare_params(w1, b1, w2, b2):
    """One-time weight prep (do this at init and cache the results).

    Weights are (in_features, out_features) so the kernel computes x @ W + b,
    numerically identical to torch's x @ W.T + b.  Accuracy note: W1/W2 (and x,
    inside the kernel) are bf16 with f32 MXU accumulation — an inference-grade
    tradeoff vs. the f32 torch reference.
    """
    w1b = w1.astype(jnp.bfloat16)
    b1f = b1.reshape(1, HIDDEN).astype(jnp.float32)
    w2p = jnp.zeros((HIDDEN, OUT_PAD), jnp.bfloat16).at[:, :OUT_FEATURES].set(
        w2.astype(jnp.bfloat16))
    b2p = jnp.zeros((1, OUT_PAD), jnp.float32).at[:, :OUT_FEATURES].set(
        b2.reshape(1, OUT_FEATURES).astype(jnp.float32))
    return w1b, b1f, w2p, b2p


def cifar1_forward(x_nchw, w1b, b1f, w2p, b2p, *, tm=None):
    """x_nchw: (B, 3, 32, 32) float32.  Params from prepare_params().
    Returns (B, 10) float32 logits."""
    B = x_nchw.shape[0]
    # Flatten in C*H*W order (same as torch.flatten(x, start_dim=1)); stays f32,
    # the bf16 cast happens inside the kernel.
    x_flat = x_nchw.reshape(B, -1)

    # Batch tile: 512 for large batches (amortizes per-step overhead, keeps >=2
    # grid steps for v7x megacore), 256 mid-size, sublane-aligned tile for tiny B.
    if tm is None:
        if B >= 1024:
            tm = 512
        elif B >= 256:
            tm = 256
        else:
            tm = max(8, ((B + 7) // 8) * 8)   # f32 x -> 8-row sublane packing
    b_pad = pl.cdiv(B, tm) * tm
    if b_pad != B:
        x_flat = jnp.pad(x_flat, ((0, b_pad - B), (0, 0)))

    resident = pl.Buffered(1)   # constant index maps -> no need to double-buffer

    out = pl.pallas_call(
        cifar1_kernel,
        out_shape=jax.ShapeDtypeStruct((b_pad, OUT_PAD), jnp.float32),
        grid=(b_pad // tm,),
        in_specs=[
            pl.BlockSpec((tm, IN_FEATURES), lambda i: (i, 0)),      # x tile (pipelined)
            pl.BlockSpec((IN_FEATURES, HIDDEN), lambda i: (0, 0),
                         pipeline_mode=resident),                   # W1 resident
            pl.BlockSpec((1, HIDDEN), lambda i: (0, 0),
                         pipeline_mode=resident),                   # b1 resident
            pl.BlockSpec((HIDDEN, OUT_PAD), lambda i: (0, 0),
                         pipeline_mode=resident),                   # W2 resident
            pl.BlockSpec((1, OUT_PAD), lambda i: (0, 0),
                         pipeline_mode=resident),                   # b2 resident
        ],
        out_specs=pl.BlockSpec((tm, OUT_PAD), lambda i: (i, 0)),
        compiler_params=pltpu.CompilerParams(
            dimension_semantics=("parallel",),          # shard batch tiles across TCs (v7x)
            vmem_limit_bytes=48 * 1024 * 1024,          # headroom on v5e; < v7x 64 MiB physical
        ),
    )(x_flat, w1b, b1f, w2p, b2p)

    return out[:B, :OUT_FEATURES]


def init_params(key):
    """Deterministic init matching nn.Linear's uniform(-1/sqrt(fan_in), 1/sqrt(fan_in))."""
    k1, k2, k3, k4 = jax.random.split(key, 4)
    bound1 = 1.0 / jnp.sqrt(IN_FEATURES)
    bound2 = 1.0 / jnp.sqrt(HIDDEN)
    # Stored as (in, out) so the kernel does x @ W (== x @ W_torch.T).
    w1 = jax.random.uniform(k1, (IN_FEATURES, HIDDEN), jnp.float32, -bound1, bound1)
    b1 = jax.random.uniform(k2, (1, HIDDEN), jnp.float32, -bound1, bound1)
    w2 = jax.random.uniform(k3, (HIDDEN, OUT_FEATURES), jnp.float32, -bound2, bound2)
    b2 = jax.random.uniform(k4, (1, OUT_FEATURES), jnp.float32, -bound2, bound2)
    return w1, b1, w2, b2


if __name__ == "__main__":
    key = jax.random.PRNGKey(0)
    k_x, k_p = jax.random.split(key)

    B = 2
    x = jax.random.normal(k_x, (B, 3, 32, 32), jnp.float32)   # CIFAR-shaped NCHW input
    w1, b1, w2, b2 = init_params(k_p)

    # One-time parameter prep (hoisted out of the forward path).
    w1b, b1f, w2p, b2p = prepare_params(w1, b1, w2, b2)
    w1b, b1f, w2p, b2p = jax.block_until_ready((w1b, b1f, w2p, b2p))

    out = cifar1_forward(x, w1b, b1f, w2p, b2p)
    out = jax.block_until_ready(out)
    assert out.shape == (B, OUT_FEATURES)

    x_flat = x.reshape(B, -1)

    # (a) Full-precision reference: loose tolerance because the kernel uses bf16
    #     inputs/weights with f32 accumulation.
    ref_f32 = jnp.tanh(x_flat @ w1 + b1) @ w2 + b2
    assert jnp.allclose(out, ref_f32, atol=1e-1, rtol=1e-1)

    # (b) bf16-emulated reference (same casting, f32 accumulate): tight tolerance.
    h_ref = jnp.dot(x_flat.astype(jnp.bfloat16), w1.astype(jnp.bfloat16),
                    preferred_element_type=jnp.float32) + b1
    h_ref = jnp.tanh(h_ref)
    ref_bf16 = jnp.dot(h_ref.astype(jnp.bfloat16), w2.astype(jnp.bfloat16),
                       preferred_element_type=jnp.float32) + b2
    assert jnp.allclose(out, ref_bf16, atol=2e-3, rtol=2e-3)

    print("KERNEL_OK")
</pallas_src>

<mosaic_0001>
module attributes {stable_mosaic.version = 11 : i64} {
  func.func @cifar1_kernel(%arg0: i32, %arg1: memref<8x3072xf32, #tpu.memory_space<vmem>>, %arg2: memref<3072x768xbf16, #tpu.memory_space<vmem>>, %arg3: memref<1x768xf32, #tpu.memory_space<vmem>>, %arg4: memref<768x128xbf16, #tpu.memory_space<vmem>>, %arg5: memref<1x128xf32, #tpu.memory_space<vmem>>, %arg6: memref<8x128xf32, #tpu.memory_space<vmem>>) attributes {dimension_semantics = [#tpu.dimension_semantics<parallel>], iteration_bounds = array<i64: 1>, scalar_prefetch = 0 : i64, scratch_operands = 0 : i64, tpu.core_type = #tpu.core_type<tc>, window_params = [{transform_indices = @transform_0, window_bounds = array<i64: 8, 3072>}, {pipeline_mode = #tpu.pipeline_mode<synchronous>, transform_indices = @transform_1, window_bounds = array<i64: 3072, 768>}, {pipeline_mode = #tpu.pipeline_mode<synchronous>, transform_indices = @transform_2, window_bounds = array<i64: 1, 768>}, {pipeline_mode = #tpu.pipeline_mode<synchronous>, transform_indices = @transform_3, window_bounds = array<i64: 768, 128>}, {pipeline_mode = #tpu.pipeline_mode<synchronous>, transform_indices = @transform_4, window_bounds = array<i64: 1, 128>}, {transform_indices = @transform_5, window_bounds = array<i64: 8, 128>}]} {
    %c0 = arith.constant 0 : index
    %c0_0 = arith.constant 0 : index
    %0 = vector.load %arg1[%c0, %c0_0] : memref<8x3072xf32, #tpu.memory_space<vmem>>, vector<8x3072xf32>
    %1 = arith.truncf %0 : vector<8x3072xf32> to vector<8x3072xbf16>
    %c0_1 = arith.constant 0 : index
    %c0_2 = arith.constant 0 : index
    %2 = vector.load %arg2[%c0_1, %c0_2] : memref<3072x768xbf16, #tpu.memory_space<vmem>>, vector<3072x768xbf16>
    %cst = arith.constant dense<0.000000e+00> : vector<8x768xf32>
    %3 = tpu.matmul %1, %2, %cst {dimension_numbers = #tpu.dot_dimension_numbers<[1], [0], [0], [1], [0, 0, 1, 1], [], []>} : vector<8x3072xbf16>, vector<3072x768xbf16>, vector<8x768xf32> -> vector<8x768xf32>
    %c0_3 = arith.constant 0 : index
    %c0_4 = arith.constant 0 : index
    %4 = vector.load %arg3[%c0_3, %c0_4] : memref<1x768xf32, #tpu.memory_space<vmem>>, vector<1x768xf32>
    %5 = vector.broadcast %4 : vector<1x768xf32> to vector<8x768xf32>
    %6 = arith.addf %3, %5 : vector<8x768xf32>
    %7 = math.tanh %6 : vector<8x768xf32>
    %8 = arith.truncf %7 : vector<8x768xf32> to vector<8x768xbf16>
    %c0_5 = arith.constant 0 : index
    %c0_6 = arith.constant 0 : index
    %9 = vector.load %arg4[%c0_5, %c0_6] : memref<768x128xbf16, #tpu.memory_space<vmem>>, vector<768x128xbf16>
    %cst_7 = arith.constant dense<0.000000e+00> : vector<8x128xf32>
    %10 = tpu.matmul %8, %9, %cst_7 {dimension_numbers = #tpu.dot_dimension_numbers<[1], [0], [0], [1], [0, 0, 1, 1], [], []>} : vector<8x768xbf16>, vector<768x128xbf16>, vector<8x128xf32> -> vector<8x128xf32>
    %c0_8 = arith.constant 0 : index
    %c0_9 = arith.constant 0 : index
    %11 = vector.load %arg5[%c0_8, %c0_9] : memref<1x128xf32, #tpu.memory_space<vmem>>, vector<1x128xf32>
    %12 = vector.broadcast %11 : vector<1x128xf32> to vector<8x128xf32>
    %13 = arith.addf %10, %12 : vector<8x128xf32>
    %c0_10 = arith.constant 0 : index
    %c0_11 = arith.constant 0 : index
    %14 = vector.load %arg6[%c0_10, %c0_11] : memref<8x128xf32, #tpu.memory_space<vmem>>, vector<8x128xf32>
    tpu.vector_store %arg6[%c0_10, %c0_11], %13 {strides = array<i32>} : memref<8x128xf32, #tpu.memory_space<vmem>>, vector<8x128xf32>,
    return
  }
  func.func @transform_0(%arg0: i32) -> (i32, i32) {
    %c0_i32 = arith.constant 0 : i32
    %c0_i32_0 = arith.constant 0 : i32
    return %arg0, %c0_i32 : i32, i32
  }
  func.func @transform_1(%arg0: i32) -> (i32, i32) {
    %c0_i32 = arith.constant 0 : i32
    %c0_i32_0 = arith.constant 0 : i32
    %c0_i32_1 = arith.constant 0 : i32
    return %c0_i32, %c0_i32_0 : i32, i32
  }
  func.func @transform_2(%arg0: i32) -> (i32, i32) {
    %c0_i32 = arith.constant 0 : i32
    %c0_i32_0 = arith.constant 0 : i32
    %c0_i32_1 = arith.constant 0 : i32
    return %c0_i32, %c0_i32_0 : i32, i32
  }
  func.func @transform_3(%arg0: i32) -> (i32, i32) {
    %c0_i32 = arith.constant 0 : i32
    %c0_i32_0 = arith.constant 0 : i32
    %c0_i32_1 = arith.constant 0 : i32
    return %c0_i32, %c0_i32_0 : i32, i32
  }
  func.func @transform_4(%arg0: i32) -> (i32, i32) {
    %c0_i32 = arith.constant 0 : i32
    %c0_i32_0 = arith.constant 0 : i32
    %c0_i32_1 = arith.constant 0 : i32
    return %c0_i32, %c0_i32_0 : i32, i32
  }
  func.func @transform_5(%arg0: i32) -> (i32, i32) {
    %c0_i32 = arith.constant 0 : i32
    %c0_i32_0 = arith.constant 0 : i32
    return %arg0, %c0_i32 : i32, i32
  }
}

</mosaic_0001>

<bundles_post_ra>
// kernel: tpu_custom_call.1
= control target key start
LH: loop header
LB: loop body
LE: loop exit
PB: predicated region body
PF: predicated region fallthrough
CT: control target
= control target key end

     0   :  { %10 = vsyncpa [#allocation3], 0  ;;  %s12687_s0 = inlined_call_operand.hbm [shape: f32[8,3072], index: 0, kind: input, shape index: {}]   ;;  %s12688_s1 = inlined_call_operand.hbm [shape: bf16[3072,768], index: 1, kind: input, shape index: {}]   ;;  %s12689_s2 = inlined_call_operand.hbm [shape: f32[1,768], index: 2, kind: input, shape index: {}]   ;;  %s12690_s3 = inlined_call_operand.hbm [shape: bf16[768,128], index: 3, kind: input, shape index: {}]   ;;  %s12691_s4 = inlined_call_operand.hbm [shape: f32[1,128], index: 4, kind: input, shape index: {}]   ;;  %s12692_s5 = inlined_call_operand.hbm [shape: f32[8,128], index: 5, kind: output, shape index: {}]  }
   0x1   :  { %11 = vsyncpa [#allocation6], 0 }
   0x2   :  { %12 = vsyncpa [#allocation9], 0 }
   0x3   :  { %13 = vsyncpa [#allocation4], 0  ;;  %s12435_s18 = smov [#allocation5]   ;;  %s12295_s22 = scalar_lea.hbm %s12688_s1, 147456 }
   0x4   :  { %s29_s19 = sshll.u32 %s12435_s18, 4  ;;  %p12296_p0 = scmp.ne.s32.totalorder %s12688_s1, %s12295_s22  ;;  %s30_s19 = int_to_ptr.vmem [resolvable:$true] %s29_s19 }
   0x5   :  { %p12299_p1 = scmp.lt.u32.totalorder %s12295_s22, %s12688_s1 }
   0x7   :  { %p12301_p2 = pnand %p12299_p1, %p12296_p0 }
   0x9   :  { %12304 = shalt.err (!%p12301_p2)
}
   0xa   :  { %s12305_s27 = scalar_lea.vmem %s30_s19, 147456  ;;  %p12310_p4 = scmp.lt.s32.totalorder %s30_s19, %s30_s19 }
   0xb   :  { %p12306_p3 = scmp.ne.s32.totalorder %s30_s19, %s12305_s27  ;;  %p12311_p5 = scmp.lt.s32.totalorder %s12305_s27, %s12305_s27 }
   0xd   :  { %p12312_p6 = por %p12311_p5, %p12310_p4 }
   0xf   :  { %p12313_p7 = pnand %p12312_p6, %p12306_p3 }
  0x11   :  { %12316 = shalt.err (!%p12313_p7)
}
  0x12   :  { %s12436_s28 = smov 384   ;;  %s12437_s29 = smov 24  }
  0x13   :  { %35 = dma.hbm_to_vmem [thread:$0]  %s12688_s1, 147456, %s30_s19, [#allocation6], %s12436_s28, %s12436_s28, %s12437_s29  }
  0x14   :  { %s12438_s7 = smov [#allocation8]   ;;  %s12317_s11 = scalar_lea.hbm %s12690_s3, 6144 }
  0x15   :  { %s51_s8 = sshll.u32 %s12438_s7, 4  ;;  %p12318_p8 = scmp.ne.s32.totalorder %s12690_s3, %s12317_s11  ;;  %s52_s8 = int_to_ptr.vmem [resolvable:$true] %s51_s8 }
  0x16   :  { %p12321_p9 = scmp.lt.u32.totalorder %s12317_s11, %s12690_s3 }
  0x18   :  { %p12323_p10 = pnand %p12321_p9, %p12318_p8 }
  0x1a   :  { %12326 = shalt.err (!%p12323_p10)
}
  0x1b   :  { %s12327_s16 = scalar_lea.vmem %s52_s8, 6144  ;;  %p12332_p12 = scmp.lt.s32.totalorder %s52_s8, %s52_s8 }
  0x1c   :  { %p12328_p11 = scmp.ne.s32.totalorder %s52_s8, %s12327_s16  ;;  %p12333_p13 = scmp.lt.s32.totalorder %s12327_s16, %s12327_s16 }
  0x1e   :  { %p12334_p0 = por %p12333_p13, %p12332_p12 }
  0x20   :  { %p12335_p1 = pnand %p12334_p0, %p12328_p11 }
  0x22   :  { %12338 = shalt.err (!%p12335_p1)
}
  0x23   :  { %s12439_s1 = smov 64   ;;  %s12440_s17 = smov 4  }
  0x24   :  { %57 = dma.hbm_to_vmem [thread:$0]  %s12690_s3, 6144, %s52_s8, [#allocation9], %s12439_s1, %s12439_s1, %s12440_s17  }
  0x25   :  { %s12441_s20 = smov [#allocation2]   ;;  %s12442_s22 = smov [#allocation7]  }
  0x26   :  { %s20_s21 = sshll.u32 %s12441_s20, 4  ;;  %s42_s23 = sshll.u32 %s12442_s22, 4  ;;  %s21_s21 = int_to_ptr.vmem [resolvable:$true] %s20_s21  ;;  %s43_s23 = int_to_ptr.vmem [resolvable:$true] %s42_s23 }
  0x27   :  { %s12339_s26 = scalar_lea.hbm %s12687_s0, 3072 }
  0x28   :  { %p12340_p2 = scmp.ne.s32.totalorder %s12687_s0, %s12339_s26  ;;  %p12343_p3 = scmp.lt.u32.totalorder %s12339_s26, %s12687_s0 }
  0x2a   :  { %p12345_p4 = pnand %p12343_p3, %p12340_p2 }
  0x2c   :  { %12348 = shalt.err (!%p12345_p4)
}
  0x2d   :  { %s12349_s3 = scalar_lea.vmem %s21_s21, 3072  ;;  %p12354_p6 = scmp.lt.s32.totalorder %s21_s21, %s21_s21 }
  0x2e   :  { %p12350_p5 = scmp.ne.s32.totalorder %s21_s21, %s12349_s3  ;;  %p12355_p7 = scmp.lt.s32.totalorder %s12349_s3, %s12349_s3 }
  0x30   :  { %p12356_p8 = por %p12355_p7, %p12354_p6 }
  0x32   :  { %p12357_p9 = pnand %p12356_p8, %p12350_p5 }
  0x34   :  { %12360 = shalt.err (!%p12357_p9)
}
  0x35   :  { %23 = dma.hbm_to_vmem [thread:$0]  %s12687_s0, 3072, %s21_s21, [#allocation3]  }
  0x36   :  { %s12361_s10 = scalar_lea.hbm %s12689_s2, 96 }
  0x37   :  { %p12362_p10 = scmp.ne.s32.totalorder %s12689_s2, %s12361_s10  ;;  %p12365_p11 = scmp.lt.u32.totalorder %s12361_s10, %s12689_s2 }
  0x39   :  { %p12367_p12 = pnand %p12365_p11, %p12362_p10 }
  0x3b   :  { %12370 = shalt.err (!%p12367_p12)
}
  0x3c   :  { %s12371_s15 = scalar_lea.vmem %s43_s23, 96  ;;  %p12376_p0 = scmp.lt.s32.totalorder %s43_s23, %s43_s23 }
  0x3d   :  { %p12372_p13 = scmp.ne.s32.totalorder %s43_s23, %s12371_s15  ;;  %p12377_p1 = scmp.lt.s32.totalorder %s12371_s15, %s12371_s15 }
  0x3f   :  { %p12378_p2 = por %p12377_p1, %p12376_p0 }
  0x41   :  { %p12379_p3 = pnand %p12378_p2, %p12372_p13 }
  0x43   :  { %12382 = shalt.err (!%p12379_p3)
}
  0x44   :  { %45 = dma.hbm_to_vmem [thread:$0]  %s12689_s2, 96, %s43_s23, [#allocation6]  }
  0x45   :  { %s12443_s1 = smov [#allocation10]   ;;  %s12383_s20 = scalar_lea.hbm %s12691_s4, 16 }
  0x46   :  { %s64_s17 = sshll.u32 %s12443_s1, 4  ;;  %p12384_p4 = scmp.ne.s32.totalorder %s12691_s4, %s12383_s20  ;;  %s65_s17 = int_to_ptr.vmem [resolvable:$true] %s64_s17 }
  0x47   :  { %p12387_p5 = scmp.lt.u32.totalorder %s12383_s20, %s12691_s4 }
  0x49   :  { %p12389_p6 = pnand %p12387_p5, %p12384_p4 }
  0x4b   :  { %12392 = shalt.err (!%p12389_p6)
}
  0x4c   :  { %s12393_s26 = scalar_lea.vmem %s65_s17, 16  ;;  %s12397_s2 = scalar_lea.vmem %s65_s17, 32 }
  0x4d   :  { %p12394_p7 = scmp.ne.s32.totalorder %s65_s17, %s12393_s26  ;;  %p12398_p8 = scmp.lt.s32.totalorder %s65_s17, %s65_s17 }
  0x4e   :  { %p12399_p9 = scmp.lt.s32.totalorder %s12397_s2, %s12393_s26 }
  0x50   :  { %p12400_p10 = por %p12399_p9, %p12398_p8 }
  0x52   :  { %p12401_p11 = pnand %p12400_p10, %p12394_p7 }
  0x54   :  { %12404 = shalt.err (!%p12401_p11)
}
  0x55   :  { %67 = dma.hbm_to_vmem [thread:$0]  %s12691_s4, 16, %s65_s17, [#allocation9]  }
  0x56   :  { %12427 = dma.done.wait [#allocation3], 3072  }
  0x57   :  { %12428 = vsyncadd [#allocation3], 4294964224 }
  0x58   :  { %12429 = dma.done.wait [#allocation6], 147552  }
  0x59   :  { %12430 = vsyncadd [#allocation6], 4294819744 }
  0x5a   :  { %12431 = dma.done.wait [#allocation9], 6160  }
  0x5b   :  { %12432 = vsyncadd [#allocation9], 4294961136  ;;  %v10506_v0 = vld [vmem:[#allocation5 + $0x4] ss:$24 sps:$4 sm:$0xff]   ;;  %v10510_v2 = vld [vmem:[#allocation5] ss:$24 sps:$4 sm:$0xff]  }
  0x5c   :  { %v10508_v1 = vld [vmem:[#allocation5 + $0xf04] ss:$24 sps:$4 sm:$0xff]   ;;  %7076 = vmatprep.subr.bf16.mxu1 %v10506_v0  ;;  %v10511_v3 = vld [vmem:[#allocation5 + $0xf00] ss:$24 sps:$4 sm:$0xff]   ;;  %v10512_v4 = vld [vmem:[#allocation5 + $0x34] ss:$24 sps:$4 sm:$0xff]  }
  0x5d   :  { %7281 = vmatprep.subr.bf16.mxu0 %v10508_v1  ;;  %7077 = vmatpush1.bf16.msra.mxu1 %v10510_v2  ;;  %v10514_v5 = vld [vmem:[#allocation5 + $0xf34] ss:$24 sps:$4 sm:$0xff]   ;;  %v10516_v6 = vld [vmem:[#allocation5 + $0x30] ss:$24 sps:$4 sm:$0xff]   ;;  %v10518_v8 = vld [vmem:[#allocation5 + $0x64] ss:$24 sps:$4 sm:$0xff]  }
  0x5e   :  { %7282 = vmatpush1.bf16.msra.mxu0 %v10511_v3  ;;  %7078 = vmatprep.subr.bf16.mxu1 %v10512_v4  ;;  %v10517_v7 = vld [vmem:[#allocation5 + $0xf30] ss:$24 sps:$4 sm:$0xff]   ;;  %v10520_v9 = vld [vmem:[#allocation5 + $0xf64] ss:$24 sps:$4 sm:$0xff]   ;;  %v10522_v10 = vld [vmem:[#allocation5 + $0x60] ss:$24 sps:$4 sm:$0xff]  }
  0x5f   :  { %7283 = vmatprep.subr.bf16.mxu0 %v10514_v5  ;;  %v10523_v11 = vld [vmem:[#allocation5 + $0xf60] ss:$24 sps:$4 sm:$0xff]   ;;  %v10524_v12 = vld [vmem:[#allocation5 + $0x94] ss:$24 sps:$4 sm:$0xff]   ;;  %v10528_v14 = vld [vmem:[#allocation5 + $0x90] ss:$24 sps:$4 sm:$0xff]  }
  0x60   :  { %v10526_v13 = vld [vmem:[#allocation5 + $0xf94] ss:$24 sps:$4 sm:$0xff]   ;;  %v10529_v15 = vld [vmem:[#allocation5 + $0xf90] ss:$24 sps:$4 sm:$0xff]   ;;  %v10530_v16 = vld [vmem:[#allocation5 + $0xc4] ss:$24 sps:$4 sm:$0xff]  }
  0x61   :  { %7079 = vmatpush1.bf16.msra.mxu1 %v10516_v6  ;;  %v10532_v17 = vld [vmem:[#allocation5 + $0xfc4] ss:$24 sps:$4 sm:$0xff]   ;;  %v10534_v18 = vld [vmem:[#allocation5 + $0xc0] ss:$24 sps:$4 sm:$0xff]   ;;  %v10536_v20 = vld [vmem:[#allocation5 + $0xf4] ss:$24 sps:$4 sm:$0xff]  }
  0x62   :  { %7284 = vmatpush1.bf16.msra.mxu0 %v10517_v7  ;;  %7080 = vmatprep.subr.bf16.mxu1 %v10518_v8  ;;  %v10535_v19 = vld [vmem:[#allocation5 + $0xfc0] ss:$24 sps:$4 sm:$0xff]   ;;  %v10538_v21 = vld [vmem:[#allocation5 + $0xff4] ss:$24 sps:$4 sm:$0xff]   ;;  %v10540_v22 = vld [vmem:[#allocation5 + $0xf0] ss:$24 sps:$4 sm:$0xff]  }
  0x63   :  { %7285 = vmatprep.subr.bf16.mxu0 %v10520_v9  ;;  %v10541_v23 = vld [vmem:[#allocation5 + $0xff0] ss:$24 sps:$4 sm:$0xff]   ;;  %v10542_v24 = vld [vmem:[#allocation5 + $0x124] ss:$24 sps:$4 sm:$0xff]   ;;  %v10546_v26 = vld [vmem:[#allocation5 + $0x120] ss:$24 sps:$4 sm:$0xff]  }
  0x64   :  { %v10544_v25 = vld [vmem:[#allocation5 + $0x1024] ss:$24 sps:$4 sm:$0xff]   ;;  %v10547_v27 = vld [vmem:[#allocation5 + $0x1020] ss:$24 sps:$4 sm:$0xff]   ;;  %v10548_v28 = vld [vmem:[#allocation5 + $0x154] ss:$24 sps:$4 sm:$0xff]  }
  0x65   :  { %7081 = vmatpush1.bf16.msra.mxu1 %v10522_v10  ;;  %v10550_v29 = vld [vmem:[#allocation5 + $0x1054] ss:$24 sps:$4 sm:$0xff]   ;;  %v10552_v30 = vld [vmem:[#allocation5 + $0x150] ss:$24 sps:$4 sm:$0xff]   ;;  %v10554_v32 = vld [vmem:[#allocation5 + $0x184] ss:$24 sps:$4 sm:$0xff]  }
  0x66   :  { %7286 = vmatpush1.bf16.msra.mxu0 %v10523_v11  ;;  %7082 = vmatprep.subr.bf16.mxu1 %v10524_v12  ;;  %v10553_v31 = vld [vmem:[#allocation5 + $0x1050] ss:$24 sps:$4 sm:$0xff]   ;;  %v10556_v33 = vld [vmem:[#allocation5 + $0x1084] ss:$24 sps:$4 sm:$0xff]   ;;  %v10558_v34 = vld [vmem:[#allocation5 + $0x180] ss:$24 sps:$4 sm:$0xff]  }
  0x67   :  { %7287 = vmatprep.subr.bf16.mxu0 %v10526_v13  ;;  %v10559_v35 = vld [vmem:[#allocation5 + $0x1080] ss:$24 sps:$4 sm:$0xff]   ;;  %v10560_v36 = vld [vmem:[#allocation5 + $0x1b4] ss:$24 sps:$4 sm:$0xff]   ;;  %v10564_v38 = vld [vmem:[#allocation5 + $0x1b0] ss:$24 sps:$4 sm:$0xff]  }
  0x68   :  { %v10562_v37 = vld [vmem:[#allocation5 + $0x10b4] ss:$24 sps:$4 sm:$0xff]   ;;  %v10565_v39 = vld [vmem:[#allocation5 + $0x10b0] ss:$24 sps:$4 sm:$0xff]   ;;  %v10566_v40 = vld [vmem:[#allocation5 + $0x1e4] ss:$24 sps:$4 sm:$0xff]  }
  0x69   :  { %7083 = vmatpush1.bf16.msra.mxu1 %v10528_v14  ;;  %v10568_v41 = vld [vmem:[#allocation5 + $0x10e4] ss:$24 sps:$4 sm:$0xff]   ;;  %v10570_v42 = vld [vmem:[#allocation5 + $0x1e0] ss:$24 sps:$4 sm:$0xff]   ;;  %v10572_v44 = vld [vmem:[#allocation5 + $0x214] ss:$24 sps:$4 sm:$0xff]  }
  0x6a   :  { %7288 = vmatpush1.bf16.msra.mxu0 %v10529_v15  ;;  %7084 = vmatprep.subr.bf16.mxu1 %v10530_v16  ;;  %v10571_v43 = vld [vmem:[#allocation5 + $0x10e0] ss:$24 sps:$4 sm:$0xff]   ;;  %v10574_v45 = vld [vmem:[#allocation5 + $0x1114] ss:$24 sps:$4 sm:$0xff]   ;;  %v10576_v47 = vld [vmem:[#allocation5 + $0x210] ss:$24 sps:$4 sm:$0xff]  }
  0x6b   :  { %7289 = vmatprep.subr.bf16.mxu0 %v10532_v17  ;;  %v85_v46 = vld [vmem:[#allocation2 + $0x8] sm:$0xff]  ;;  %v95_v50 = vld [vmem:[#allocation2 + $0x58] sm:$0xff]  ;;  %v84_v5 = vld [vmem:[#allocation2] sm:$0xff]  ;;  %s12444_s4 = smov [#allocation11]  }
  0x6c   :  { %v12535_v48 = vpack.c.bf16 %v85_v46, %v85_v46  ;;  %v10577_v49 = vld [vmem:[#allocation5 + $0x1110] ss:$24 sps:$4 sm:$0xff]   ;;  %v10578_v51 = vld [vmem:[#allocation5 + $0x244] ss:$24 sps:$4 sm:$0xff]   ;;  %v12537_v53 = vpack.c.bf16 %v95_v50, %v95_v50  ;;  %v10582_v54 = vld [vmem:[#allocation5 + $0x240] ss:$24 sps:$4 sm:$0xff]   ;;  %v12541_v10 = vpack.c.bf16 %v84_v5, %v84_v5 }
  0x6d   :  { %7085 = vmatpush1.bf16.msra.mxu1 %v10534_v18  ;;  %v10580_v52 = vld [vmem:[#allocation5 + $0x1144] ss:$24 sps:$4 sm:$0xff]   ;;  %v10583_v55 = vld [vmem:[#allocation5 + $0x1140] ss:$24 sps:$4 sm:$0xff]   ;;  %v10584_v56 = vld [vmem:[#allocation5 + $0x274] ss:$24 sps:$4 sm:$0xff]  }
  0x6e   :  { %7290 = vmatpush1.bf16.msra.mxu0 %v10535_v19  ;;  %7086 = vmatprep.subr.bf16.mxu1 %v10536_v20  ;;  %v10586_v57 = vld [vmem:[#allocation5 + $0x1174] ss:$24 sps:$4 sm:$0xff]   ;;  %v10588_v58 = vld [vmem:[#allocation5 + $0x270] ss:$24 sps:$4 sm:$0xff]   ;;  %v10590_v60 = vld [vmem:[#allocation5 + $0x2a4] ss:$24 sps:$4 sm:$0xff]  }
  0x6f   :  { %7291 = vmatprep.subr.bf16.mxu0 %v10538_v21  ;;  %7108 = vmatprep.mubr.bf16.mxu1 %v12535_v48  ;;  %v10589_v59 = vld [vmem:[#allocation5 + $0x1170] ss:$24 sps:$4 sm:$0xff]   ;;  %v10592_v61 = vld [vmem:[#allocation5 + $0x11a4] ss:$24 sps:$4 sm:$0xff]   ;;  %v10594_v62 = vld [vmem:[#allocation5 + $0x2a0] ss:$24 sps:$4 sm:$0xff]  }
  0x70   :  { %7313 = vmatprep.mubr.bf16.mxu0 %v12537_v53  ;;  %v10595_v63 = vld [vmem:[#allocation5 + $0x11a0] ss:$24 sps:$4 sm:$0xff]   ;;  %v10596_v0 = vld [vmem:[#allocation5 + $0x2d4] ss:$24 sps:$4 sm:$0xff]   ;;  %v10600_v2 = vld [vmem:[#allocation5 + $0x2d0] ss:$24 sps:$4 sm:$0xff]  }
  0x71   :  { %7087 = vmatpush1.bf16.msra.mxu1 %v10540_v22  ;;  %v10598_v1 = vld [vmem:[#allocation5 + $0x11d4] ss:$24 sps:$4 sm:$0xff]   ;;  %v10601_v3 = vld [vmem:[#allocation5 + $0x11d0] ss:$24 sps:$4 sm:$0xff]   ;;  %v10604_v4 = vld [vmem:[#allocation5 + $0x304] ss:$24 sps:$4 sm:$0xff]  }
  0x72   :  { %7292 = vmatpush1.bf16.msra.mxu0 %v10541_v23  ;;  %7088 = vmatprep.subr.bf16.mxu1 %v10542_v24  ;;  %v94_v6 = vld [vmem:[#allocation2 + $0x50] sm:$0xff]  ;;  %v10607_v7 = vld [vmem:[#allocation5 + $0x1204] ss:$24 sps:$4 sm:$0xff]   ;;  %v10602_v8 = vld [vmem:[#allocation5 + $0x300] ss:$24 sps:$4 sm:$0xff]   ;;  %s9082_s28 = sshll.u32 %s12444_s4, 4  ;;  %s9083_s28 = int_to_ptr.vmem [resolvable:$true] %s9082_s28 }
  0x73   :  { %7293 = vmatprep.subr.bf16.mxu0 %v10544_v25  ;;  %v10605_v9 = vld [vmem:[#allocation5 + $0x1200] ss:$24 sps:$4 sm:$0xff]   ;;  %v12543_v11 = vpack.c.bf16 %v94_v6, %v94_v6  ;;  %v10610_v12 = vld [vmem:[#allocation5 + $0x334] ss:$24 sps:$4 sm:$0xff]   ;;  %v10608_v14 = vld [vmem:[#allocation5 + $0x330] ss:$24 sps:$4 sm:$0xff]   ;;  %p12410_p13 = scmp.lt.s32.totalorder %s9083_s28, %s9083_s28 }
  0x74   :  { %v10613_v13 = vld [vmem:[#allocation5 + $0x1234] ss:$24 sps:$4 sm:$0xff]   ;;  %v10611_v15 = vld [vmem:[#allocation5 + $0x1230] ss:$24 sps:$4 sm:$0xff]   ;;  %v10616_v16 = vld [vmem:[#allocation5 + $0x364] ss:$24 sps:$4 sm:$0xff]  }
  0x75   :  { %7089 = vmatpush1.bf16.msra.mxu1 %v10546_v26  ;;  %v10619_v17 = vld [vmem:[#allocation5 + $0x1264] ss:$24 sps:$4 sm:$0xff]   ;;  %v10614_v18 = vld [vmem:[#allocation5 + $0x360] ss:$24 sps:$4 sm:$0xff]   ;;  %v10622_v20 = vld [vmem:[#allocation5 + $0x394] ss:$24 sps:$4 sm:$0xff]  }
  0x76   :  { %7294 = vmatpush1.bf16.msra.mxu0 %v10547_v27  ;;  %7090 = vmatprep.subr.bf16.mxu1 %v10548_v28  ;;  %v10617_v19 = vld [vmem:[#allocation5 + $0x1260] ss:$24 sps:$4 sm:$0xff]   ;;  %v10625_v21 = vld [vmem:[#allocation5 + $0x1294] ss:$24 sps:$4 sm:$0xff]   ;;  %v10620_v22 = vld [vmem:[#allocation5 + $0x390] ss:$24 sps:$4 sm:$0xff]  }
  0x77   :  { %7295 = vmatprep.subr.bf16.mxu0 %v10550_v29  ;;  %v10623_v23 = vld [vmem:[#allocation5 + $0x1290] ss:$24 sps:$4 sm:$0xff]   ;;  %v10628_v24 = vld [vmem:[#allocation5 + $0x3c4] ss:$24 sps:$4 sm:$0xff]   ;;  %v10626_v26 = vld [vmem:[#allocation5 + $0x3c0] ss:$24 sps:$4 sm:$0xff]  }
  0x78   :  { %v10631_v25 = vld [vmem:[#allocation5 + $0x12c4] ss:$24 sps:$4 sm:$0xff]   ;;  %v10629_v27 = vld [vmem:[#allocation5 + $0x12c0] ss:$24 sps:$4 sm:$0xff]   ;;  %v10634_v28 = vld [vmem:[#allocation5 + $0x3f4] ss:$24 sps:$4 sm:$0xff]  }
  0x79   :  { %7091 = vmatpush1.bf16.msra.mxu1 %v10552_v30  ;;  %v10637_v29 = vld [vmem:[#allocation5 + $0x12f4] ss:$24 sps:$4 sm:$0xff]   ;;  %v10632_v30 = vld [vmem:[#allocation5 + $0x3f0] ss:$24 sps:$4 sm:$0xff]   ;;  %v10650_v46 = vld [vmem:[#allocation5 + $0x480] ss:$24 sps:$4 sm:$0xff]  }
  0x7a   :  { %7296 = vmatpush1.bf16.msra.mxu0 %v10553_v31  ;;  %7092 = vmatprep.subr.bf16.mxu1 %v10554_v32  ;;  %v10635_v31 = vld [vmem:[#allocation5 + $0x12f0] ss:$24 sps:$4 sm:$0xff]   ;;  %v10640_v32 = vld [vmem:[#allocation5 + $0x424] ss:$24 sps:$4 sm:$0xff]   ;;  %v10661_v50 = vld [vmem:[#allocation5 + $0x13b4] ss:$24 sps:$4 sm:$0xff]  }
  0x7b   :  { %7297 = vmatprep.subr.bf16.mxu0 %v10556_v33  ;;  %v10643_v33 = vld [vmem:[#allocation5 + $0x1324] ss:$24 sps:$4 sm:$0xff]   ;;  %v10683_v5 = vld [vmem:[#allocation5 + $0x1470] ss:$24 sps:$4 sm:$0xff]   ;;  %s12405_s29 = scalar_lea.vmem %s9083_s28, 128 }
  0x7c   :  { %v10688_v6 = vld [vmem:[#allocation5 + $0x5a4] ss:$24 sps:$4 sm:$0xff]   ;;  %p12406_p12 = scmp.ne.s32.totalorder %s9083_s28, %s12405_s29  ;;  %p12411_p0 = scmp.lt.s32.totalorder %s12405_s29, %s12405_s29 }
  0x7d   :  { %7093 = vmatpush1.bf16.msra.mxu1 %v10558_v34  ;;  %v87_v34 = vld [vmem:[#allocation2 + $0x18] sm:$0xff] }
  0x7e   :  { %7298 = vmatpush1.bf16.msra.mxu0 %v10559_v35  ;;  %7094 = vmatprep.subr.bf16.mxu1 %v10560_v36  ;;  %v10638_v35 = vld [vmem:[#allocation5 + $0x420] ss:$24 sps:$4 sm:$0xff]   ;;  %v12547_v36 = vpack.c.bf16 %v87_v34, %v87_v34  ;;  %p12412_p1 = por %p12411_p0, %p12410_p13 }
  0x7f   :  { %7299 = vmatprep.subr.bf16.mxu0 %v10562_v37  ;;  %v10641_v37 = vld [vmem:[#allocation5 + $0x1320] ss:$24 sps:$4 sm:$0xff]  }
  0x80   :  { %v10710_v34 = vld [vmem:[#allocation5 + $0x660] ss:$24 sps:$4 sm:$0xff]   ;;  %p12413_p2 = pnand %p12412_p1, %p12406_p12 }
  0x81   :  { %7095 = vmatpush1.bf16.msra.mxu1 %v10564_v38  ;;  %v97_v38 = vld [vmem:[#allocation2 + $0x68] sm:$0xff] }
  0x82   :  { %7300 = vmatpush1.bf16.msra.mxu0 %v10565_v39  ;;  %7096 = vmatprep.subr.bf16.mxu1 %v10566_v40  ;;  %v10646_v39 = vld [vmem:[#allocation5 + $0x454] ss:$24 sps:$4 sm:$0xff]  }
  0x83   :  { %7301 = vmatprep.subr.bf16.mxu0 %v10568_v41  ;;  %v10649_v40 = vld [vmem:[#allocation5 + $0x1354] ss:$24 sps:$4 sm:$0xff]   ;;  %v12549_v41 = vpack.c.bf16 %v97_v38, %v97_v38 }
  0x84   :  { %v10721_v38 = vld [vmem:[#allocation5 + $0x1594] ss:$24 sps:$4 sm:$0xff]  }
  0x85   :  { %7097 = vmatpush1.bf16.msra.mxu1 %v10570_v42  ;;  %v10644_v42 = vld [vmem:[#allocation5 + $0x450] ss:$24 sps:$4 sm:$0xff]  }
  0x86   :  { %7302 = vmatpush1.bf16.msra.mxu0 %v10571_v43  ;;  %7098 = vmatprep.subr.bf16.mxu1 %v10572_v44  ;;  %v10647_v43 = vld [vmem:[#allocation5 + $0x1350] ss:$24 sps:$4 sm:$0xff]   ;;  %v10652_v44 = vld [vmem:[#allocation5 + $0x484] ss:$24 sps:$4 sm:$0xff]  }
  0x87   :  { %7303 = vmatprep.subr.bf16.mxu0 %v10574_v45  ;;  %v10655_v45 = vld [vmem:[#allocation5 + $0x1384] ss:$24 sps:$4 sm:$0xff]  }
  0x89   :  { %7099 = vmatpush1.bf16.msra.mxu1 %v10576_v47  ;;  %v10653_v47 = vld [vmem:[#allocation5 + $0x1380] ss:$24 sps:$4 sm:$0xff]  }
  0x8a   :  { %7304 = vmatpush1.bf16.msra.mxu0 %v10577_v49  ;;  %7100 = vmatprep.subr.bf16.mxu1 %v10578_v51  ;;  %v10658_v49 = vld [vmem:[#allocation5 + $0x4b4] ss:$24 sps:$4 sm:$0xff]   ;;  %v10656_v51 = vld [vmem:[#allocation5 + $0x4b0] ss:$24 sps:$4 sm:$0xff]  }
  0x8b   :  { %7305 = vmatprep.subr.bf16.mxu0 %v10580_v52  ;;  %v10659_v52 = vld [vmem:[#allocation5 + $0x13b0] ss:$24 sps:$4 sm:$0xff]  }
  0x8d   :  { %7101 = vmatpush1.bf16.msra.mxu1 %v10582_v54  ;;  %v10664_v54 = vld [vmem:[#allocation5 + $0x4e4] ss:$24 sps:$4 sm:$0xff]  }
  0x8e   :  { %7306 = vmatpush1.bf16.msra.mxu0 %v10583_v55  ;;  %7102 = vmatprep.subr.bf16.mxu1 %v10584_v56  ;;  %v10667_v55 = vld [vmem:[#allocation5 + $0x13e4] ss:$24 sps:$4 sm:$0xff]   ;;  %v10662_v56 = vld [vmem:[#allocation5 + $0x4e0] ss:$24 sps:$4 sm:$0xff]  }
  0x8f   :  { %7307 = vmatprep.subr.bf16.mxu0 %v10586_v57  ;;  %v10665_v57 = vld [vmem:[#allocation5 + $0x13e0] ss:$24 sps:$4 sm:$0xff]  }
  0x91   :  { %7103 = vmatpush1.bf16.msra.mxu1 %v10588_v58  ;;  %v10670_v58 = vld [vmem:[#allocation5 + $0x514] ss:$24 sps:$4 sm:$0xff]  }
  0x92   :  { %7308 = vmatpush1.bf16.msra.mxu0 %v10589_v59  ;;  %7104 = vmatprep.subr.bf16.mxu1 %v10590_v60  ;;  %v10673_v59 = vld [vmem:[#allocation5 + $0x1414] ss:$24 sps:$4 sm:$0xff]   ;;  %v10668_v60 = vld [vmem:[#allocation5 + $0x510] ss:$24 sps:$4 sm:$0xff]  }
  0x93   :  { %7309 = vmatprep.subr.bf16.mxu0 %v10592_v61  ;;  %v10671_v61 = vld [vmem:[#allocation5 + $0x1410] ss:$24 sps:$4 sm:$0xff]  }
  0x95   :  { %7105 = vmatpush1.bf16.msra.mxu1 %v10594_v62  ;;  %v10676_v62 = vld [vmem:[#allocation5 + $0x544] ss:$24 sps:$4 sm:$0xff]  }
  0x96   :  { %7310 = vmatpush1.bf16.msra.mxu0 %v10595_v63  ;;  %7106 = vmatprep.subr.bf16.mxu1 %v10596_v0  ;;  %v10679_v63 = vld [vmem:[#allocation5 + $0x1444] ss:$24 sps:$4 sm:$0xff]   ;;  %v10674_v0 = vld [vmem:[#allocation5 + $0x540] ss:$24 sps:$4 sm:$0xff]  }
  0x97   :  { %7311 = vmatprep.subr.bf16.mxu0 %v10598_v1  ;;  %v10677_v1 = vld [vmem:[#allocation5 + $0x1440] ss:$24 sps:$4 sm:$0xff]  }
  0x99   :  { %7107 = vmatpush1.bf16.msra.mxu1 %v10600_v2  ;;  %v10682_v2 = vld [vmem:[#allocation5 + $0x574] ss:$24 sps:$4 sm:$0xff]  }
  0x9a   :  { %7312 = vmatpush1.bf16.msra.mxu0 %v10601_v3  ;;  %7117 = vmatprep.subr.bf16.mxu1 %v10604_v4  ;;  %v10685_v3 = vld [vmem:[#allocation5 + $0x1474] ss:$24 sps:$4 sm:$0xff]   ;;  %v10680_v4 = vld [vmem:[#allocation5 + $0x570] ss:$24 sps:$4 sm:$0xff]  }
  0x9b   :  { %7322 = vmatprep.subr.bf16.mxu0 %v10607_v7  ;;  %v10691_v7 = vld [vmem:[#allocation5 + $0x14a4] ss:$24 sps:$4 sm:$0xff]  }
  0x9c   :  { %7109 = vmatmul.mubr.bf16.vlgmr.msra.gmra.mrb[0].mxu1 %v12541_v10 }
  0x9d   :  { %7314 = vmatmul.mubr.bf16.vlgmr.msra.gmra.mrb[0].mxu0 %v12543_v11  ;;  %7118 = vmatpush1.bf16.msra.mxu1 %v10602_v8  ;;  %v10686_v8 = vld [vmem:[#allocation5 + $0x5a0] ss:$24 sps:$4 sm:$0xff]  }
  0x9e   :  { %7323 = vmatpush1.bf16.msra.mxu0 %v10605_v9  ;;  %7119 = vmatprep.subr.bf16.mxu1 %v10610_v12  ;;  %v10689_v9 = vld [vmem:[#allocation5 + $0x14a0] ss:$24 sps:$4 sm:$0xff]   ;;  %v10694_v12 = vld [vmem:[#allocation5 + $0x5d4] ss:$24 sps:$4 sm:$0xff]  }
  0x9f   :  { %7324 = vmatprep.subr.bf16.mxu0 %v10613_v13  ;;  %7149 = vmatprep.mubr.bf16.mxu1 %v12547_v36  ;;  %v10697_v13 = vld [vmem:[#allocation5 + $0x14d4] ss:$24 sps:$4 sm:$0xff]  }
  0xa0   :  { %7354 = vmatprep.mubr.bf16.mxu0 %v12549_v41 }
  0xa1   :  { %7120 = vmatpush1.bf16.msra.mxu1 %v10608_v14  ;;  %v10692_v14 = vld [vmem:[#allocation5 + $0x5d0] ss:$24 sps:$4 sm:$0xff]  }
  0xa2   :  { %7325 = vmatpush1.bf16.msra.mxu0 %v10611_v15  ;;  %7121 = vmatprep.subr.bf16.mxu1 %v10616_v16  ;;  %v10695_v15 = vld [vmem:[#allocation5 + $0x14d0] ss:$24 sps:$4 sm:$0xff]   ;;  %v10700_v16 = vld [vmem:[#allocation5 + $0x604] ss:$24 sps:$4 sm:$0xff]  }
  0xa3   :  { %7326 = vmatprep.subr.bf16.mxu0 %v10619_v17  ;;  %v86_v17 = vld [vmem:[#allocation2 + $0x10] sm:$0xff] }
  0xa5   :  { %7122 = vmatpush1.bf16.msra.mxu1 %v10614_v18  ;;  %v96_v18 = vld [vmem:[#allocation2 + $0x60] sm:$0xff] }
  0xa6   :  { %7327 = vmatpush1.bf16.msra.mxu0 %v10617_v19  ;;  %7123 = vmatprep.subr.bf16.mxu1 %v10622_v20  ;;  %v10703_v19 = vld [vmem:[#allocation5 + $0x1504] ss:$24 sps:$4 sm:$0xff]   ;;  %v10698_v20 = vld [vmem:[#allocation5 + $0x600] ss:$24 sps:$4 sm:$0xff]  }
  0xa7   :  { %7328 = vmatprep.subr.bf16.mxu0 %v10625_v21  ;;  %v10701_v21 = vld [vmem:[#allocation5 + $0x1500] ss:$24 sps:$4 sm:$0xff]  }
  0xa9   :  { %7124 = vmatpush1.bf16.msra.mxu1 %v10620_v22  ;;  %v12553_v22 = vpack.c.bf16 %v86_v17, %v86_v17  ;;  %v10773_v17 = vld [vmem:[#allocation5 + $0x1740] ss:$24 sps:$4 sm:$0xff]  }
  0xaa   :  { %7329 = vmatpush1.bf16.msra.mxu0 %v10623_v23  ;;  %7125 = vmatprep.subr.bf16.mxu1 %v10628_v24  ;;  %v12555_v23 = vpack.c.bf16 %v96_v18, %v96_v18  ;;  %v10706_v24 = vld [vmem:[#allocation5 + $0x634] ss:$24 sps:$4 sm:$0xff]  }
  0xab   :  { %7330 = vmatprep.subr.bf16.mxu0 %v10631_v25  ;;  %v10709_v25 = vld [vmem:[#allocation5 + $0x1534] ss:$24 sps:$4 sm:$0xff]  }
  0xac   :  { %v10778_v18 = vld [vmem:[#allocation5 + $0x874] ss:$24 sps:$4 sm:$0xff]  }
  0xad   :  { %7126 = vmatpush1.bf16.msra.mxu1 %v10626_v26  ;;  %v89_v26 = vld [vmem:[#allocation2 + $0x28] sm:$0xff] }
  0xae   :  { %7331 = vmatpush1.bf16.msra.mxu0 %v10629_v27  ;;  %7127 = vmatprep.subr.bf16.mxu1 %v10634_v28  ;;  %v10704_v27 = vld [vmem:[#allocation5 + $0x630] ss:$24 sps:$4 sm:$0xff]   ;;  %v12559_v28 = vpack.c.bf16 %v89_v26, %v89_v26  ;;  %v10782_v26 = vld [vmem:[#allocation5 + $0x8a0] ss:$24 sps:$4 sm:$0xff]  }
  0xaf   :  { %7332 = vmatprep.subr.bf16.mxu0 %v10637_v29  ;;  %v10707_v29 = vld [vmem:[#allocation5 + $0x1530] ss:$24 sps:$4 sm:$0xff]  }
  0xb1   :  { %7128 = vmatpush1.bf16.msra.mxu1 %v10632_v30  ;;  %v99_v30 = vld [vmem:[#allocation2 + $0x78] sm:$0xff] }
  0xb2   :  { %7333 = vmatpush1.bf16.msra.mxu0 %v10635_v31  ;;  %7129 = vmatprep.subr.bf16.mxu1 %v10640_v32  ;;  %v10712_v31 = vld [vmem:[#allocation5 + $0x664] ss:$24 sps:$4 sm:$0xff]  }
  0xb3   :  { %7334 = vmatprep.subr.bf16.mxu0 %v10643_v33  ;;  %v10715_v32 = vld [vmem:[#allocation5 + $0x1564] ss:$24 sps:$4 sm:$0xff]   ;;  %v12561_v33 = vpack.c.bf16 %v99_v30, %v99_v30  ;;  %v10793_v30 = vld [vmem:[#allocation5 + $0x17d4] ss:$24 sps:$4 sm:$0xff]  }
  0xb5   :  { %7130 = vmatpush1.bf16.msra.mxu1 %v10638_v35  ;;  %v10713_v35 = vld [vmem:[#allocation5 + $0x1560] ss:$24 sps:$4 sm:$0xff]  }
  0xb6   :  { %7335 = vmatpush1.bf16.msra.mxu0 %v10641_v37  ;;  %7131 = vmatprep.subr.bf16.mxu1 %v10646_v39  ;;  %v10718_v37 = vld [vmem:[#allocation5 + $0x694] ss:$24 sps:$4 sm:$0xff]   ;;  %v10716_v39 = vld [vmem:[#allocation5 + $0x690] ss:$24 sps:$4 sm:$0xff]  }
  0xb7   :  { %7336 = vmatprep.subr.bf16.mxu0 %v10649_v40  ;;  %v10719_v40 = vld [vmem:[#allocation5 + $0x1590] ss:$24 sps:$4 sm:$0xff]  }
  0xb9   :  { %7132 = vmatpush1.bf16.msra.mxu1 %v10644_v42  ;;  %v10724_v42 = vld [vmem:[#allocation5 + $0x6c4] ss:$24 sps:$4 sm:$0xff]  }
  0xba   :  { %7337 = vmatpush1.bf16.msra.mxu0 %v10647_v43  ;;  %7133 = vmatprep.subr.bf16.mxu1 %v10652_v44  ;;  %v10727_v43 = vld [vmem:[#allocation5 + $0x15c4] ss:$24 sps:$4 sm:$0xff]   ;;  %v10722_v44 = vld [vmem:[#allocation5 + $0x6c0] ss:$24 sps:$4 sm:$0xff]  }
  0xbb   :  { %7338 = vmatprep.subr.bf16.mxu0 %v10655_v45  ;;  %v10725_v45 = vld [vmem:[#allocation5 + $0x15c0] ss:$24 sps:$4 sm:$0xff]  }
  0xbd   :  { %7134 = vmatpush1.bf16.msra.mxu1 %v10650_v46  ;;  %v10730_v46 = vld [vmem:[#allocation5 + $0x6f4] ss:$24 sps:$4 sm:$0xff]  }
  0xbe   :  { %7339 = vmatpush1.bf16.msra.mxu0 %v10653_v47  ;;  %7135 = vmatprep.subr.bf16.mxu1 %v10658_v49  ;;  %v10733_v47 = vld [vmem:[#allocation5 + $0x15f4] ss:$24 sps:$4 sm:$0xff]   ;;  %v10728_v49 = vld [vmem:[#allocation5 + $0x6f0] ss:$24 sps:$4 sm:$0xff]  }
  0xbf   :  { %7340 = vmatprep.subr.bf16.mxu0 %v10661_v50  ;;  %v10731_v50 = vld [vmem:[#allocation5 + $0x15f0] ss:$24 sps:$4 sm:$0xff]  }
  0xc1   :  { %7136 = vmatpush1.bf16.msra.mxu1 %v10656_v51  ;;  %v10736_v51 = vld [vmem:[#allocation5 + $0x724] ss:$24 sps:$4 sm:$0xff]  }
  0xc2   :  { %7341 = vmatpush1.bf16.msra.mxu0 %v10659_v52  ;;  %7137 = vmatprep.subr.bf16.mxu1 %v10664_v54  ;;  %v10739_v52 = vld [vmem:[#allocation5 + $0x1624] ss:$24 sps:$4 sm:$0xff]   ;;  %v10734_v54 = vld [vmem:[#allocation5 + $0x720] ss:$24 sps:$4 sm:$0xff]  }
  0xc3   :  { %7342 = vmatprep.subr.bf16.mxu0 %v10667_v55  ;;  %v10737_v55 = vld [vmem:[#allocation5 + $0x1620] ss:$24 sps:$4 sm:$0xff]  }
  0xc5   :  { %7138 = vmatpush1.bf16.msra.mxu1 %v10662_v56  ;;  %v10742_v56 = vld [vmem:[#allocation5 + $0x754] ss:$24 sps:$4 sm:$0xff]  }
  0xc6   :  { %7343 = vmatpush1.bf16.msra.mxu0 %v10665_v57  ;;  %7139 = vmatprep.subr.bf16.mxu1 %v10670_v58  ;;  %v10745_v57 = vld [vmem:[#allocation5 + $0x1654] ss:$24 sps:$4 sm:$0xff]   ;;  %v10740_v58 = vld [vmem:[#allocation5 + $0x750] ss:$24 sps:$4 sm:$0xff]  }
  0xc7   :  { %7344 = vmatprep.subr.bf16.mxu0 %v10673_v59  ;;  %v10743_v59 = vld [vmem:[#allocation5 + $0x1650] ss:$24 sps:$4 sm:$0xff]  }
  0xc9   :  { %7140 = vmatpush1.bf16.msra.mxu1 %v10668_v60  ;;  %v10748_v60 = vld [vmem:[#allocation5 + $0x784] ss:$24 sps:$4 sm:$0xff]  }
  0xca   :  { %7345 = vmatpush1.bf16.msra.mxu0 %v10671_v61  ;;  %7141 = vmatprep.subr.bf16.mxu1 %v10676_v62  ;;  %v10751_v61 = vld [vmem:[#allocation5 + $0x1684] ss:$24 sps:$4 sm:$0xff]   ;;  %v10746_v62 = vld [vmem:[#allocation5 + $0x780] ss:$24 sps:$4 sm:$0xff]  }
  0xcb   :  { %7346 = vmatprep.subr.bf16.mxu0 %v10679_v63  ;;  %v10749_v63 = vld [vmem:[#allocation5 + $0x1680] ss:$24 sps:$4 sm:$0xff]  }
  0xcd   :  { %7142 = vmatpush1.bf16.msra.mxu1 %v10674_v0  ;;  %v10754_v0 = vld [vmem:[#allocation5 + $0x7b4] ss:$24 sps:$4 sm:$0xff]  }
  0xce   :  { %7347 = vmatpush1.bf16.msra.mxu0 %v10677_v1  ;;  %7143 = vmatprep.subr.bf16.mxu1 %v10682_v2  ;;  %v10757_v1 = vld [vmem:[#allocation5 + $0x16b4] ss:$24 sps:$4 sm:$0xff]   ;;  %v10752_v2 = vld [vmem:[#allocation5 + $0x7b0] ss:$24 sps:$4 sm:$0xff]  }
  0xcf   :  { %7348 = vmatprep.subr.bf16.mxu0 %v10685_v3  ;;  %v10755_v3 = vld [vmem:[#allocation5 + $0x16b0] ss:$24 sps:$4 sm:$0xff]  }
  0xd1   :  { %7144 = vmatpush1.bf16.msra.mxu1 %v10680_v4  ;;  %v10760_v4 = vld [vmem:[#allocation5 + $0x7e4] ss:$24 sps:$4 sm:$0xff]  }
  0xd2   :  { %7349 = vmatpush1.bf16.msra.mxu0 %v10683_v5  ;;  %7145 = vmatprep.subr.bf16.mxu1 %v10688_v6  ;;  %v10763_v5 = vld [vmem:[#allocation5 + $0x16e4] ss:$24 sps:$4 sm:$0xff]   ;;  %v10758_v6 = vld [vmem:[#allocation5 + $0x7e0] ss:$24 sps:$4 sm:$0xff]  }
  0xd3   :  { %7350 = vmatprep.subr.bf16.mxu0 %v10691_v7  ;;  %v10761_v7 = vld [vmem:[#allocation5 + $0x16e0] ss:$24 sps:$4 sm:$0xff]  }
  0xd5   :  { %7146 = vmatpush1.bf16.msra.mxu1 %v10686_v8  ;;  %v10766_v8 = vld [vmem:[#allocation5 + $0x814] ss:$24 sps:$4 sm:$0xff]  }
  0xd6   :  { %7351 = vmatpush1.bf16.msra.mxu0 %v10689_v9  ;;  %7147 = vmatprep.subr.bf16.mxu1 %v10694_v12  ;;  %v10769_v9 = vld [vmem:[#allocation5 + $0x1714] ss:$24 sps:$4 sm:$0xff]   ;;  %v10764_v12 = vld [vmem:[#allocation5 + $0x810] ss:$24 sps:$4 sm:$0xff]  }
  0xd7   :  { %7352 = vmatprep.subr.bf16.mxu0 %v10697_v13  ;;  %v10767_v13 = vld [vmem:[#allocation5 + $0x1710] ss:$24 sps:$4 sm:$0xff]  }
  0xd9   :  { %7148 = vmatpush1.bf16.msra.mxu1 %v10692_v14  ;;  %v10772_v14 = vld [vmem:[#allocation5 + $0x844] ss:$24 sps:$4 sm:$0xff]  }
  0xda   :  { %7353 = vmatpush1.bf16.msra.mxu0 %v10695_v15  ;;  %7158 = vmatprep.subr.bf16.mxu1 %v10700_v16  ;;  %v10775_v15 = vld [vmem:[#allocation5 + $0x1744] ss:$24 sps:$4 sm:$0xff]   ;;  %v10770_v16 = vld [vmem:[#allocation5 + $0x840] ss:$24 sps:$4 sm:$0xff]  }
  0xdb   :  { %7363 = vmatprep.subr.bf16.mxu0 %v10703_v19  ;;  %v10781_v19 = vld [vmem:[#allocation5 + $0x1774] ss:$24 sps:$4 sm:$0xff]  }
  0xdc   :  { %7150 = vmatmul.mubr.bf16.vlgmr.msra.gmra.mrb[0].mxu1 %v12553_v22 }
  0xdd   :  { %7355 = vmatmul.mubr.bf16.vlgmr.msra.gmra.mrb[0].mxu0 %v12555_v23  ;;  %7159 = vmatpush1.bf16.msra.mxu1 %v10698_v20  ;;  %v10776_v20 = vld [vmem:[#allocation5 + $0x870] ss:$24 sps:$4 sm:$0xff]  }
  0xde   :  { %7364 = vmatpush1.bf16.msra.mxu0 %v10701_v21  ;;  %7160 = vmatprep.subr.bf16.mxu1 %v10706_v24  ;;  %v10779_v21 = vld [vmem:[#allocation5 + $0x1770] ss:$24 sps:$4 sm:$0xff]   ;;  %v10784_v24 = vld [vmem:[#allocation5 + $0x8a4] ss:$24 sps:$4 sm:$0xff]  }
  0xdf   :  { %7365 = vmatprep.subr.bf16.mxu0 %v10709_v25  ;;  %7190 = vmatprep.mubr.bf16.mxu1 %v12559_v28  ;;  %v10787_v25 = vld [vmem:[#allocation5 + $0x17a4] ss:$24 sps:$4 sm:$0xff]  }
  0xe0   :  { %7395 = vmatprep.mubr.bf16.mxu0 %v12561_v33 }
  0xe1   :  { %7161 = vmatpush1.bf16.msra.mxu1 %v10704_v27  ;;  %v10785_v27 = vld [vmem:[#allocation5 + $0x17a0] ss:$24 sps:$4 sm:$0xff]  }
  0xe2   :  { %7366 = vmatpush1.bf16.msra.mxu0 %v10707_v29  ;;  %7162 = vmatprep.subr.bf16.mxu1 %v10712_v31  ;;  %v10790_v29 = vld [vmem:[#allocation5 + $0x8d4] ss:$24 sps:$4 sm:$0xff]   ;;  %v10788_v31 = vld [vmem:[#allocation5 + $0x8d0] ss:$24 sps:$4 sm:$0xff]  }
  0xe3   :  { %7367 = vmatprep.subr.bf16.mxu0 %v10715_v32  ;;  %v10791_v32 = vld [vmem:[#allocation5 + $0x17d0] ss:$24 sps:$4 sm:$0xff]  }
  0xe5   :  { %7163 = vmatpush1.bf16.msra.mxu1 %v10710_v34  ;;  %v10796_v34 = vld [vmem:[#allocation5 + $0x904] ss:$24 sps:$4 sm:$0xff]  }
  0xe6   :  { %7368 = vmatpush1.bf16.msra.mxu0 %v10713_v35  ;;  %7164 = vmatprep.subr.bf16.mxu1 %v10718_v37  ;;  %v88_v35 = vld [vmem:[#allocation2 + $0x20] sm:$0xff]  ;;  %v98_v37 = vld [vmem:[#allocation2 + $0x70] sm:$0xff] }
  0xe7   :  { %7369 = vmatprep.subr.bf16.mxu0 %v10721_v38  ;;  %v10799_v38 = vld [vmem:[#allocation5 + $0x1804] ss:$24 sps:$4 sm:$0xff]  }
  0xe9   :  { %7165 = vmatpush1.bf16.msra.mxu1 %v10716_v39  ;;  %v10794_v39 = vld [vmem:[#allocation5 + $0x900] ss:$24 sps:$4 sm:$0xff]  }
  0xea   :  { %7370 = vmatpush1.bf16.msra.mxu0 %v10719_v40  ;;  %7166 = vmatprep.subr.bf16.mxu1 %v10724_v42  ;;  %v10797_v40 = vld [vmem:[#allocation5 + $0x1800] ss:$24 sps:$4 sm:$0xff]   ;;  %v12565_v42 = vpack.c.bf16 %v88_v35, %v88_v35  ;;  %v10863_v35 = vld [vmem:[#allocation5 + $0x1a10] ss:$24 sps:$4 sm:$0xff]  }
  0xeb   :  { %7371 = vmatprep.subr.bf16.mxu0 %v10727_v43  ;;  %v12567_v43 = vpack.c.bf16 %v98_v37, %v98_v37  ;;  %v10868_v37 = vld [vmem:[#allocation5 + $0xb44] ss:$24 sps:$4 sm:$0xff]  }
  0xed   :  { %7167 = vmatpush1.bf16.msra.mxu1 %v10722_v44  ;;  %v91_v44 = vld [vmem:[#allocation2 + $0x38] sm:$0xff] }
  0xee   :  { %7372 = vmatpush1.bf16.msra.mxu0 %v10725_v45  ;;  %7168 = vmatprep.subr.bf16.mxu1 %v10730_v46  ;;  %v101_v45 = vld [vmem:[#allocation2 + $0x88] sm:$0xff] }
  0xef   :  { %7373 = vmatprep.subr.bf16.mxu0 %v10733_v47  ;;  %v10802_v46 = vld [vmem:[#allocation5 + $0x934] ss:$24 sps:$4 sm:$0xff]  }
  0xf0   :  { %v10805_v47 = vld [vmem:[#allocation5 + $0x1834] ss:$24 sps:$4 sm:$0xff]  }
  0xf1   :  { %7169 = vmatpush1.bf16.msra.mxu1 %v10728_v49  ;;  %v12569_v49 = vpack.c.bf16 %v91_v44, %v91_v44  ;;  %v10874_v44 = vld [vmem:[#allocation5 + $0xb74] ss:$24 sps:$4 sm:$0xff]  }
  0xf2   :  { %7374 = vmatpush1.bf16.msra.mxu0 %v10731_v50  ;;  %7170 = vmatprep.subr.bf16.mxu1 %v10736_v51  ;;  %v12571_v50 = vpack.c.bf16 %v101_v45, %v101_v45  ;;  %v10800_v51 = vld [vmem:[#allocation5 + $0x930] ss:$24 sps:$4 sm:$0xff]   ;;  %v10877_v45 = vld [vmem:[#allocation5 + $0x1a74] ss:$24 sps:$4 sm:$0xff]  }
  0xf3   :  { %7375 = vmatprep.subr.bf16.mxu0 %v10739_v52  ;;  %v10803_v52 = vld [vmem:[#allocation5 + $0x1830] ss:$24 sps:$4 sm:$0xff]  }
  0xf5   :  { %7171 = vmatpush1.bf16.msra.mxu1 %v10734_v54  ;;  %v10808_v54 = vld [vmem:[#allocation5 + $0x964] ss:$24 sps:$4 sm:$0xff]  }
  0xf6   :  { %7376 = vmatpush1.bf16.msra.mxu0 %v10737_v55  ;;  %7172 = vmatprep.subr.bf16.mxu1 %v10742_v56  ;;  %v10811_v55 = vld [vmem:[#allocation5 + $0x1864] ss:$24 sps:$4 sm:$0xff]   ;;  %v10806_v56 = vld [vmem:[#allocation5 + $0x960] ss:$24 sps:$4 sm:$0xff]  }
  0xf7   :  { %7377 = vmatprep.subr.bf16.mxu0 %v10745_v57  ;;  %v10809_v57 = vld [vmem:[#allocation5 + $0x1860] ss:$24 sps:$4 sm:$0xff]  }
  0xf9   :  { %7173 = vmatpush1.bf16.msra.mxu1 %v10740_v58  ;;  %v10814_v58 = vld [vmem:[#allocation5 + $0x994] ss:$24 sps:$4 sm:$0xff]  }
  0xfa   :  { %7378 = vmatpush1.bf16.msra.mxu0 %v10743_v59  ;;  %7174 = vmatprep.subr.bf16.mxu1 %v10748_v60  ;;  %v10817_v59 = vld [vmem:[#allocation5 + $0x1894] ss:$24 sps:$4 sm:$0xff]   ;;  %v10812_v60 = vld [vmem:[#allocation5 + $0x990] ss:$24 sps:$4 sm:$0xff]  }
  0xfb   :  { %7379 = vmatprep.subr.bf16.mxu0 %v10751_v61  ;;  %v10815_v61 = vld [vmem:[#allocation5 + $0x1890] ss:$24 sps:$4 sm:$0xff]  }
  0xfd   :  { %7175 = vmatpush1.bf16.msra.mxu1 %v10746_v62  ;;  %v10820_v62 = vld [vmem:[#allocation5 + $0x9c4] ss:$24 sps:$4 sm:$0xff]  }
  0xfe   :  { %7380 = vmatpush1.bf16.msra.mxu0 %v10749_v63  ;;  %7176 = vmatprep.subr.bf16.mxu1 %v10754_v0  ;;  %v10823_v63 = vld [vmem:[#allocation5 + $0x18c4] ss:$24 sps:$4 sm:$0xff]   ;;  %v10818_v0 = vld [vmem:[#allocation5 + $0x9c0] ss:$24 sps:$4 sm:$0xff]  }
  0xff   :  { %7381 = vmatprep.subr.bf16.mxu0 %v10757_v1  ;;  %v10821_v1 = vld [vmem:[#allocation5 + $0x18c0] ss:$24 sps:$4 sm:$0xff]  }
 0x101   :  { %7177 = vmatpush1.bf16.msra.mxu1 %v10752_v2  ;;  %v10826_v2 = vld [vmem:[#allocation5 + $0x9f4] ss:$24 sps:$4 sm:$0xff]  }
 0x102   :  { %7382 = vmatpush1.bf16.msra.mxu0 %v10755_v3  ;;  %7178 = vmatprep.subr.bf16.mxu1 %v10760_v4  ;;  %v10829_v3 = vld [vmem:[#allocation5 + $0x18f4] ss:$24 sps:$4 sm:$0xff]   ;;  %v10824_v4 = vld [vmem:[#allocation5 + $0x9f0] ss:$24 sps:$4 sm:$0xff]  }
 0x103   :  { %7383 = vmatprep.subr.bf16.mxu0 %v10763_v5  ;;  %v10827_v5 = vld [vmem:[#allocation5 + $0x18f0] ss:$24 sps:$4 sm:$0xff]  }
 0x105   :  { %7179 = vmatpush1.bf16.msra.mxu1 %v10758_v6  ;;  %v10832_v6 = vld [vmem:[#allocation5 + $0xa24] ss:$24 sps:$4 sm:$0xff]  }
 0x106   :  { %7384 = vmatpush1.bf16.msra.mxu0 %v10761_v7  ;;  %7180 = vmatprep.subr.bf16.mxu1 %v10766_v8  ;;  %v10835_v7 = vld [vmem:[#allocation5 + $0x1924] ss:$24 sps:$4 sm:$0xff]   ;;  %v10830_v8 = vld [vmem:[#allocation5 + $0xa20] ss:$24 sps:$4 sm:$0xff]  }
 0x107   :  { %7385 = vmatprep.subr.bf16.mxu0 %v10769_v9  ;;  %v10833_v9 = vld [vmem:[#allocation5 + $0x1920] ss:$24 sps:$4 sm:$0xff]  }
 0x109   :  { %7181 = vmatpush1.bf16.msra.mxu1 %v10764_v12  ;;  %v10838_v12 = vld [vmem:[#allocation5 + $0xa54] ss:$24 sps:$4 sm:$0xff]  }
 0x10a   :  { %7386 = vmatpush1.bf16.msra.mxu0 %v10767_v13  ;;  %7182 = vmatprep.subr.bf16.mxu1 %v10772_v14  ;;  %v10841_v13 = vld [vmem:[#allocation5 + $0x1954] ss:$24 sps:$4 sm:$0xff]   ;;  %v10836_v14 = vld [vmem:[#allocation5 + $0xa50] ss:$24 sps:$4 sm:$0xff]  }
 0x10b   :  { %7387 = vmatprep.subr.bf16.mxu0 %v10775_v15  ;;  %v10839_v15 = vld [vmem:[#allocation5 + $0x1950] ss:$24 sps:$4 sm:$0xff]  }
 0x10d   :  { %7183 = vmatpush1.bf16.msra.mxu1 %v10770_v16  ;;  %v10844_v16 = vld [vmem:[#allocation5 + $0xa84] ss:$24 sps:$4 sm:$0xff]  }
 0x10e   :  { %7388 = vmatpush1.bf16.msra.mxu0 %v10773_v17  ;;  %7184 = vmatprep.subr.bf16.mxu1 %v10778_v18  ;;  %v10847_v17 = vld [vmem:[#allocation5 + $0x1984] ss:$24 sps:$4 sm:$0xff]   ;;  %v10842_v18 = vld [vmem:[#allocation5 + $0xa80] ss:$24 sps:$4 sm:$0xff]  }
 0x10f   :  { %7389 = vmatprep.subr.bf16.mxu0 %v10781_v19  ;;  %v10845_v19 = vld [vmem:[#allocation5 + $0x1980] ss:$24 sps:$4 sm:$0xff]  }
 0x111   :  { %7185 = vmatpush1.bf16.msra.mxu1 %v10776_v20  ;;  %v10850_v20 = vld [vmem:[#allocation5 + $0xab4] ss:$24 sps:$4 sm:$0xff]  }
 0x112   :  { %7390 = vmatpush1.bf16.msra.mxu0 %v10779_v21  ;;  %7186 = vmatprep.subr.bf16.mxu1 %v10784_v24  ;;  %v10853_v21 = vld [vmem:[#allocation5 + $0x19b4] ss:$24 sps:$4 sm:$0xff]   ;;  %v10848_v24 = vld [vmem:[#allocation5 + $0xab0] ss:$24 sps:$4 sm:$0xff]  }
 0x113   :  { %7391 = vmatprep.subr.bf16.mxu0 %v10787_v25  ;;  %v10851_v25 = vld [vmem:[#allocation5 + $0x19b0] ss:$24 sps:$4 sm:$0xff]  }
 0x115   :  { %7187 = vmatpush1.bf16.msra.mxu1 %v10782_v26  ;;  %v10856_v26 = vld [vmem:[#allocation5 + $0xae4] ss:$24 sps:$4 sm:$0xff]  }
 0x116   :  { %7392 = vmatpush1.bf16.msra.mxu0 %v10785_v27  ;;  %7188 = vmatprep.subr.bf16.mxu1 %v10790_v29  ;;  %v10859_v27 = vld [vmem:[#allocation5 + $0x19e4] ss:$24 sps:$4 sm:$0xff]   ;;  %v10854_v29 = vld [vmem:[#allocation5 + $0xae0] ss:$24 sps:$4 sm:$0xff]  }
 0x117   :  { %7393 = vmatprep.subr.bf16.mxu0 %v10793_v30  ;;  %v10857_v30 = vld [vmem:[#allocation5 + $0x19e0] ss:$24 sps:$4 sm:$0xff]  }
 0x119   :  { %7189 = vmatpush1.bf16.msra.mxu1 %v10788_v31  ;;  %v10862_v31 = vld [vmem:[#allocation5 + $0xb14] ss:$24 sps:$4 sm:$0xff]  }
 0x11a   :  { %7394 = vmatpush1.bf16.msra.mxu0 %v10791_v32  ;;  %7199 = vmatprep.subr.bf16.mxu1 %v10796_v34  ;;  %v10865_v32 = vld [vmem:[#allocation5 + $0x1a14] ss:$24 sps:$4 sm:$0xff]   ;;  %v10860_v34 = vld [vmem:[#allocation5 + $0xb10] ss:$24 sps:$4 sm:$0xff]  }
 0x11b   :  { %7404 = vmatprep.subr.bf16.mxu0 %v10799_v38  ;;  %v10871_v38 = vld [vmem:[#allocation5 + $0x1a44] ss:$24 sps:$4 sm:$0xff]  }
 0x11c   :  { %7191 = vmatmul.mubr.bf16.vlgmr.msra.gmra.mrb[0].mxu1 %v12565_v42 }
 0x11d   :  { %7396 = vmatmul.mubr.bf16.vlgmr.msra.gmra.mrb[0].mxu0 %v12567_v43  ;;  %7200 = vmatpush1.bf16.msra.mxu1 %v10794_v39  ;;  %v10866_v39 = vld [vmem:[#allocation5 + $0xb40] ss:$24 sps:$4 sm:$0xff]  }
 0x11e   :  { %7405 = vmatpush1.bf16.msra.mxu0 %v10797_v40  ;;  %7201 = vmatprep.subr.bf16.mxu1 %v10802_v46  ;;  %v10869_v40 = vld [vmem:[#allocation5 + $0x1a40] ss:$24 sps:$4 sm:$0xff]   ;;  %v10872_v46 = vld [vmem:[#allocation5 + $0xb70] ss:$24 sps:$4 sm:$0xff]  }
 0x11f   :  { %7406 = vmatprep.subr.bf16.mxu0 %v10805_v47  ;;  %7231 = vmatprep.mubr.bf16.mxu1 %v12569_v49  ;;  %v10875_v47 = vld [vmem:[#allocation5 + $0x1a70] ss:$24 sps:$4 sm:$0xff]  }
 0x120   :  { %7436 = vmatprep.mubr.bf16.mxu0 %v12571_v50 }
 0x121   :  { %7202 = vmatpush1.bf16.msra.mxu1 %v10800_v51  ;;  %v10880_v51 = vld [vmem:[#allocation5 + $0xba4] ss:$24 sps:$4 sm:$0xff]  }
 0x122   :  { %7407 = vmatpush1.bf16.msra.mxu0 %v10803_v52  ;;  %7203 = vmatprep.subr.bf16.mxu1 %v10808_v54  ;;  %v10883_v52 = vld [vmem:[#allocation5 + $0x1aa4] ss:$24 sps:$4 sm:$0xff]   ;;  %v10878_v54 = vld [vmem:[#allocation5 + $0xba0] ss:$24 sps:$4 sm:$0xff]  }
 0x123   :  { %7408 = vmatprep.subr.bf16.mxu0 %v10811_v55  ;;  %v10881_v55 = vld [vmem:[#allocation5 + $0x1aa0] ss:$24 sps:$4 sm:$0xff]  }
 0x125   :  { %7204 = vmatpush1.bf16.msra.mxu1 %v10806_v56  ;;  %v10886_v56 = vld [vmem:[#allocation5 + $0xbd4] ss:$24 sps:$4 sm:$0xff]  }
 0x126   :  { %7409 = vmatpush1.bf16.msra.mxu0 %v10809_v57  ;;  %7205 = vmatprep.subr.bf16.mxu1 %v10814_v58  ;;  %v10889_v57 = vld [vmem:[#allocation5 + $0x1ad4] ss:$24 sps:$4 sm:$0xff]   ;;  %v10884_v58 = vld [vmem:[#allocation5 + $0xbd0] ss:$24 sps:$4 sm:$0xff]  }
 0x127   :  { %7410 = vmatprep.subr.bf16.mxu0 %v10817_v59  ;;  %v10887_v59 = vld [vmem:[#allocation5 + $0x1ad0] ss:$24 sps:$4 sm:$0xff]  }
 0x129   :  { %7206 = vmatpush1.bf16.msra.mxu1 %v10812_v60  ;;  %v10892_v60 = vld [vmem:[#allocation5 + $0xc04] ss:$24 sps:$4 sm:$0xff]  }
 0x12a   :  { %7411 = vmatpush1.bf16.msra.mxu0 %v10815_v61  ;;  %7207 = vmatprep.subr.bf16.mxu1 %v10820_v62  ;;  %v90_v61 = vld [vmem:[#allocation2 + $0x30] sm:$0xff]  ;;  %v100_v62 = vld [vmem:[#allocation2 + $0x80] sm:$0xff] }
 0x12b   :  { %7412 = vmatprep.subr.bf16.mxu0 %v10823_v63  ;;  %v10895_v63 = vld [vmem:[#allocation5 + $0x1b04] ss:$24 sps:$4 sm:$0xff]  }
 0x12d   :  { %7208 = vmatpush1.bf16.msra.mxu1 %v10818_v0  ;;  %v10890_v0 = vld [vmem:[#allocation5 + $0xc00] ss:$24 sps:$4 sm:$0xff]  }
 0x12e   :  { %7413 = vmatpush1.bf16.msra.mxu0 %v10821_v1  ;;  %7209 = vmatprep.subr.bf16.mxu1 %v10826_v2  ;;  %v10893_v1 = vld [vmem:[#allocation5 + $0x1b00] ss:$24 sps:$4 sm:$0xff]   ;;  %v12577_v2 = vpack.c.bf16 %v90_v61, %v90_v61 }
 0x12f   :  { %7414 = vmatprep.subr.bf16.mxu0 %v10829_v3  ;;  %v12579_v3 = vpack.c.bf16 %v100_v62, %v100_v62  ;;  %v10953_v61 = vld [vmem:[#allocation5 + $0x1ce0] ss:$24 sps:$4 sm:$0xff]   ;;  %v10958_v62 = vld [vmem:[#allocation5 + $0xe14] ss:$24 sps:$4 sm:$0xff]  }
 0x131   :  { %7210 = vmatpush1.bf16.msra.mxu1 %v10824_v4  ;;  %v93_v4 = vld [vmem:[#allocation2 + $0x48] sm:$0xff] }
 0x132   :  { %7415 = vmatpush1.bf16.msra.mxu0 %v10827_v5  ;;  %7211 = vmatprep.subr.bf16.mxu1 %v10832_v6  ;;  %v103_v5 = vld [vmem:[#allocation2 + $0x98] sm:$0xff]  ;;  %v10898_v6 = vld [vmem:[#allocation5 + $0xc34] ss:$24 sps:$4 sm:$0xff]  }
 0x133   :  { %7416 = vmatprep.subr.bf16.mxu0 %v10835_v7  ;;  %v10901_v7 = vld [vmem:[#allocation5 + $0x1b34] ss:$24 sps:$4 sm:$0xff]  }
 0x135   :  { %7212 = vmatpush1.bf16.msra.mxu1 %v10830_v8  ;;  %v12581_v8 = vpack.c.bf16 %v93_v4, %v93_v4  ;;  %v10964_v4 = vld [vmem:[#allocation5 + $0xe44] ss:$24 sps:$4 sm:$0xff]  }
 0x136   :  { %7417 = vmatpush1.bf16.msra.mxu0 %v10833_v9  ;;  %7213 = vmatprep.subr.bf16.mxu1 %v10838_v12  ;;  %v12583_v9 = vpack.c.bf16 %v103_v5, %v103_v5  ;;  %v10896_v12 = vld [vmem:[#allocation5 + $0xc30] ss:$24 sps:$4 sm:$0xff]   ;;  %v10967_v5 = vld [vmem:[#allocation5 + $0x1d44] ss:$24 sps:$4 sm:$0xff]  }
 0x137   :  { %7418 = vmatprep.subr.bf16.mxu0 %v10841_v13  ;;  %v10899_v13 = vld [vmem:[#allocation5 + $0x1b30] ss:$24 sps:$4 sm:$0xff]  }
 0x139   :  { %7214 = vmatpush1.bf16.msra.mxu1 %v10836_v14  ;;  %v10904_v14 = vld [vmem:[#allocation5 + $0xc64] ss:$24 sps:$4 sm:$0xff]  }
 0x13a   :  { %7419 = vmatpush1.bf16.msra.mxu0 %v10839_v15  ;;  %7215 = vmatprep.subr.bf16.mxu1 %v10844_v16  ;;  %v10907_v15 = vld [vmem:[#allocation5 + $0x1b64] ss:$24 sps:$4 sm:$0xff]   ;;  %v10902_v16 = vld [vmem:[#allocation5 + $0xc60] ss:$24 sps:$4 sm:$0xff]  }
 0x13b   :  { %7420 = vmatprep.subr.bf16.mxu0 %v10847_v17  ;;  %v10905_v17 = vld [vmem:[#allocation5 + $0x1b60] ss:$24 sps:$4 sm:$0xff]  }
 0x13d   :  { %7216 = vmatpush1.bf16.msra.mxu1 %v10842_v18  ;;  %v10910_v18 = vld [vmem:[#allocation5 + $0xc94] ss:$24 sps:$4 sm:$0xff]  }
 0x13e   :  { %7421 = vmatpush1.bf16.msra.mxu0 %v10845_v19  ;;  %7217 = vmatprep.subr.bf16.mxu1 %v10850_v20  ;;  %v10913_v19 = vld [vmem:[#allocation5 + $0x1b94] ss:$24 sps:$4 sm:$0xff]   ;;  %v10908_v20 = vld [vmem:[#allocation5 + $0xc90] ss:$24 sps:$4 sm:$0xff]  }
 0x13f   :  { %7422 = vmatprep.subr.bf16.mxu0 %v10853_v21  ;;  %v10911_v21 = vld [vmem:[#allocation5 + $0x1b90] ss:$24 sps:$4 sm:$0xff]  }
 0x141   :  { %7218 = vmatpush1.bf16.msra.mxu1 %v10848_v24  ;;  %v10916_v24 = vld [vmem:[#allocation5 + $0xcc4] ss:$24 sps:$4 sm:$0xff]  }
 0x142   :  { %7423 = vmatpush1.bf16.msra.mxu0 %v10851_v25  ;;  %7219 = vmatprep.subr.bf16.mxu1 %v10856_v26  ;;  %v10919_v25 = vld [vmem:[#allocation5 + $0x1bc4] ss:$24 sps:$4 sm:$0xff]   ;;  %v10914_v26 = vld [vmem:[#allocation5 + $0xcc0] ss:$24 sps:$4 sm:$0xff]  }
 0x143   :  { %7424 = vmatprep.subr.bf16.mxu0 %v10859_v27  ;;  %v10917_v27 = vld [vmem:[#allocation5 + $0x1bc0] ss:$24 sps:$4 sm:$0xff]  }
 0x145   :  { %7220 = vmatpush1.bf16.msra.mxu1 %v10854_v29  ;;  %v10922_v29 = vld [vmem:[#allocation5 + $0xcf4] ss:$24 sps:$4 sm:$0xff]  }
 0x146   :  { %7425 = vmatpush1.bf16.msra.mxu0 %v10857_v30  ;;  %7221 = vmatprep.subr.bf16.mxu1 %v10862_v31  ;;  %v10925_v30 = vld [vmem:[#allocation5 + $0x1bf4] ss:$24 sps:$4 sm:$0xff]   ;;  %v10920_v31 = vld [vmem:[#allocation5 + $0xcf0] ss:$24 sps:$4 sm:$0xff]  }
 0x147   :  { %7426 = vmatprep.subr.bf16.mxu0 %v10865_v32  ;;  %v10923_v32 = vld [vmem:[#allocation5 + $0x1bf0] ss:$24 sps:$4 sm:$0xff]  }
 0x149   :  { %7222 = vmatpush1.bf16.msra.mxu1 %v10860_v34  ;;  %v10928_v34 = vld [vmem:[#allocation5 + $0xd24] ss:$24 sps:$4 sm:$0xff]  }
 0x14a   :  { %7427 = vmatpush1.bf16.msra.mxu0 %v10863_v35  ;;  %7223 = vmatprep.subr.bf16.mxu1 %v10868_v37  ;;  %v10931_v35 = vld [vmem:[#allocation5 + $0x1c24] ss:$24 sps:$4 sm:$0xff]   ;;  %v10926_v37 = vld [vmem:[#allocation5 + $0xd20] ss:$24 sps:$4 sm:$0xff]  }
 0x14b   :  { %7428 = vmatprep.subr.bf16.mxu0 %v10871_v38  ;;  %v10929_v38 = vld [vmem:[#allocation5 + $0x1c20] ss:$24 sps:$4 sm:$0xff]  }
 0x14d   :  { %7224 = vmatpush1.bf16.msra.mxu1 %v10866_v39  ;;  %v10934_v39 = vld [vmem:[#allocation5 + $0xd54] ss:$24 sps:$4 sm:$0xff]  }
 0x14e   :  { %7429 = vmatpush1.bf16.msra.mxu0 %v10869_v40  ;;  %7225 = vmatprep.subr.bf16.mxu1 %v10874_v44  ;;  %v10937_v40 = vld [vmem:[#allocation5 + $0x1c54] ss:$24 sps:$4 sm:$0xff]   ;;  %v10932_v44 = vld [vmem:[#allocation5 + $0xd50] ss:$24 sps:$4 sm:$0xff]  }
 0x14f   :  { %7430 = vmatprep.subr.bf16.mxu0 %v10877_v45  ;;  %v10935_v45 = vld [vmem:[#allocation5 + $0x1c50] ss:$24 sps:$4 sm:$0xff]  }
 0x151   :  { %7226 = vmatpush1.bf16.msra.mxu1 %v10872_v46  ;;  %v10940_v46 = vld [vmem:[#allocation5 + $0xd84] ss:$24 sps:$4 sm:$0xff]  }
 0x152   :  { %7431 = vmatpush1.bf16.msra.mxu0 %v10875_v47  ;;  %7227 = vmatprep.subr.bf16.mxu1 %v10880_v51  ;;  %v10943_v47 = vld [vmem:[#allocation5 + $0x1c84] ss:$24 sps:$4 sm:$0xff]   ;;  %v10938_v51 = vld [vmem:[#allocation5 + $0xd80] ss:$24 sps:$4 sm:$0xff]  }
 0x153   :  { %7432 = vmatprep.subr.bf16.mxu0 %v10883_v52  ;;  %v10941_v52 = vld [vmem:[#allocation5 + $0x1c80] ss:$24 sps:$4 sm:$0xff]  }
 0x155   :  { %7228 = vmatpush1.bf16.msra.mxu1 %v10878_v54  ;;  %v10946_v54 = vld [vmem:[#allocation5 + $0xdb4] ss:$24 sps:$4 sm:$0xff]  }
 0x156   :  { %7433 = vmatpush1.bf16.msra.mxu0 %v10881_v55  ;;  %7229 = vmatprep.subr.bf16.mxu1 %v10886_v56  ;;  %v10949_v55 = vld [vmem:[#allocation5 + $0x1cb4] ss:$24 sps:$4 sm:$0xff]   ;;  %v10944_v56 = vld [vmem:[#allocation5 + $0xdb0] ss:$24 sps:$4 sm:$0xff]  }
 0x157   :  { %7434 = vmatprep.subr.bf16.mxu0 %v10889_v57  ;;  %v10947_v57 = vld [vmem:[#allocation5 + $0x1cb0] ss:$24 sps:$4 sm:$0xff]  }
 0x159   :  { %7230 = vmatpush1.bf16.msra.mxu1 %v10884_v58  ;;  %v10952_v58 = vld [vmem:[#allocation5 + $0xde4] ss:$24 sps:$4 sm:$0xff]  }
 0x15a   :  { %7435 = vmatpush1.bf16.msra.mxu0 %v10887_v59  ;;  %7240 = vmatprep.subr.bf16.mxu1 %v10892_v60  ;;  %v10955_v59 = vld [vmem:[#allocation5 + $0x1ce4] ss:$24 sps:$4 sm:$0xff]   ;;  %v10950_v60 = vld [vmem:[#allocation5 + $0xde0] ss:$24 sps:$4 sm:$0xff]  }
 0x15b   :  { %7445 = vmatprep.subr.bf16.mxu0 %v10895_v63  ;;  %v10961_v63 = vld [vmem:[#allocation5 + $0x1d14] ss:$24 sps:$4 sm:$0xff]  }
 0x15c   :  { %7232 = vmatmul.mubr.bf16.vlgmr.msra.gmra.mrb[0].mxu1 %v12577_v2 }
 0x15d   :  { %7437 = vmatmul.mubr.bf16.vlgmr.msra.gmra.mrb[0].mxu0 %v12579_v3  ;;  %7241 = vmatpush1.bf16.msra.mxu1 %v10890_v0  ;;  %v10956_v0 = vld [vmem:[#allocation5 + $0xe10] ss:$24 sps:$4 sm:$0xff]  }
 0x15e   :  { %7446 = vmatpush1.bf16.msra.mxu0 %v10893_v1  ;;  %7242 = vmatprep.subr.bf16.mxu1 %v10898_v6  ;;  %v10959_v1 = vld [vmem:[#allocation5 + $0x1d10] ss:$24 sps:$4 sm:$0xff]   ;;  %v10962_v6 = vld [vmem:[#allocation5 + $0xe40] ss:$24 sps:$4 sm:$0xff]  }
 0x15f   :  { %7447 = vmatprep.subr.bf16.mxu0 %v10901_v7  ;;  %7272 = vmatprep.mubr.bf16.mxu1 %v12581_v8  ;;  %v10965_v7 = vld [vmem:[#allocation5 + $0x1d40] ss:$24 sps:$4 sm:$0xff]  }
 0x160   :  { %7477 = vmatprep.mubr.bf16.mxu0 %v12583_v9 }
 0x161   :  { %7243 = vmatpush1.bf16.msra.mxu1 %v10896_v12  ;;  %v10970_v12 = vld [vmem:[#allocation5 + $0xe74] ss:$24 sps:$4 sm:$0xff]  }
 0x162   :  { %7448 = vmatpush1.bf16.msra.mxu0 %v10899_v13  ;;  %7244 = vmatprep.subr.bf16.mxu1 %v10904_v14  ;;  %v10973_v13 = vld [vmem:[#allocation5 + $0x1d74] ss:$24 sps:$4 sm:$0xff]   ;;  %v10968_v14 = vld [vmem:[#allocation5 + $0xe70] ss:$24 sps:$4 sm:$0xff]  }
 0x163   :  { %7449 = vmatprep.subr.bf16.mxu0 %v10907_v15  ;;  %v10971_v15 = vld [vmem:[#allocation5 + $0x1d70] ss:$24 sps:$4 sm:$0xff]  }
 0x165   :  { %7245 = vmatpush1.bf16.msra.mxu1 %v10902_v16  ;;  %v10976_v16 = vld [vmem:[#allocation5 + $0xea4] ss:$24 sps:$4 sm:$0xff]  }
 0x166   :  { %7450 = vmatpush1.bf16.msra.mxu0 %v10905_v17  ;;  %7246 = vmatprep.subr.bf16.mxu1 %v10910_v18  ;;  %v10979_v17 = vld [vmem:[#allocation5 + $0x1da4] ss:$24 sps:$4 sm:$0xff]   ;;  %v10974_v18 = vld [vmem:[#allocation5 + $0xea0] ss:$24 sps:$4 sm:$0xff]  }
 0x167   :  { %7451 = vmatprep.subr.bf16.mxu0 %v10913_v19  ;;  %v10977_v19 = vld [vmem:[#allocation5 + $0x1da0] ss:$24 sps:$4 sm:$0xff]  }
 0x169   :  { %7247 = vmatpush1.bf16.msra.mxu1 %v10908_v20  ;;  %v10982_v20 = vld [vmem:[#allocation5 + $0xed4] ss:$24 sps:$4 sm:$0xff]  }
 0x16a   :  { %7452 = vmatpush1.bf16.msra.mxu0 %v10911_v21  ;;  %7248 = vmatprep.subr.bf16.mxu1 %v10916_v24  ;;  %v10985_v21 = vld [vmem:[#allocation5 + $0x1dd4] ss:$24 sps:$4 sm:$0xff]   ;;  %v10980_v24 = vld [vmem:[#allocation5 + $0xed0] ss:$24 sps:$4 sm:$0xff]  }
 0x16b   :  { %7453 = vmatprep.subr.bf16.mxu0 %v10919_v25  ;;  %v10983_v25 = vld [vmem:[#allocation5 + $0x1dd0] ss:$24 sps:$4 sm:$0xff]  }
 0x16d   :  { %7249 = vmatpush1.bf16.msra.mxu1 %v10914_v26  ;;  %v92_v26 = vld [vmem:[#allocation2 + $0x40] sm:$0xff] }
 0x16e   :  { %7454 = vmatpush1.bf16.msra.mxu0 %v10917_v27  ;;  %7250 = vmatprep.subr.bf16.mxu1 %v10922_v29  ;;  %v102_v27 = vld [vmem:[#allocation2 + $0x90] sm:$0xff]  ;;  %v10988_v29 = vld [vmem:[#allocation5 + $0x1e04] ss:$24 sps:$4 sm:$0xff]  }
 0x16f   :  { %7455 = vmatprep.subr.bf16.mxu0 %v10925_v30  ;;  %v10991_v30 = vld [vmem:[#allocation5 + $0xc] ss:$24 sps:$4 sm:$0xff]  }
 0x171   :  { %7251 = vmatpush1.bf16.msra.mxu1 %v10920_v31  ;;  %v10986_v31 = vld [vmem:[#allocation5 + $0x1e00] ss:$24 sps:$4 sm:$0xff]  }
 0x172   :  { %7456 = vmatpush1.bf16.msra.mxu0 %v10923_v32  ;;  %7252 = vmatprep.subr.bf16.mxu1 %v10928_v34  ;;  %v12589_v32 = vpack.c.bf16 %v92_v26, %v92_v26  ;;  %v12591_v34 = vpack.c.bf16 %v102_v27, %v102_v27  ;;  %v11048_v26 = vld [vmem:[#allocation5 + $0x1fe4] ss:$24 sps:$4 sm:$0xff]  }
 0x173   :  { %7457 = vmatprep.subr.bf16.mxu0 %v10931_v35  ;;  %v105_v35 = vld [vmem:[#allocation2 + $0xa8] sm:$0xff] }
 0x174   :  { %v11051_v27 = vld [vmem:[#allocation5 + $0x1ec] ss:$24 sps:$4 sm:$0xff]  }
 0x175   :  { %7253 = vmatpush1.bf16.msra.mxu1 %v10926_v37  ;;  %v10989_v37 = vld [vmem:[#allocation5 + $0x8] ss:$24 sps:$4 sm:$0xff]  }
 0x176   :  { %7458 = vmatpush1.bf16.msra.mxu0 %v10929_v38  ;;  %7254 = vmatprep.subr.bf16.mxu1 %v10934_v39  ;;  %v10994_v38 = vld [vmem:[#allocation5 + $0x1e34] ss:$24 sps:$4 sm:$0xff]  }
 0x177   :  { %7459 = vmatprep.subr.bf16.mxu0 %v10937_v40  ;;  %v10997_v39 = vld [vmem:[#allocation5 + $0x3c] ss:$24 sps:$4 sm:$0xff]   ;;  %v12593_v40 = vpack.c.bf16 %v105_v35, %v105_v35 }
 0x178   :  { %v11057_v35 = vld [vmem:[#allocation5 + $0x21c] ss:$24 sps:$4 sm:$0xff]  }
 0x179   :  { %7255 = vmatpush1.bf16.msra.mxu1 %v10932_v44  ;;  %v10992_v44 = vld [vmem:[#allocation5 + $0x1e30] ss:$24 sps:$4 sm:$0xff]  }
 0x17a   :  { %7460 = vmatpush1.bf16.msra.mxu0 %v10935_v45  ;;  %7256 = vmatprep.subr.bf16.mxu1 %v10940_v46  ;;  %v10995_v45 = vld [vmem:[#allocation5 + $0x38] ss:$24 sps:$4 sm:$0xff]   ;;  %v11000_v46 = vld [vmem:[#allocation5 + $0x1e64] ss:$24 sps:$4 sm:$0xff]  }
 0x17b   :  { %7461 = vmatprep.subr.bf16.mxu0 %v10943_v47  ;;  %v11003_v47 = vld [vmem:[#allocation5 + $0x6c] ss:$24 sps:$4 sm:$0xff]  }
 0x17d   :  { %7257 = vmatpush1.bf16.msra.mxu1 %v10938_v51  ;;  %v10998_v51 = vld [vmem:[#allocation5 + $0x1e60] ss:$24 sps:$4 sm:$0xff]  }
 0x17e   :  { %7462 = vmatpush1.bf16.msra.mxu0 %v10941_v52  ;;  %7258 = vmatprep.subr.bf16.mxu1 %v10946_v54  ;;  %v11001_v52 = vld [vmem:[#allocation5 + $0x68] ss:$24 sps:$4 sm:$0xff]   ;;  %v11006_v54 = vld [vmem:[#allocation5 + $0x1e94] ss:$24 sps:$4 sm:$0xff]  }
 0x17f   :  { %7463 = vmatprep.subr.bf16.mxu0 %v10949_v55  ;;  %v11009_v55 = vld [vmem:[#allocation5 + $0x9c] ss:$24 sps:$4 sm:$0xff]  }
 0x181   :  { %7259 = vmatpush1.bf16.msra.mxu1 %v10944_v56  ;;  %v11004_v56 = vld [vmem:[#allocation5 + $0x1e90] ss:$24 sps:$4 sm:$0xff]  }
 0x182   :  { %7464 = vmatpush1.bf16.msra.mxu0 %v10947_v57  ;;  %7260 = vmatprep.subr.bf16.mxu1 %v10952_v58  ;;  %v11007_v57 = vld [vmem:[#allocation5 + $0x98] ss:$24 sps:$4 sm:$0xff]   ;;  %v11012_v58 = vld [vmem:[#allocation5 + $0x1ec4] ss:$24 sps:$4 sm:$0xff]  }
 0x183   :  { %7465 = vmatprep.subr.bf16.mxu0 %v10955_v59  ;;  %v11015_v59 = vld [vmem:[#allocation5 + $0xcc] ss:$24 sps:$4 sm:$0xff]  }
 0x185   :  { %7261 = vmatpush1.bf16.msra.mxu1 %v10950_v60  ;;  %v11010_v60 = vld [vmem:[#allocation5 + $0x1ec0] ss:$24 sps:$4 sm:$0xff]  }
 0x186   :  { %7466 = vmatpush1.bf16.msra.mxu0 %v10953_v61  ;;  %7262 = vmatprep.subr.bf16.mxu1 %v10958_v62  ;;  %v11013_v61 = vld [vmem:[#allocation5 + $0xc8] ss:$24 sps:$4 sm:$0xff]   ;;  %v11018_v62 = vld [vmem:[#allocation5 + $0x1ef4] ss:$24 sps:$4 sm:$0xff]  }
 0x187   :  { %7467 = vmatprep.subr.bf16.mxu0 %v10961_v63  ;;  %v11021_v63 = vld [vmem:[#allocation5 + $0xfc] ss:$24 sps:$4 sm:$0xff]  }
 0x189   :  { %7263 = vmatpush1.bf16.msra.mxu1 %v10956_v0  ;;  %v11016_v0 = vld [vmem:[#allocation5 + $0x1ef0] ss:$24 sps:$4 sm:$0xff]  }
 0x18a   :  { %7468 = vmatpush1.bf16.msra.mxu0 %v10959_v1  ;;  %7264 = vmatprep.subr.bf16.mxu1 %v10964_v4  ;;  %v11019_v1 = vld [vmem:[#allocation5 + $0xf8] ss:$24 sps:$4 sm:$0xff]   ;;  %v11024_v4 = vld [vmem:[#allocation5 + $0x1f24] ss:$24 sps:$4 sm:$0xff]  }
 0x18b   :  { %7469 = vmatprep.subr.bf16.mxu0 %v10967_v5  ;;  %v11027_v5 = vld [vmem:[#allocation5 + $0x12c] ss:$24 sps:$4 sm:$0xff]  }
 0x18d   :  { %7265 = vmatpush1.bf16.msra.mxu1 %v10962_v6  ;;  %v11022_v6 = vld [vmem:[#allocation5 + $0x1f20] ss:$24 sps:$4 sm:$0xff]  }
 0x18e   :  { %7470 = vmatpush1.bf16.msra.mxu0 %v10965_v7  ;;  %7266 = vmatprep.subr.bf16.mxu1 %v10970_v12  ;;  %v11025_v7 = vld [vmem:[#allocation5 + $0x128] ss:$24 sps:$4 sm:$0xff]   ;;  %v11030_v12 = vld [vmem:[#allocation5 + $0x1f54] ss:$24 sps:$4 sm:$0xff]  }
 0x18f   :  { %7471 = vmatprep.subr.bf16.mxu0 %v10973_v13  ;;  %v11033_v13 = vld [vmem:[#allocation5 + $0x15c] ss:$24 sps:$4 sm:$0xff]  }
 0x191   :  { %7267 = vmatpush1.bf16.msra.mxu1 %v10968_v14  ;;  %v11028_v14 = vld [vmem:[#allocation5 + $0x1f50] ss:$24 sps:$4 sm:$0xff]  }
 0x192   :  { %7472 = vmatpush1.bf16.msra.mxu0 %v10971_v15  ;;  %7268 = vmatprep.subr.bf16.mxu1 %v10976_v16  ;;  %v11031_v15 = vld [vmem:[#allocation5 + $0x158] ss:$24 sps:$4 sm:$0xff]   ;;  %v11036_v16 = vld [vmem:[#allocation5 + $0x1f84] ss:$24 sps:$4 sm:$0xff]  }
 0x193   :  { %7473 = vmatprep.subr.bf16.mxu0 %v10979_v17  ;;  %v11039_v17 = vld [vmem:[#allocation5 + $0x18c] ss:$24 sps:$4 sm:$0xff]  }
 0x195   :  { %7269 = vmatpush1.bf16.msra.mxu1 %v10974_v18  ;;  %v11034_v18 = vld [vmem:[#allocation5 + $0x1f80] ss:$24 sps:$4 sm:$0xff]  }
 0x196   :  { %7474 = vmatpush1.bf16.msra.mxu0 %v10977_v19  ;;  %7270 = vmatprep.subr.bf16.mxu1 %v10982_v20  ;;  %v11037_v19 = vld [vmem:[#allocation5 + $0x188] ss:$24 sps:$4 sm:$0xff]   ;;  %v11042_v20 = vld [vmem:[#allocation5 + $0x1fb4] ss:$24 sps:$4 sm:$0xff]  }
 0x197   :  { %7475 = vmatprep.subr.bf16.mxu0 %v10985_v21  ;;  %v11045_v21 = vld [vmem:[#allocation5 + $0x1bc] ss:$24 sps:$4 sm:$0xff]  }
 0x199   :  { %7271 = vmatpush1.bf16.msra.mxu1 %v10980_v24  ;;  %v11040_v24 = vld [vmem:[#allocation5 + $0x1fb0] ss:$24 sps:$4 sm:$0xff]  }
 0x19a   :  { %7476 = vmatpush1.bf16.msra.mxu0 %v10983_v25  ;;  %7568 = vmatprep.subr.bf16.mxu1 %v10991_v30  ;;  %v11043_v25 = vld [vmem:[#allocation5 + $0x1b8] ss:$24 sps:$4 sm:$0xff]   ;;  %v11049_v30 = vld [vmem:[#allocation5 + $0x1e8] ss:$24 sps:$4 sm:$0xff]  }
 0x19b   :  { %7486 = vmatprep.subr.bf16.mxu0 %v10988_v29  ;;  %v11046_v29 = vld [vmem:[#allocation5 + $0x1fe0] ss:$24 sps:$4 sm:$0xff]  }
 0x19c   :  { %7273 = vmatmul.mubr.bf16.vlgmr.msra.gmra.mrb[0].mxu1 %v12589_v32 }
 0x19d   :  { %7478 = vmatmul.mubr.bf16.vlgmr.msra.gmra.mrb[0].mxu0 %v12591_v34  ;;  %7569 = vmatpush1.bf16.msra.mxu1 %v10989_v37  ;;  %v11052_v37 = vld [vmem:[#allocation5 + $0x2010] ss:$24 sps:$4 sm:$0xff]  }
 0x19e   :  { %7487 = vmatpush1.bf16.msra.mxu0 %v10986_v31  ;;  %7570 = vmatprep.subr.bf16.mxu1 %v10997_v39  ;;  %v11054_v31 = vld [vmem:[#allocation5 + $0x2014] ss:$24 sps:$4 sm:$0xff]   ;;  %v11060_v39 = vld [vmem:[#allocation5 + $0x2044] ss:$24 sps:$4 sm:$0xff]  }
 0x19f   :  { %7488 = vmatprep.subr.bf16.mxu0 %v10994_v38  ;;  %7518 = vmatprep.mubr.bf16.mxu0 %v12593_v40  ;;  %v11055_v38 = vld [vmem:[#allocation5 + $0x218] ss:$24 sps:$4 sm:$0xff]  }
 0x1a0   :  { %7600 = vmatprep.mubr.bf16.mxu1 %v12535_v48 }
 0x1a1   :  { %7571 = vmatpush1.bf16.msra.mxu1 %v10995_v45  ;;  %v11058_v45 = vld [vmem:[#allocation5 + $0x2040] ss:$24 sps:$4 sm:$0xff]  }
 0x1a2   :  { %7489 = vmatpush1.bf16.msra.mxu0 %v10992_v44  ;;  %7572 = vmatprep.subr.bf16.mxu1 %v11003_v47  ;;  %v11063_v44 = vld [vmem:[#allocation5 + $0x24c] ss:$24 sps:$4 sm:$0xff]  }
 0x1a3   :  { %7490 = vmatprep.subr.bf16.mxu0 %v11000_v46  ;;  %v11061_v46 = vld [vmem:[#allocation5 + $0x248] ss:$24 sps:$4 sm:$0xff]   ;;  %v11066_v47 = vld [vmem:[#allocation5 + $0x2074] ss:$24 sps:$4 sm:$0xff]  }
 0x1a5   :  { %7573 = vmatpush1.bf16.msra.mxu1 %v11001_v52  ;;  %v11064_v52 = vld [vmem:[#allocation5 + $0x2070] ss:$24 sps:$4 sm:$0xff]  }
 0x1a6   :  { %7491 = vmatpush1.bf16.msra.mxu0 %v10998_v51  ;;  %7574 = vmatprep.subr.bf16.mxu1 %v11009_v55  ;;  %v11069_v51 = vld [vmem:[#allocation5 + $0x27c] ss:$24 sps:$4 sm:$0xff]  }
 0x1a7   :  { %7492 = vmatprep.subr.bf16.mxu0 %v11006_v54  ;;  %v11067_v54 = vld [vmem:[#allocation5 + $0x278] ss:$24 sps:$4 sm:$0xff]   ;;  %v11072_v55 = vld [vmem:[#allocation5 + $0x20a4] ss:$24 sps:$4 sm:$0xff]  }
 0x1a9   :  { %7575 = vmatpush1.bf16.msra.mxu1 %v11007_v57  ;;  %v11070_v57 = vld [vmem:[#allocation5 + $0x20a0] ss:$24 sps:$4 sm:$0xff]  }
 0x1aa   :  { %7493 = vmatpush1.bf16.msra.mxu0 %v11004_v56  ;;  %7576 = vmatprep.subr.bf16.mxu1 %v11015_v59  ;;  %v11075_v56 = vld [vmem:[#allocation5 + $0x2ac] ss:$24 sps:$4 sm:$0xff]  }
 0x1ab   :  { %7494 = vmatprep.subr.bf16.mxu0 %v11012_v58  ;;  %v11073_v58 = vld [vmem:[#allocation5 + $0x2a8] ss:$24 sps:$4 sm:$0xff]   ;;  %v11078_v59 = vld [vmem:[#allocation5 + $0x20d4] ss:$24 sps:$4 sm:$0xff]  }
 0x1ad   :  { %7577 = vmatpush1.bf16.msra.mxu1 %v11013_v61  ;;  %v11076_v61 = vld [vmem:[#allocation5 + $0x20d0] ss:$24 sps:$4 sm:$0xff]  }
 0x1ae   :  { %7495 = vmatpush1.bf16.msra.mxu0 %v11010_v60  ;;  %7578 = vmatprep.subr.bf16.mxu1 %v11021_v63  ;;  %v11081_v60 = vld [vmem:[#allocation5 + $0x2dc] ss:$24 sps:$4 sm:$0xff]  }
 0x1af   :  { %7496 = vmatprep.subr.bf16.mxu0 %v11018_v62  ;;  %v11079_v62 = vld [vmem:[#allocation5 + $0x2d8] ss:$24 sps:$4 sm:$0xff]   ;;  %v11084_v63 = vld [vmem:[#allocation5 + $0x2104] ss:$24 sps:$4 sm:$0xff]  }
 0x1b1   :  { %7579 = vmatpush1.bf16.msra.mxu1 %v11019_v1  ;;  %v11087_v1 = vld [vmem:[#allocation5 + $0x30c] ss:$24 sps:$4 sm:$0xff]  }
 0x1b2   :  { %7497 = vmatpush1.bf16.msra.mxu0 %v11016_v0  ;;  %7580 = vmatprep.subr.bf16.mxu1 %v11027_v5  ;;  %v104_v0 = vld [vmem:[#allocation2 + $0xa0] sm:$0xff] }
 0x1b3   :  { %7498 = vmatprep.subr.bf16.mxu0 %v11024_v4  ;;  %v107_v4 = vld [vmem:[#allocation2 + $0xb8] sm:$0xff]  ;;  %v12599_v5 = vpack.c.bf16 %v104_v0, %v104_v0 }
 0x1b4   :  { %v11144_v0 = vld [vmem:[#allocation5 + $0x22e4] ss:$24 sps:$4 sm:$0xff]  }
 0x1b5   :  { %7581 = vmatpush1.bf16.msra.mxu1 %v11025_v7  ;;  %v11085_v7 = vld [vmem:[#allocation5 + $0x308] ss:$24 sps:$4 sm:$0xff]  }
 0x1b6   :  { %7499 = vmatpush1.bf16.msra.mxu0 %v11022_v6  ;;  %7582 = vmatprep.subr.bf16.mxu1 %v11033_v13  ;;  %v11082_v6 = vld [vmem:[#allocation5 + $0x2100] ss:$24 sps:$4 sm:$0xff]   ;;  %v11093_v13 = vld [vmem:[#allocation5 + $0x33c] ss:$24 sps:$4 sm:$0xff]  }
 0x1b7   :  { %7500 = vmatprep.subr.bf16.mxu0 %v11030_v12  ;;  %v11090_v12 = vld [vmem:[#allocation5 + $0x2134] ss:$24 sps:$4 sm:$0xff]  }
 0x1b9   :  { %7583 = vmatpush1.bf16.msra.mxu1 %v11031_v15  ;;  %v11088_v15 = vld [vmem:[#allocation5 + $0x2130] ss:$24 sps:$4 sm:$0xff]  }
 0x1ba   :  { %7501 = vmatpush1.bf16.msra.mxu0 %v11028_v14  ;;  %7584 = vmatprep.subr.bf16.mxu1 %v11039_v17  ;;  %v12601_v14 = vpack.c.bf16 %v107_v4, %v107_v4  ;;  %v11096_v17 = vld [vmem:[#allocation5 + $0x2164] ss:$24 sps:$4 sm:$0xff]   ;;  %v11142_v4 = vld [vmem:[#allocation5 + $0x22e0] ss:$24 sps:$4 sm:$0xff]  }
 0x1bb   :  { %7502 = vmatprep.subr.bf16.mxu0 %v11036_v16  ;;  %v11091_v16 = vld [vmem:[#allocation5 + $0x338] ss:$24 sps:$4 sm:$0xff]  }
 0x1bd   :  { %7585 = vmatpush1.bf16.msra.mxu1 %v11037_v19  ;;  %v11094_v19 = vld [vmem:[#allocation5 + $0x2160] ss:$24 sps:$4 sm:$0xff]  }
 0x1be   :  { %7503 = vmatpush1.bf16.msra.mxu0 %v11034_v18  ;;  %7586 = vmatprep.subr.bf16.mxu1 %v11045_v21  ;;  %v11099_v18 = vld [vmem:[#allocation5 + $0x36c] ss:$24 sps:$4 sm:$0xff]  }
 0x1bf   :  { %7504 = vmatprep.subr.bf16.mxu0 %v11042_v20  ;;  %v11097_v20 = vld [vmem:[#allocation5 + $0x368] ss:$24 sps:$4 sm:$0xff]   ;;  %v11102_v21 = vld [vmem:[#allocation5 + $0x2194] ss:$24 sps:$4 sm:$0xff]  }
 0x1c1   :  { %7587 = vmatpush1.bf16.msra.mxu1 %v11043_v25  ;;  %v11100_v25 = vld [vmem:[#allocation5 + $0x2190] ss:$24 sps:$4 sm:$0xff]  }
 0x1c2   :  { %7505 = vmatpush1.bf16.msra.mxu0 %v11040_v24  ;;  %7588 = vmatprep.subr.bf16.mxu1 %v11051_v27  ;;  %v11105_v24 = vld [vmem:[#allocation5 + $0x39c] ss:$24 sps:$4 sm:$0xff]  }
 0x1c3   :  { %7506 = vmatprep.subr.bf16.mxu0 %v11048_v26  ;;  %v11103_v26 = vld [vmem:[#allocation5 + $0x398] ss:$24 sps:$4 sm:$0xff]   ;;  %v11108_v27 = vld [vmem:[#allocation5 + $0x21c4] ss:$24 sps:$4 sm:$0xff]  }
 0x1c5   :  { %7589 = vmatpush1.bf16.msra.mxu1 %v11049_v30  ;;  %v11106_v30 = vld [vmem:[#allocation5 + $0x21c0] ss:$24 sps:$4 sm:$0xff]  }
 0x1c6   :  { %7507 = vmatpush1.bf16.msra.mxu0 %v11046_v29  ;;  %7590 = vmatprep.subr.bf16.mxu1 %v11057_v35  ;;  %v11111_v29 = vld [vmem:[#allocation5 + $0x3cc] ss:$24 sps:$4 sm:$0xff]  }
 0x1c7   :  { %7508 = vmatprep.subr.bf16.mxu0 %v11054_v31  ;;  %v11109_v31 = vld [vmem:[#allocation5 + $0x3c8] ss:$24 sps:$4 sm:$0xff]   ;;  %v11114_v35 = vld [vmem:[#allocation5 + $0x21f4] ss:$24 sps:$4 sm:$0xff]  }
 0x1c9   :  { %7591 = vmatpush1.bf16.msra.mxu1 %v11055_v38  ;;  %v11112_v38 = vld [vmem:[#allocation5 + $0x21f0] ss:$24 sps:$4 sm:$0xff]  }
 0x1ca   :  { %7509 = vmatpush1.bf16.msra.mxu0 %v11052_v37  ;;  %7592 = vmatprep.subr.bf16.mxu1 %v11063_v44  ;;  %v11117_v37 = vld [vmem:[#allocation5 + $0x3fc] ss:$24 sps:$4 sm:$0xff]  }
 0x1cb   :  { %7510 = vmatprep.subr.bf16.mxu0 %v11060_v39  ;;  %v11115_v39 = vld [vmem:[#allocation5 + $0x3f8] ss:$24 sps:$4 sm:$0xff]   ;;  %v11120_v44 = vld [vmem:[#allocation5 + $0x2224] ss:$24 sps:$4 sm:$0xff]  }
 0x1cd   :  { %7593 = vmatpush1.bf16.msra.mxu1 %v11061_v46  ;;  %v11118_v46 = vld [vmem:[#allocation5 + $0x2220] ss:$24 sps:$4 sm:$0xff]  }
 0x1ce   :  { %7511 = vmatpush1.bf16.msra.mxu0 %v11058_v45  ;;  %7594 = vmatprep.subr.bf16.mxu1 %v11069_v51  ;;  %v11123_v45 = vld [vmem:[#allocation5 + $0x42c] ss:$24 sps:$4 sm:$0xff]  }
 0x1cf   :  { %7512 = vmatprep.subr.bf16.mxu0 %v11066_v47  ;;  %v11121_v47 = vld [vmem:[#allocation5 + $0x428] ss:$24 sps:$4 sm:$0xff]   ;;  %v11126_v51 = vld [vmem:[#allocation5 + $0x2254] ss:$24 sps:$4 sm:$0xff]  }
 0x1d1   :  { %7595 = vmatpush1.bf16.msra.mxu1 %v11067_v54  ;;  %v11124_v54 = vld [vmem:[#allocation5 + $0x2250] ss:$24 sps:$4 sm:$0xff]  }
 0x1d2   :  { %7513 = vmatpush1.bf16.msra.mxu0 %v11064_v52  ;;  %7596 = vmatprep.subr.bf16.mxu1 %v11075_v56  ;;  %v11129_v52 = vld [vmem:[#allocation5 + $0x45c] ss:$24 sps:$4 sm:$0xff]  }
 0x1d3   :  { %7514 = vmatprep.subr.bf16.mxu0 %v11072_v55  ;;  %v11127_v55 = vld [vmem:[#allocation5 + $0x458] ss:$24 sps:$4 sm:$0xff]   ;;  %v11132_v56 = vld [vmem:[#allocation5 + $0x2284] ss:$24 sps:$4 sm:$0xff]  }
 0x1d5   :  { %7597 = vmatpush1.bf16.msra.mxu1 %v11073_v58  ;;  %v11130_v58 = vld [vmem:[#allocation5 + $0x2280] ss:$24 sps:$4 sm:$0xff]  }
 0x1d6   :  { %7515 = vmatpush1.bf16.msra.mxu0 %v11070_v57  ;;  %7598 = vmatprep.subr.bf16.mxu1 %v11081_v60  ;;  %v11135_v57 = vld [vmem:[#allocation5 + $0x48c] ss:$24 sps:$4 sm:$0xff]  }
 0x1d7   :  { %7516 = vmatprep.subr.bf16.mxu0 %v11078_v59  ;;  %v11133_v59 = vld [vmem:[#allocation5 + $0x488] ss:$24 sps:$4 sm:$0xff]   ;;  %v11138_v60 = vld [vmem:[#allocation5 + $0x22b4] ss:$24 sps:$4 sm:$0xff]  }
 0x1d9   :  { %7599 = vmatpush1.bf16.msra.mxu1 %v11079_v62  ;;  %v11136_v62 = vld [vmem:[#allocation5 + $0x22b0] ss:$24 sps:$4 sm:$0xff]  }
 0x1da   :  { %7517 = vmatpush1.bf16.msra.mxu0 %v11076_v61  ;;  %7609 = vmatprep.subr.bf16.mxu1 %v11087_v1  ;;  %v11141_v61 = vld [vmem:[#allocation5 + $0x4bc] ss:$24 sps:$4 sm:$0xff]   ;;  %v11147_v1 = vld [vmem:[#allocation5 + $0x4ec] ss:$24 sps:$4 sm:$0xff]  }
 0x1db   :  { %7527 = vmatprep.subr.bf16.mxu0 %v11084_v63  ;;  %v11139_v63 = vld [vmem:[#allocation5 + $0x4b8] ss:$24 sps:$4 sm:$0xff]  }
 0x1dc   :  { %7601 = vmatmul.mubr.bf16.vlgmr.msra.gmra.mrb[4].mxu1 %v12541_v10 }
 0x1dd   :  { %7519 = vmatmul.mubr.bf16.vlgmr.msra.gmra.mrb[0].mxu0 %v12599_v5  ;;  %7610 = vmatpush1.bf16.msra.mxu1 %v11085_v7  ;;  %v11150_v7 = vld [vmem:[#allocation5 + $0x2314] ss:$24 sps:$4 sm:$0xff]  }
 0x1de   :  { %7528 = vmatpush1.bf16.msra.mxu0 %v11082_v6  ;;  %7611 = vmatprep.subr.bf16.mxu1 %v11093_v13  ;;  %v11145_v6 = vld [vmem:[#allocation5 + $0x4e8] ss:$24 sps:$4 sm:$0xff]  }
 0x1df   :  { %7529 = vmatprep.subr.bf16.mxu0 %v11090_v12  ;;  %7559 = vmatprep.mubr.bf16.mxu0 %v12601_v14  ;;  %v11153_v12 = vld [vmem:[#allocation5 + $0x51c] ss:$24 sps:$4 sm:$0xff]   ;;  %v11148_v13 = vld [vmem:[#allocation5 + $0x2310] ss:$24 sps:$4 sm:$0xff]  }
 0x1e0   :  { %7641 = vmatprep.mubr.bf16.mxu1 %v12547_v36 }
 0x1e1   :  { %7612 = vmatpush1.bf16.msra.mxu1 %v11091_v16  ;;  %v11156_v16 = vld [vmem:[#allocation5 + $0x2344] ss:$24 sps:$4 sm:$0xff]  }
 0x1e2   :  { %7530 = vmatpush1.bf16.msra.mxu0 %v11088_v15  ;;  %7613 = vmatprep.subr.bf16.mxu1 %v11099_v18  ;;  %v11151_v15 = vld [vmem:[#allocation5 + $0x518] ss:$24 sps:$4 sm:$0xff]  }
 0x1e3   :  { %7531 = vmatprep.subr.bf16.mxu0 %v11096_v17  ;;  %v11159_v17 = vld [vmem:[#allocation5 + $0x54c] ss:$24 sps:$4 sm:$0xff]   ;;  %v11154_v18 = vld [vmem:[#allocation5 + $0x2340] ss:$24 sps:$4 sm:$0xff]  }
 0x1e5   :  { %7614 = vmatpush1.bf16.msra.mxu1 %v11097_v20  ;;  %v11162_v20 = vld [vmem:[#allocation5 + $0x2374] ss:$24 sps:$4 sm:$0xff]  }
 0x1e6   :  { %7532 = vmatpush1.bf16.msra.mxu0 %v11094_v19  ;;  %7615 = vmatprep.subr.bf16.mxu1 %v11105_v24  ;;  %v11157_v19 = vld [vmem:[#allocation5 + $0x548] ss:$24 sps:$4 sm:$0xff]  }
 0x1e7   :  { %7533 = vmatprep.subr.bf16.mxu0 %v11102_v21  ;;  %v11165_v21 = vld [vmem:[#allocation5 + $0x57c] ss:$24 sps:$4 sm:$0xff]   ;;  %v11160_v24 = vld [vmem:[#allocation5 + $0x2370] ss:$24 sps:$4 sm:$0xff]  }
 0x1e9   :  { %7616 = vmatpush1.bf16.msra.mxu1 %v11103_v26  ;;  %v11168_v26 = vld [vmem:[#allocation5 + $0x23a4] ss:$24 sps:$4 sm:$0xff]  }
 0x1ea   :  { %7534 = vmatpush1.bf16.msra.mxu0 %v11100_v25  ;;  %7617 = vmatprep.subr.bf16.mxu1 %v11111_v29  ;;  %v11163_v25 = vld [vmem:[#allocation5 + $0x578] ss:$24 sps:$4 sm:$0xff]  }
 0x1eb   :  { %7535 = vmatprep.subr.bf16.mxu0 %v11108_v27  ;;  %v11171_v27 = vld [vmem:[#allocation5 + $0x5ac] ss:$24 sps:$4 sm:$0xff]   ;;  %v11166_v29 = vld [vmem:[#allocation5 + $0x23a0] ss:$24 sps:$4 sm:$0xff]  }
 0x1ed   :  { %7618 = vmatpush1.bf16.msra.mxu1 %v11109_v31  ;;  %v11174_v31 = vld [vmem:[#allocation5 + $0x23d4] ss:$24 sps:$4 sm:$0xff]  }
 0x1ee   :  { %7536 = vmatpush1.bf16.msra.mxu0 %v11106_v30  ;;  %7619 = vmatprep.subr.bf16.mxu1 %v11117_v37  ;;  %v11169_v30 = vld [vmem:[#allocation5 + $0x5a8] ss:$24 sps:$4 sm:$0xff]  }
 0x1ef   :  { %7537 = vmatprep.subr.bf16.mxu0 %v11114_v35  ;;  %v11177_v35 = vld [vmem:[#allocation5 + $0x5dc] ss:$24 sps:$4 sm:$0xff]   ;;  %v11172_v37 = vld [vmem:[#allocation5 + $0x23d0] ss:$24 sps:$4 sm:$0xff]  }
 0x1f1   :  { %7620 = vmatpush1.bf16.msra.mxu1 %v11115_v39  ;;  %v106_v39 = vld [vmem:[#allocation2 + $0xb0] sm:$0xff] }
 0x1f2   :  { %7538 = vmatpush1.bf16.msra.mxu0 %v11112_v38  ;;  %7621 = vmatprep.subr.bf16.mxu1 %v11123_v45  ;;  %v11175_v38 = vld [vmem:[#allocation5 + $0x5d8] ss:$24 sps:$4 sm:$0xff]   ;;  %v11183_v45 = vld [vmem:[#allocation5 + $0x14] ss:$24 sps:$4 sm:$0xff]  }
 0x1f3   :  { %7539 = vmatprep.subr.bf16.mxu0 %v11120_v44  ;;  %v11180_v44 = vld [vmem:[#allocation5 + $0x60c] ss:$24 sps:$4 sm:$0xff]  }
 0x1f5   :  { %7622 = vmatpush1.bf16.msra.mxu1 %v11121_v47  ;;  %v11178_v47 = vld [vmem:[#allocation5 + $0x608] ss:$24 sps:$4 sm:$0xff]  }
 0x1f6   :  { %7540 = vmatpush1.bf16.msra.mxu0 %v11118_v46  ;;  %7623 = vmatprep.subr.bf16.mxu1 %v11129_v52  ;;  %v12607_v46 = vpack.c.bf16 %v106_v39, %v106_v39  ;;  %v11186_v52 = vld [vmem:[#allocation5 + $0x63c] ss:$24 sps:$4 sm:$0xff]   ;;  %v11240_v39 = vld [vmem:[#allocation5 + $0x7ec] ss:$24 sps:$4 sm:$0xff]  }
 0x1f7   :  { %7541 = vmatprep.subr.bf16.mxu0 %v11126_v51  ;;  %v11181_v51 = vld [vmem:[#allocation5 + $0x10] ss:$24 sps:$4 sm:$0xff]  }
 0x1f9   :  { %7624 = vmatpush1.bf16.msra.mxu1 %v11127_v55  ;;  %v11184_v55 = vld [vmem:[#allocation5 + $0x638] ss:$24 sps:$4 sm:$0xff]  }
 0x1fa   :  { %7542 = vmatpush1.bf16.msra.mxu0 %v11124_v54  ;;  %7625 = vmatprep.subr.bf16.mxu1 %v11135_v57  ;;  %v11189_v54 = vld [vmem:[#allocation5 + $0x44] ss:$24 sps:$4 sm:$0xff]  }
 0x1fb   :  { %7543 = vmatprep.subr.bf16.mxu0 %v11132_v56  ;;  %v11187_v56 = vld [vmem:[#allocation5 + $0x40] ss:$24 sps:$4 sm:$0xff]   ;;  %v11192_v57 = vld [vmem:[#allocation5 + $0x66c] ss:$24 sps:$4 sm:$0xff]  }
 0x1fd   :  { %7626 = vmatpush1.bf16.msra.mxu1 %v11133_v59  ;;  %v11190_v59 = vld [vmem:[#allocation5 + $0x668] ss:$24 sps:$4 sm:$0xff]  }
 0x1fe   :  { %7544 = vmatpush1.bf16.msra.mxu0 %v11130_v58  ;;  %7627 = vmatprep.subr.bf16.mxu1 %v11141_v61  ;;  %v11195_v58 = vld [vmem:[#allocation5 + $0x74] ss:$24 sps:$4 sm:$0xff]  }
 0x1ff   :  { %7545 = vmatprep.subr.bf16.mxu0 %v11138_v60  ;;  %v11193_v60 = vld [vmem:[#allocation5 + $0x70] ss:$24 sps:$4 sm:$0xff]   ;;  %v11198_v61 = vld [vmem:[#allocation5 + $0x69c] ss:$24 sps:$4 sm:$0xff]  }
 0x201   :  { %7628 = vmatpush1.bf16.msra.mxu1 %v11139_v63  ;;  %v11196_v63 = vld [vmem:[#allocation5 + $0x698] ss:$24 sps:$4 sm:$0xff]  }
 0x202   :  { %7546 = vmatpush1.bf16.msra.mxu0 %v11136_v62  ;;  %7629 = vmatprep.subr.bf16.mxu1 %v11147_v1  ;;  %v11201_v62 = vld [vmem:[#allocation5 + $0xa4] ss:$24 sps:$4 sm:$0xff]  }
 0x203   :  { %7547 = vmatprep.subr.bf16.mxu0 %v11144_v0  ;;  %v11199_v0 = vld [vmem:[#allocation5 + $0xa0] ss:$24 sps:$4 sm:$0xff]   ;;  %v11204_v1 = vld [vmem:[#allocation5 + $0x6cc] ss:$24 sps:$4 sm:$0xff]  }
 0x205   :  { %7630 = vmatpush1.bf16.msra.mxu1 %v11145_v6  ;;  %v11202_v6 = vld [vmem:[#allocation5 + $0x6c8] ss:$24 sps:$4 sm:$0xff]  }
 0x206   :  { %7548 = vmatpush1.bf16.msra.mxu0 %v11142_v4  ;;  %7631 = vmatprep.subr.bf16.mxu1 %v11153_v12  ;;  %v11207_v4 = vld [vmem:[#allocation5 + $0xd4] ss:$24 sps:$4 sm:$0xff]   ;;  %v11213_v12 = vld [vmem:[#allocation5 + $0x104] ss:$24 sps:$4 sm:$0xff]  }
 0x207   :  { %7549 = vmatprep.subr.bf16.mxu0 %v11150_v7  ;;  %v11210_v7 = vld [vmem:[#allocation5 + $0x6fc] ss:$24 sps:$4 sm:$0xff]  }
 0x209   :  { %7632 = vmatpush1.bf16.msra.mxu1 %v11151_v15  ;;  %v11211_v15 = vld [vmem:[#allocation5 + $0x100] ss:$24 sps:$4 sm:$0xff]  }
 0x20a   :  { %7550 = vmatpush1.bf16.msra.mxu0 %v11148_v13  ;;  %7633 = vmatprep.subr.bf16.mxu1 %v11159_v17  ;;  %v11208_v13 = vld [vmem:[#allocation5 + $0x6f8] ss:$24 sps:$4 sm:$0xff]   ;;  %v11219_v17 = vld [vmem:[#allocation5 + $0x134] ss:$24 sps:$4 sm:$0xff]  }
 0x20b   :  { %7551 = vmatprep.subr.bf16.mxu0 %v11156_v16  ;;  %v11216_v16 = vld [vmem:[#allocation5 + $0x72c] ss:$24 sps:$4 sm:$0xff]  }
 0x20d   :  { %7634 = vmatpush1.bf16.msra.mxu1 %v11157_v19  ;;  %v11217_v19 = vld [vmem:[#allocation5 + $0x130] ss:$24 sps:$4 sm:$0xff]  }
 0x20e   :  { %7552 = vmatpush1.bf16.msra.mxu0 %v11154_v18  ;;  %7635 = vmatprep.subr.bf16.mxu1 %v11165_v21  ;;  %v11214_v18 = vld [vmem:[#allocation5 + $0x728] ss:$24 sps:$4 sm:$0xff]   ;;  %v11225_v21 = vld [vmem:[#allocation5 + $0x164] ss:$24 sps:$4 sm:$0xff]  }
 0x20f   :  { %7553 = vmatprep.subr.bf16.mxu0 %v11162_v20  ;;  %v11222_v20 = vld [vmem:[#allocation5 + $0x75c] ss:$24 sps:$4 sm:$0xff]  }
 0x211   :  { %7636 = vmatpush1.bf16.msra.mxu1 %v11163_v25  ;;  %v11223_v25 = vld [vmem:[#allocation5 + $0x160] ss:$24 sps:$4 sm:$0xff]  }
 0x212   :  { %7554 = vmatpush1.bf16.msra.mxu0 %v11160_v24  ;;  %7637 = vmatprep.subr.bf16.mxu1 %v11171_v27  ;;  %v11220_v24 = vld [vmem:[#allocation5 + $0x758] ss:$24 sps:$4 sm:$0xff]   ;;  %v11231_v27 = vld [vmem:[#allocation5 + $0x194] ss:$24 sps:$4 sm:$0xff]  }
 0x213   :  { %7555 = vmatprep.subr.bf16.mxu0 %v11168_v26  ;;  %v11228_v26 = vld [vmem:[#allocation5 + $0x78c] ss:$24 sps:$4 sm:$0xff]  }
 0x215   :  { %7638 = vmatpush1.bf16.msra.mxu1 %v11169_v30  ;;  %v11229_v30 = vld [vmem:[#allocation5 + $0x190] ss:$24 sps:$4 sm:$0xff]  }
 0x216   :  { %7556 = vmatpush1.bf16.msra.mxu0 %v11166_v29  ;;  %7639 = vmatprep.subr.bf16.mxu1 %v11177_v35  ;;  %v11226_v29 = vld [vmem:[#allocation5 + $0x788] ss:$24 sps:$4 sm:$0xff]   ;;  %v11237_v35 = vld [vmem:[#allocation5 + $0x1c4] ss:$24 sps:$4 sm:$0xff]  }
 0x217   :  { %7557 = vmatprep.subr.bf16.mxu0 %v11174_v31  ;;  %v11234_v31 = vld [vmem:[#allocation5 + $0x7bc] ss:$24 sps:$4 sm:$0xff]  }
 0x219   :  { %7640 = vmatpush1.bf16.msra.mxu1 %v11175_v38  ;;  %v11235_v38 = vld [vmem:[#allocation5 + $0x1c0] ss:$24 sps:$4 sm:$0xff]  }
 0x21a   :  { %7558 = vmatpush1.bf16.msra.mxu0 %v11172_v37  ;;  %7650 = vmatprep.subr.bf16.mxu1 %v11180_v44  ;;  %v11232_v37 = vld [vmem:[#allocation5 + $0x7b8] ss:$24 sps:$4 sm:$0xff]   ;;  %v11243_v44 = vld [vmem:[#allocation5 + $0x1f4] ss:$24 sps:$4 sm:$0xff]  }
 0x21b   :  { %8060 = vmatprep.subr.bf16.mxu0 %v11183_v45  ;;  %v11238_v45 = vld [vmem:[#allocation5 + $0x7e8] ss:$24 sps:$4 sm:$0xff]  }
 0x21c   :  { %7642 = vmatmul.mubr.bf16.vlgmr.msra.gmra.mrb[4].mxu1 %v12553_v22 }
 0x21d   :  { %7560 = vmatmul.mubr.bf16.vlgmr.msra.gmra.mrb[0].mxu0 %v12607_v46  ;;  %7651 = vmatpush1.bf16.msra.mxu1 %v11178_v47  ;;  %v11241_v47 = vld [vmem:[#allocation5 + $0x1f0] ss:$24 sps:$4 sm:$0xff]  }
 0x21e   :  { %8061 = vmatpush1.bf16.msra.mxu0 %v11181_v51  ;;  %7652 = vmatprep.subr.bf16.mxu1 %v11186_v52  ;;  %v11246_v51 = vld [vmem:[#allocation5 + $0x81c] ss:$24 sps:$4 sm:$0xff]  }
 0x21f   :  { %8062 = vmatprep.subr.bf16.mxu0 %v11189_v54  ;;  %7682 = vmatprep.mubr.bf16.mxu1 %v12559_v28  ;;  %v11249_v52 = vld [vmem:[#allocation5 + $0x224] ss:$24 sps:$4 sm:$0xff]   ;;  %v11244_v54 = vld [vmem:[#allocation5 + $0x818] ss:$24 sps:$4 sm:$0xff]  }
 0x220   :  { %8092 = vmatprep.mubr.bf16.mxu0 %v12535_v48  ;;  %v11205_v48 = vld [vmem:[#allocation5 + $0xd0] ss:$24 sps:$4 sm:$0xff]  }
 0x221   :  { %7653 = vmatpush1.bf16.msra.mxu1 %v11184_v55  ;;  %v11247_v55 = vld [vmem:[#allocation5 + $0x220] ss:$24 sps:$4 sm:$0xff]  }
 0x222   :  { %8063 = vmatpush1.bf16.msra.mxu0 %v11187_v56  ;;  %7654 = vmatprep.subr.bf16.mxu1 %v11192_v57  ;;  %v11252_v56 = vld [vmem:[#allocation5 + $0x84c] ss:$24 sps:$4 sm:$0xff]  }
 0x223   :  { %8064 = vmatprep.subr.bf16.mxu0 %v11195_v58  ;;  %v11255_v57 = vld [vmem:[#allocation5 + $0x254] ss:$24 sps:$4 sm:$0xff]   ;;  %v11250_v58 = vld [vmem:[#allocation5 + $0x848] ss:$24 sps:$4 sm:$0xff]  }
 0x225   :  { %7655 = vmatpush1.bf16.msra.mxu1 %v11190_v59  ;;  %v11253_v59 = vld [vmem:[#allocation5 + $0x250] ss:$24 sps:$4 sm:$0xff]  }
 0x226   :  { %8065 = vmatpush1.bf16.msra.mxu0 %v11193_v60  ;;  %7656 = vmatprep.subr.bf16.mxu1 %v11198_v61  ;;  %v11258_v60 = vld [vmem:[#allocation5 + $0x87c] ss:$24 sps:$4 sm:$0xff]  }
 0x227   :  { %8066 = vmatprep.subr.bf16.mxu0 %v11201_v62  ;;  %v11261_v61 = vld [vmem:[#allocation5 + $0x284] ss:$24 sps:$4 sm:$0xff]   ;;  %v11256_v62 = vld [vmem:[#allocation5 + $0x878] ss:$24 sps:$4 sm:$0xff]  }
 0x229   :  { %7657 = vmatpush1.bf16.msra.mxu1 %v11196_v63  ;;  %v11259_v63 = vld [vmem:[#allocation5 + $0x280] ss:$24 sps:$4 sm:$0xff]  }
 0x22a   :  { %8067 = vmatpush1.bf16.msra.mxu0 %v11199_v0  ;;  %7658 = vmatprep.subr.bf16.mxu1 %v11204_v1  ;;  %v11264_v0 = vld [vmem:[#allocation5 + $0x8ac] ss:$24 sps:$4 sm:$0xff]  }
 0x22b   :  { %8068 = vmatprep.subr.bf16.mxu0 %v11207_v4  ;;  %v11267_v1 = vld [vmem:[#allocation5 + $0x2b4] ss:$24 sps:$4 sm:$0xff]   ;;  %v11262_v4 = vld [vmem:[#allocation5 + $0x8a8] ss:$24 sps:$4 sm:$0xff]  }
 0x22d   :  { %7659 = vmatpush1.bf16.msra.mxu1 %v11202_v6  ;;  %v11265_v6 = vld [vmem:[#allocation5 + $0x2b0] ss:$24 sps:$4 sm:$0xff]  }
 0x22e   :  { %8069 = vmatpush1.bf16.msra.mxu0 %v11205_v48  ;;  %7660 = vmatprep.subr.bf16.mxu1 %v11210_v7  ;;  %v11270_v48 = vld [vmem:[#allocation5 + $0x8dc] ss:$24 sps:$4 sm:$0xff]  }
 0x22f   :  { %8070 = vmatprep.subr.bf16.mxu0 %v11213_v12  ;;  %v11273_v7 = vld [vmem:[#allocation5 + $0x2e4] ss:$24 sps:$4 sm:$0xff]   ;;  %v11268_v12 = vld [vmem:[#allocation5 + $0x8d8] ss:$24 sps:$4 sm:$0xff]  }
 0x231   :  { %7661 = vmatpush1.bf16.msra.mxu1 %v11208_v13  ;;  %v11271_v13 = vld [vmem:[#allocation5 + $0x2e0] ss:$24 sps:$4 sm:$0xff]  }
 0x232   :  { %8071 = vmatpush1.bf16.msra.mxu0 %v11211_v15  ;;  %7662 = vmatprep.subr.bf16.mxu1 %v11216_v16  ;;  %v11276_v15 = vld [vmem:[#allocation5 + $0x90c] ss:$24 sps:$4 sm:$0xff]  }
 0x233   :  { %8072 = vmatprep.subr.bf16.mxu0 %v11219_v17  ;;  %v11279_v16 = vld [vmem:[#allocation5 + $0x314] ss:$24 sps:$4 sm:$0xff]   ;;  %v11274_v17 = vld [vmem:[#allocation5 + $0x908] ss:$24 sps:$4 sm:$0xff]  }
 0x235   :  { %7663 = vmatpush1.bf16.msra.mxu1 %v11214_v18  ;;  %v11277_v18 = vld [vmem:[#allocation5 + $0x310] ss:$24 sps:$4 sm:$0xff]  }
 0x236   :  { %8073 = vmatpush1.bf16.msra.mxu0 %v11217_v19  ;;  %7664 = vmatprep.subr.bf16.mxu1 %v11222_v20  ;;  %v11282_v19 = vld [vmem:[#allocation5 + $0x93c] ss:$24 sps:$4 sm:$0xff]  }
 0x237   :  { %8074 = vmatprep.subr.bf16.mxu0 %v11225_v21  ;;  %v11285_v20 = vld [vmem:[#allocation5 + $0x344] ss:$24 sps:$4 sm:$0xff]   ;;  %v11280_v21 = vld [vmem:[#allocation5 + $0x938] ss:$24 sps:$4 sm:$0xff]  }
 0x239   :  { %7665 = vmatpush1.bf16.msra.mxu1 %v11220_v24  ;;  %v11283_v24 = vld [vmem:[#allocation5 + $0x340] ss:$24 sps:$4 sm:$0xff]  }
 0x23a   :  { %8075 = vmatpush1.bf16.msra.mxu0 %v11223_v25  ;;  %7666 = vmatprep.subr.bf16.mxu1 %v11228_v26  ;;  %v11288_v25 = vld [vmem:[#allocation5 + $0x96c] ss:$24 sps:$4 sm:$0xff]  }
 0x23b   :  { %8076 = vmatprep.subr.bf16.mxu0 %v11231_v27  ;;  %v11291_v26 = vld [vmem:[#allocation5 + $0x374] ss:$24 sps:$4 sm:$0xff]   ;;  %v11286_v27 = vld [vmem:[#allocation5 + $0x968] ss:$24 sps:$4 sm:$0xff]  }
 0x23d   :  { %7667 = vmatpush1.bf16.msra.mxu1 %v11226_v29  ;;  %v11289_v29 = vld [vmem:[#allocation5 + $0x370] ss:$24 sps:$4 sm:$0xff]  }
 0x23e   :  { %8077 = vmatpush1.bf16.msra.mxu0 %v11229_v30  ;;  %7668 = vmatprep.subr.bf16.mxu1 %v11234_v31  ;;  %v11294_v30 = vld [vmem:[#allocation5 + $0x99c] ss:$24 sps:$4 sm:$0xff]   ;;  %v11292_v31 = vld [vmem:[#allocation5 + $0x998] ss:$24 sps:$4 sm:$0xff]  }
 0x23f   :  { %8078 = vmatprep.subr.bf16.mxu0 %v11237_v35  ;;  %v11295_v35 = vld [vmem:[#allocation5 + $0x3a0] ss:$24 sps:$4 sm:$0xff]  }
 0x241   :  { %7669 = vmatpush1.bf16.msra.mxu1 %v11232_v37  ;;  %v11300_v37 = vld [vmem:[#allocation5 + $0x9cc] ss:$24 sps:$4 sm:$0xff]  }
 0x242   :  { %8079 = vmatpush1.bf16.msra.mxu0 %v11235_v38  ;;  %7670 = vmatprep.subr.bf16.mxu1 %v11240_v39  ;;  %v11303_v38 = vld [vmem:[#allocation5 + $0x3d4] ss:$24 sps:$4 sm:$0xff]   ;;  %v11298_v39 = vld [vmem:[#allocation5 + $0x9c8] ss:$24 sps:$4 sm:$0xff]  }
 0x243   :  { %8080 = vmatprep.subr.bf16.mxu0 %v11243_v44  ;;  %v11306_v44 = vld [vmem:[#allocation5 + $0x9fc] ss:$24 sps:$4 sm:$0xff]  }
 0x245   :  { %7671 = vmatpush1.bf16.msra.mxu1 %v11238_v45  ;;  %v11309_v45 = vld [vmem:[#allocation5 + $0x404] ss:$24 sps:$4 sm:$0xff]  }
 0x246   :  { %8081 = vmatpush1.bf16.msra.mxu0 %v11241_v47  ;;  %7672 = vmatprep.subr.bf16.mxu1 %v11246_v51  ;;  %v11304_v47 = vld [vmem:[#allocation5 + $0x9f8] ss:$24 sps:$4 sm:$0xff]  }
 0x247   :  { %8082 = vmatprep.subr.bf16.mxu0 %v11249_v52  ;;  %v11307_v51 = vld [vmem:[#allocation5 + $0x400] ss:$24 sps:$4 sm:$0xff]   ;;  %v11312_v52 = vld [vmem:[#allocation5 + $0xa2c] ss:$24 sps:$4 sm:$0xff]  }
 0x249   :  { %7673 = vmatpush1.bf16.msra.mxu1 %v11244_v54  ;;  %v11315_v54 = vld [vmem:[#allocation5 + $0x434] ss:$24 sps:$4 sm:$0xff]  }
 0x24a   :  { %8083 = vmatpush1.bf16.msra.mxu0 %v11247_v55  ;;  %7674 = vmatprep.subr.bf16.mxu1 %v11252_v56  ;;  %v11310_v56 = vld [vmem:[#allocation5 + $0xa28] ss:$24 sps:$4 sm:$0xff]  }
 0x24b   :  { %8084 = vmatprep.subr.bf16.mxu0 %v11255_v57  ;;  %v11313_v57 = vld [vmem:[#allocation5 + $0x430] ss:$24 sps:$4 sm:$0xff]  }
 0x24d   :  { %7675 = vmatpush1.bf16.msra.mxu1 %v11250_v58 }
 0x24e   :  { %8085 = vmatpush1.bf16.msra.mxu0 %v11253_v59  ;;  %7676 = vmatprep.subr.bf16.mxu1 %v11258_v60 }
 0x24f   :  { %8086 = vmatprep.subr.bf16.mxu0 %v11261_v61  ;;  %v11318_v61 = vld [vmem:[#allocation5 + $0xa5c] ss:$24 sps:$4 sm:$0xff]  }
 0x251   :  { %7677 = vmatpush1.bf16.msra.mxu1 %v11256_v62  ;;  %v11321_v62 = vld [vmem:[#allocation5 + $0x464] ss:$24 sps:$4 sm:$0xff]  }
 0x252   :  { %8087 = vmatpush1.bf16.msra.mxu0 %v11259_v63  ;;  %7678 = vmatprep.subr.bf16.mxu1 %v11264_v0  ;;  %v11316_v63 = vld [vmem:[#allocation5 + $0xa58] ss:$24 sps:$4 sm:$0xff]  }
 0x253   :  { %8088 = vmatprep.subr.bf16.mxu0 %v11267_v1  ;;  %v11319_v0 = vld [vmem:[#allocation5 + $0x460] ss:$24 sps:$4 sm:$0xff]   ;;  %v11324_v1 = vld [vmem:[#allocation5 + $0xa8c] ss:$24 sps:$4 sm:$0xff]  }
 0x255   :  { %7679 = vmatpush1.bf16.msra.mxu1 %v11262_v4  ;;  %v11327_v4 = vld [vmem:[#allocation5 + $0x494] ss:$24 sps:$4 sm:$0xff]  }
 0x256   :  { %8089 = vmatpush1.bf16.msra.mxu0 %v11265_v6  ;;  %7680 = vmatprep.subr.bf16.mxu1 %v11270_v48  ;;  %v11322_v6 = vld [vmem:[#allocation5 + $0xa88] ss:$24 sps:$4 sm:$0xff]  }
 0x257   :  { %8090 = vmatprep.subr.bf16.mxu0 %v11273_v7  ;;  %v11325_v48 = vld [vmem:[#allocation5 + $0x490] ss:$24 sps:$4 sm:$0xff]   ;;  %v11330_v7 = vld [vmem:[#allocation5 + $0xabc] ss:$24 sps:$4 sm:$0xff]  }
 0x259   :  { %7681 = vmatpush1.bf16.msra.mxu1 %v11268_v12  ;;  %v11333_v12 = vld [vmem:[#allocation5 + $0x4c4] ss:$24 sps:$4 sm:$0xff]  }
 0x25a   :  { %8091 = vmatpush1.bf16.msra.mxu0 %v11271_v13  ;;  %7691 = vmatprep.subr.bf16.mxu1 %v11276_v15  ;;  %v11328_v13 = vld [vmem:[#allocation5 + $0xab8] ss:$24 sps:$4 sm:$0xff]  }
 0x25b   :  { %8101 = vmatprep.subr.bf16.mxu0 %v11279_v16  ;;  %v11331_v15 = vld [vmem:[#allocation5 + $0x4c0] ss:$24 sps:$4 sm:$0xff]   ;;  %v11336_v16 = vld [vmem:[#allocation5 + $0xaec] ss:$24 sps:$4 sm:$0xff]  }
 0x25c   :  { %7683 = vmatmul.mubr.bf16.vlgmr.msra.gmra.mrb[4].mxu1 %v12565_v42 }
 0x25d   :  { %8093 = vmatmul.mubr.bf16.vlgmr.msra.gmra.mrb[4].mxu0 %v12541_v10  ;;  %7692 = vmatpush1.bf16.msra.mxu1 %v11274_v17  ;;  %v11297_v10 = vld [vmem:[#allocation5 + $0x3a4] ss:$24 sps:$4 sm:$0xff]   ;;  %v11339_v17 = vld [vmem:[#allocation5 + $0x4f4] ss:$24 sps:$4 sm:$0xff]  }
 0x25e   :  { %8102 = vmatpush1.bf16.msra.mxu0 %v11277_v18  ;;  %7693 = vmatprep.subr.bf16.mxu1 %v11282_v19  ;;  %v11334_v18 = vld [vmem:[#allocation5 + $0xae8] ss:$24 sps:$4 sm:$0xff]  }
 0x25f   :  { %8103 = vmatprep.subr.bf16.mxu0 %v11285_v20  ;;  %7723 = vmatprep.mubr.bf16.mxu1 %v12569_v49  ;;  %v11337_v19 = vld [vmem:[#allocation5 + $0x4f0] ss:$24 sps:$4 sm:$0xff]   ;;  %v11342_v20 = vld [vmem:[#allocation5 + $0xb1c] ss:$24 sps:$4 sm:$0xff]  }
 0x260   :  { %8133 = vmatprep.mubr.bf16.mxu0 %v12547_v36  ;;  %v11301_v36 = vld [vmem:[#allocation5 + $0x3d0] ss:$24 sps:$4 sm:$0xff]  }
 0x261   :  { %7694 = vmatpush1.bf16.msra.mxu1 %v11280_v21  ;;  %v11345_v21 = vld [vmem:[#allocation5 + $0x524] ss:$24 sps:$4 sm:$0xff]  }
 0x262   :  { %8104 = vmatpush1.bf16.msra.mxu0 %v11283_v24  ;;  %7695 = vmatprep.subr.bf16.mxu1 %v11288_v25  ;;  %v11340_v24 = vld [vmem:[#allocation5 + $0xb18] ss:$24 sps:$4 sm:$0xff]  }
 0x263   :  { %8105 = vmatprep.subr.bf16.mxu0 %v11291_v26  ;;  %v11343_v25 = vld [vmem:[#allocation5 + $0x520] ss:$24 sps:$4 sm:$0xff]   ;;  %v11348_v26 = vld [vmem:[#allocation5 + $0xb4c] ss:$24 sps:$4 sm:$0xff]  }
 0x265   :  { %7696 = vmatpush1.bf16.msra.mxu1 %v11286_v27  ;;  %v11351_v27 = vld [vmem:[#allocation5 + $0x554] ss:$24 sps:$4 sm:$0xff]  }
 0x266   :  { %8106 = vmatpush1.bf16.msra.mxu0 %v11289_v29  ;;  %7697 = vmatprep.subr.bf16.mxu1 %v11294_v30  ;;  %v11346_v29 = vld [vmem:[#allocation5 + $0xb48] ss:$24 sps:$4 sm:$0xff]  }
 0x267   :  { %8107 = vmatprep.subr.bf16.mxu0 %v11297_v10  ;;  %v11349_v30 = vld [vmem:[#allocation5 + $0x550] ss:$24 sps:$4 sm:$0xff]   ;;  %v11354_v10 = vld [vmem:[#allocation5 + $0xb7c] ss:$24 sps:$4 sm:$0xff]  }
 0x269   :  { %7698 = vmatpush1.bf16.msra.mxu1 %v11292_v31  ;;  %v11357_v31 = vld [vmem:[#allocation5 + $0x584] ss:$24 sps:$4 sm:$0xff]  }
 0x26a   :  { %8108 = vmatpush1.bf16.msra.mxu0 %v11295_v35  ;;  %7699 = vmatprep.subr.bf16.mxu1 %v11300_v37  ;;  %v11352_v35 = vld [vmem:[#allocation5 + $0xb78] ss:$24 sps:$4 sm:$0xff]  }
 0x26b   :  { %8109 = vmatprep.subr.bf16.mxu0 %v11303_v38  ;;  %v11355_v37 = vld [vmem:[#allocation5 + $0x580] ss:$24 sps:$4 sm:$0xff]   ;;  %v11360_v38 = vld [vmem:[#allocation5 + $0xbac] ss:$24 sps:$4 sm:$0xff]  }
 0x26d   :  { %7700 = vmatpush1.bf16.msra.mxu1 %v11298_v39  ;;  %v11363_v39 = vld [vmem:[#allocation5 + $0x5b4] ss:$24 sps:$4 sm:$0xff]  }
 0x26e   :  { %8110 = vmatpush1.bf16.msra.mxu0 %v11301_v36  ;;  %7701 = vmatprep.subr.bf16.mxu1 %v11306_v44  ;;  %v11358_v36 = vld [vmem:[#allocation5 + $0xba8] ss:$24 sps:$4 sm:$0xff]  }
 0x26f   :  { %8111 = vmatprep.subr.bf16.mxu0 %v11309_v45  ;;  %v12617_v55 = vpop.f32.mrb[0].mxu1  ;;  %v11361_v44 = vld [vmem:[#allocation5 + $0x5b0] ss:$24 sps:$4 sm:$0xff]   ;;  %v11366_v45 = vld [vmem:[#allocation5 + $0xbdc] ss:$24 sps:$4 sm:$0xff]  }
 0x270   :  { %v12619_v58 = vpop.f32.mrb[1].mxu1 }
 0x271   :  { %v7278_v59 = vpop.f32.mrb[2].mxu1  ;;  %7702 = vmatpush1.bf16.msra.mxu1 %v11304_v47  ;;  %v11369_v47 = vld [vmem:[#allocation5 + $0x5e4] ss:$24 sps:$4 sm:$0xff]  }
 0x272   :  { %8112 = vmatpush1.bf16.msra.mxu0 %v11307_v51  ;;  %v7279_v60 = vpop.f32.mrb[3].mxu1  ;;  %7703 = vmatprep.subr.bf16.mxu1 %v11312_v52  ;;  %v11364_v51 = vld [vmem:[#allocation5 + $0xbd8] ss:$24 sps:$4 sm:$0xff]  }
 0x273   :  { %8113 = vmatprep.subr.bf16.mxu0 %v11315_v54  ;;  %v11367_v52 = vld [vmem:[#allocation5 + $0x5e0] ss:$24 sps:$4 sm:$0xff]   ;;  %v11372_v54 = vld [vmem:[#allocation5 + $0xc0c] ss:$24 sps:$4 sm:$0xff]   ;;  %v11373_v59 = vld [vmem:[#allocation5 + $0x610] ss:$24 sps:$4 sm:$0xff]  }
 0x274   :  { %v11378_v60 = vld [vmem:[#allocation5 + $0xc3c] ss:$24 sps:$4 sm:$0xff]  }
 0x275   :  { %7704 = vmatpush1.bf16.msra.mxu1 %v11310_v56  ;;  %v11375_v56 = vld [vmem:[#allocation5 + $0x614] ss:$24 sps:$4 sm:$0xff]  }
 0x276   :  { %8114 = vmatpush1.bf16.msra.mxu0 %v11313_v57  ;;  %7705 = vmatprep.subr.bf16.mxu1 %v11318_v61  ;;  %v11370_v57 = vld [vmem:[#allocation5 + $0xc08] ss:$24 sps:$4 sm:$0xff]   ;;  %v11381_v61 = vld [vmem:[#allocation5 + $0x644] ss:$24 sps:$4 sm:$0xff]  }
 0x277   :  { %8115 = vmatprep.subr.bf16.mxu0 %v11321_v62  ;;  %v11376_v62 = vld [vmem:[#allocation5 + $0xc38] ss:$24 sps:$4 sm:$0xff]  }
 0x279   :  { %7706 = vmatpush1.bf16.msra.mxu1 %v11316_v63  ;;  %v11379_v63 = vld [vmem:[#allocation5 + $0x640] ss:$24 sps:$4 sm:$0xff]  }
 0x27a   :  { %8116 = vmatpush1.bf16.msra.mxu0 %v11319_v0  ;;  %7707 = vmatprep.subr.bf16.mxu1 %v11324_v1  ;;  %v11384_v0 = vld [vmem:[#allocation5 + $0xc6c] ss:$24 sps:$4 sm:$0xff]  }
 0x27b   :  { %8117 = vmatprep.subr.bf16.mxu0 %v11327_v4  ;;  %v11387_v1 = vld [vmem:[#allocation5 + $0x674] ss:$24 sps:$4 sm:$0xff]   ;;  %v11382_v4 = vld [vmem:[#allocation5 + $0xc68] ss:$24 sps:$4 sm:$0xff]  }
 0x27d   :  { %7708 = vmatpush1.bf16.msra.mxu1 %v11322_v6  ;;  %v11385_v6 = vld [vmem:[#allocation5 + $0x670] ss:$24 sps:$4 sm:$0xff]  }
 0x27e   :  { %8118 = vmatpush1.bf16.msra.mxu0 %v11325_v48  ;;  %7709 = vmatprep.subr.bf16.mxu1 %v11330_v7  ;;  %v11390_v48 = vld [vmem:[#allocation5 + $0xc9c] ss:$24 sps:$4 sm:$0xff]   ;;  %v11388_v7 = vld [vmem:[#allocation5 + $0xc98] ss:$24 sps:$4 sm:$0xff]  }
 0x27f   :  { %8119 = vmatprep.subr.bf16.mxu0 %v11333_v12  ;;  %v11391_v12 = vld [vmem:[#allocation5 + $0x6a0] ss:$24 sps:$4 sm:$0xff]  }
 0x281   :  { %7710 = vmatpush1.bf16.msra.mxu1 %v11328_v13  ;;  %v11396_v13 = vld [vmem:[#allocation5 + $0xccc] ss:$24 sps:$4 sm:$0xff]  }
 0x282   :  { %8120 = vmatpush1.bf16.msra.mxu0 %v11331_v15  ;;  %7711 = vmatprep.subr.bf16.mxu1 %v11336_v16  ;;  %v11399_v15 = vld [vmem:[#allocation5 + $0x6d4] ss:$24 sps:$4 sm:$0xff]   ;;  %v11394_v16 = vld [vmem:[#allocation5 + $0xcc8] ss:$24 sps:$4 sm:$0xff]  }
 0x283   :  { %8121 = vmatprep.subr.bf16.mxu0 %v11339_v17  ;;  %v11402_v17 = vld [vmem:[#allocation5 + $0xcfc] ss:$24 sps:$4 sm:$0xff]  }
 0x285   :  { %7712 = vmatpush1.bf16.msra.mxu1 %v11334_v18  ;;  %v11405_v18 = vld [vmem:[#allocation5 + $0x704] ss:$24 sps:$4 sm:$0xff]  }
 0x286   :  { %8122 = vmatpush1.bf16.msra.mxu0 %v11337_v19  ;;  %7713 = vmatprep.subr.bf16.mxu1 %v11342_v20  ;;  %v11400_v19 = vld [vmem:[#allocation5 + $0xcf8] ss:$24 sps:$4 sm:$0xff]  }
 0x287   :  { %8123 = vmatprep.subr.bf16.mxu0 %v11345_v21  ;;  %v11403_v20 = vld [vmem:[#allocation5 + $0x700] ss:$24 sps:$4 sm:$0xff]   ;;  %v11408_v21 = vld [vmem:[#allocation5 + $0xd2c] ss:$24 sps:$4 sm:$0xff]  }
 0x289   :  { %7714 = vmatpush1.bf16.msra.mxu1 %v11340_v24  ;;  %v11411_v24 = vld [vmem:[#allocation5 + $0x734] ss:$24 sps:$4 sm:$0xff]  }
 0x28a   :  { %8124 = vmatpush1.bf16.msra.mxu0 %v11343_v25  ;;  %7715 = vmatprep.subr.bf16.mxu1 %v11348_v26  ;;  %v11406_v25 = vld [vmem:[#allocation5 + $0xd28] ss:$24 sps:$4 sm:$0xff]  }
 0x28b   :  { %8125 = vmatprep.subr.bf16.mxu0 %v11351_v27  ;;  %v11409_v26 = vld [vmem:[#allocation5 + $0x730] ss:$24 sps:$4 sm:$0xff]   ;;  %v11414_v27 = vld [vmem:[#allocation5 + $0xd5c] ss:$24 sps:$4 sm:$0xff]  }
 0x28d   :  { %7716 = vmatpush1.bf16.msra.mxu1 %v11346_v29  ;;  %v11417_v29 = vld [vmem:[#allocation5 + $0x764] ss:$24 sps:$4 sm:$0xff]  }
 0x28e   :  { %8126 = vmatpush1.bf16.msra.mxu0 %v11349_v30  ;;  %7717 = vmatprep.subr.bf16.mxu1 %v11354_v10  ;;  %v11412_v30 = vld [vmem:[#allocation5 + $0xd58] ss:$24 sps:$4 sm:$0xff]  }
 0x28f   :  { %8127 = vmatprep.subr.bf16.mxu0 %v11357_v31  ;;  %v11415_v10 = vld [vmem:[#allocation5 + $0x760] ss:$24 sps:$4 sm:$0xff]   ;;  %v11420_v31 = vld [vmem:[#allocation5 + $0xd8c] ss:$24 sps:$4 sm:$0xff]  }
 0x291   :  { %7718 = vmatpush1.bf16.msra.mxu1 %v11352_v35  ;;  %v11423_v35 = vld [vmem:[#allocation5 + $0x794] ss:$24 sps:$4 sm:$0xff]  }
 0x292   :  { %8128 = vmatpush1.bf16.msra.mxu0 %v11355_v37  ;;  %7719 = vmatprep.subr.bf16.mxu1 %v11360_v38  ;;  %v11418_v37 = vld [vmem:[#allocation5 + $0xd88] ss:$24 sps:$4 sm:$0xff]  }
 0x293   :  { %8129 = vmatprep.subr.bf16.mxu0 %v11363_v39  ;;  %v11421_v38 = vld [vmem:[#allocation5 + $0x790] ss:$24 sps:$4 sm:$0xff]   ;;  %v11426_v39 = vld [vmem:[#allocation5 + $0xdbc] ss:$24 sps:$4 sm:$0xff]  }
 0x295   :  { %7720 = vmatpush1.bf16.msra.mxu1 %v11358_v36  ;;  %v11429_v36 = vld [vmem:[#allocation5 + $0x7c4] ss:$24 sps:$4 sm:$0xff]  }
 0x296   :  { %8130 = vmatpush1.bf16.msra.mxu0 %v11361_v44  ;;  %7721 = vmatprep.subr.bf16.mxu1 %v11366_v45  ;;  %v11424_v44 = vld [vmem:[#allocation5 + $0xdb8] ss:$24 sps:$4 sm:$0xff]  }
 0x297   :  { %8131 = vmatprep.subr.bf16.mxu0 %v11369_v47  ;;  %v11427_v45 = vld [vmem:[#allocation5 + $0x7c0] ss:$24 sps:$4 sm:$0xff]   ;;  %v11432_v47 = vld [vmem:[#allocation5 + $0xdec] ss:$24 sps:$4 sm:$0xff]  }
 0x299   :  { %7722 = vmatpush1.bf16.msra.mxu1 %v11364_v51  ;;  %v11435_v51 = vld [vmem:[#allocation5 + $0x7f4] ss:$24 sps:$4 sm:$0xff]  }
 0x29a   :  { %8132 = vmatpush1.bf16.msra.mxu0 %v11367_v52  ;;  %7732 = vmatprep.subr.bf16.mxu1 %v11372_v54  ;;  %v11430_v52 = vld [vmem:[#allocation5 + $0xde8] ss:$24 sps:$4 sm:$0xff]  }
 0x29b   :  { %8142 = vmatprep.subr.bf16.mxu0 %v11375_v56  ;;  %v11433_v54 = vld [vmem:[#allocation5 + $0x7f0] ss:$24 sps:$4 sm:$0xff]   ;;  %v11438_v56 = vld [vmem:[#allocation5 + $0xe1c] ss:$24 sps:$4 sm:$0xff]  }
 0x29c   :  { %7724 = vmatmul.mubr.bf16.vlgmr.msra.gmra.mrb[4].mxu1 %v12577_v2 }
 0x29d   :  { %8134 = vmatmul.mubr.bf16.vlgmr.msra.gmra.mrb[4].mxu0 %v12553_v22  ;;  %7733 = vmatpush1.bf16.msra.mxu1 %v11370_v57  ;;  %v11393_v22 = vld [vmem:[#allocation5 + $0x6a4] ss:$24 sps:$4 sm:$0xff]  }
 0x29e   :  { %8143 = vmatpush1.bf16.msra.mxu0 %v11373_v59  ;;  %7734 = vmatprep.subr.bf16.mxu1 %v11378_v60  ;;  %v11441_v57 = vld [vmem:[#allocation5 + $0x824] ss:$24 sps:$4 sm:$0xff]   ;;  %v11436_v59 = vld [vmem:[#allocation5 + $0xe18] ss:$24 sps:$4 sm:$0xff]  }
 0x29f   :  { %8144 = vmatprep.subr.bf16.mxu0 %v11381_v61  ;;  %7764 = vmatprep.mubr.bf16.mxu1 %v12581_v8  ;;  %v11439_v60 = vld [vmem:[#allocation5 + $0x820] ss:$24 sps:$4 sm:$0xff]   ;;  %v11444_v61 = vld [vmem:[#allocation5 + $0xe4c] ss:$24 sps:$4 sm:$0xff]  }
 0x2a0   :  { %8174 = vmatprep.mubr.bf16.mxu0 %v12559_v28  ;;  %v11397_v28 = vld [vmem:[#allocation5 + $0x6d0] ss:$24 sps:$4 sm:$0xff]  }
 0x2a1   :  { %7735 = vmatpush1.bf16.msra.mxu1 %v11376_v62  ;;  %v11447_v62 = vld [vmem:[#allocation5 + $0x854] ss:$24 sps:$4 sm:$0xff]  }
 0x2a2   :  { %8145 = vmatpush1.bf16.msra.mxu0 %v11379_v63  ;;  %7736 = vmatprep.subr.bf16.mxu1 %v11384_v0  ;;  %v11442_v63 = vld [vmem:[#allocation5 + $0xe48] ss:$24 sps:$4 sm:$0xff]  }
 0x2a3   :  { %8146 = vmatprep.subr.bf16.mxu0 %v11387_v1  ;;  %v11445_v0 = vld [vmem:[#allocation5 + $0x850] ss:$24 sps:$4 sm:$0xff]   ;;  %v11450_v1 = vld [vmem:[#allocation5 + $0xe7c] ss:$24 sps:$4 sm:$0xff]  }
 0x2a5   :  { %7737 = vmatpush1.bf16.msra.mxu1 %v11382_v4  ;;  %v11453_v4 = vld [vmem:[#allocation5 + $0x884] ss:$24 sps:$4 sm:$0xff]  }
 0x2a6   :  { %8147 = vmatpush1.bf16.msra.mxu0 %v11385_v6  ;;  %7738 = vmatprep.subr.bf16.mxu1 %v11390_v48  ;;  %v11448_v6 = vld [vmem:[#allocation5 + $0xe78] ss:$24 sps:$4 sm:$0xff]  }
 0x2a7   :  { %8148 = vmatprep.subr.bf16.mxu0 %v11393_v22  ;;  %v11451_v48 = vld [vmem:[#allocation5 + $0x880] ss:$24 sps:$4 sm:$0xff]   ;;  %v11456_v22 = vld [vmem:[#allocation5 + $0xeac] ss:$24 sps:$4 sm:$0xff]  }
 0x2a9   :  { %7739 = vmatpush1.bf16.msra.mxu1 %v11388_v7  ;;  %v11459_v7 = vld [vmem:[#allocation5 + $0x8b4] ss:$24 sps:$4 sm:$0xff]  }
 0x2aa   :  { %8149 = vmatpush1.bf16.msra.mxu0 %v11391_v12  ;;  %7740 = vmatprep.subr.bf16.mxu1 %v11396_v13  ;;  %v11454_v12 = vld [vmem:[#allocation5 + $0xea8] ss:$24 sps:$4 sm:$0xff]  }
 0x2ab   :  { %8150 = vmatprep.subr.bf16.mxu0 %v11399_v15  ;;  %v11457_v13 = vld [vmem:[#allocation5 + $0x8b0] ss:$24 sps:$4 sm:$0xff]   ;;  %v11462_v15 = vld [vmem:[#allocation5 + $0xedc] ss:$24 sps:$4 sm:$0xff]  }
 0x2ad   :  { %7741 = vmatpush1.bf16.msra.mxu1 %v11394_v16  ;;  %v11465_v16 = vld [vmem:[#allocation5 + $0x8e4] ss:$24 sps:$4 sm:$0xff]  }
 0x2ae   :  { %8151 = vmatpush1.bf16.msra.mxu0 %v11397_v28  ;;  %7742 = vmatprep.subr.bf16.mxu1 %v11402_v17  ;;  %v11460_v28 = vld [vmem:[#allocation5 + $0xed8] ss:$24 sps:$4 sm:$0xff]  }
 0x2af   :  { %8152 = vmatprep.subr.bf16.mxu0 %v11405_v18  ;;  %v11463_v17 = vld [vmem:[#allocation5 + $0x8e0] ss:$24 sps:$4 sm:$0xff]   ;;  %v11468_v18 = vld [vmem:[#allocation5 + $0xf0c] ss:$24 sps:$4 sm:$0xff]  }
 0x2b1   :  { %7743 = vmatpush1.bf16.msra.mxu1 %v11400_v19  ;;  %v11471_v19 = vld [vmem:[#allocation5 + $0x914] ss:$24 sps:$4 sm:$0xff]  }
 0x2b2   :  { %8153 = vmatpush1.bf16.msra.mxu0 %v11403_v20  ;;  %7744 = vmatprep.subr.bf16.mxu1 %v11408_v21  ;;  %v11466_v20 = vld [vmem:[#allocation5 + $0xf08] ss:$24 sps:$4 sm:$0xff]  }
 0x2b3   :  { %8154 = vmatprep.subr.bf16.mxu0 %v11411_v24  ;;  %v11469_v21 = vld [vmem:[#allocation5 + $0x910] ss:$24 sps:$4 sm:$0xff]   ;;  %v11474_v24 = vld [vmem:[#allocation5 + $0xf3c] ss:$24 sps:$4 sm:$0xff]  }
 0x2b5   :  { %7745 = vmatpush1.bf16.msra.mxu1 %v11406_v25  ;;  %v11477_v25 = vld [vmem:[#allocation5 + $0x944] ss:$24 sps:$4 sm:$0xff]  }
 0x2b6   :  { %8155 = vmatpush1.bf16.msra.mxu0 %v11409_v26  ;;  %7746 = vmatprep.subr.bf16.mxu1 %v11414_v27  ;;  %v11472_v26 = vld [vmem:[#allocation5 + $0xf38] ss:$24 sps:$4 sm:$0xff]  }
 0x2b7   :  { %8156 = vmatprep.subr.bf16.mxu0 %v11417_v29  ;;  %v11475_v27 = vld [vmem:[#allocation5 + $0x940] ss:$24 sps:$4 sm:$0xff]   ;;  %v1286_v29 = vlaneseq }
 0x2b9   :  { %7747 = vmatpush1.bf16.msra.mxu1 %v11412_v30  ;;  %v11480_v30 = vld [vmem:[#allocation5 + $0xf6c] ss:$24 sps:$4 sm:$0xff]  }
 0x2ba   :  { %8157 = vmatpush1.bf16.msra.mxu0 %v11415_v10  ;;  %7748 = vmatprep.subr.bf16.mxu1 %v11420_v31  ;;  %v11483_v10 = vld [vmem:[#allocation5 + $0x974] ss:$24 sps:$4 sm:$0xff]   ;;  %v11478_v31 = vld [vmem:[#allocation5 + $0xf68] ss:$24 sps:$4 sm:$0xff]  }
 0x2bb   :  { %8158 = vmatprep.subr.bf16.mxu0 %v11423_v35  ;;  %v11481_v35 = vld [vmem:[#allocation5 + $0x970] ss:$24 sps:$4 sm:$0xff]  }
 0x2bd   :  { %7749 = vmatpush1.bf16.msra.mxu1 %v11418_v37  ;;  %v12629_v37 = vshrl.u32 %v1286_v29, 7  ;;  %v11528_v29 = vld [vmem:[#allocation5 + $0x10ec] ss:$24 sps:$4 sm:$0xff]  }
 0x2be   :  { %8159 = vmatpush1.bf16.msra.mxu0 %v11421_v38  ;;  %7750 = vmatprep.subr.bf16.mxu1 %v11426_v39  ;;  %v11489_v38 = vld [vmem:[#allocation5 + $0x9a4] ss:$24 sps:$4 sm:$0xff]  }
 0x2bf   :  { %8160 = vmatprep.subr.bf16.mxu0 %v11429_v36  ;;  %v1284_v39 = vld [vmem:[#allocation7] sm:$0x3f]  ;;  %v11484_v36 = vld [vmem:[#allocation5 + $0xf98] ss:$24 sps:$4 sm:$0xff]  }
 0x2c1   :  { %7751 = vmatpush1.bf16.msra.mxu1 %v11424_v44  ;;  %v11487_v44 = vld [vmem:[#allocation5 + $0x9a0] ss:$24 sps:$4 sm:$0xff]  }
 0x2c2   :  { %8161 = vmatpush1.bf16.msra.mxu0 %v11427_v45  ;;  %7752 = vmatprep.subr.bf16.mxu1 %v11432_v47  ;;  %v1288_v45 = vsub.s32 0, %v12629_v37  ;;  %v11495_v47 = vld [vmem:[#allocation5 + $0x9d4] ss:$24 sps:$4 sm:$0xff]  }
 0x2c3   :  { %8162 = vmatprep.subr.bf16.mxu0 %v11435_v51  ;;  %v1292_v51 = vsub.s32 1, %v12629_v37 }
 0x2c5   :  { %7753 = vmatpush1.bf16.msra.mxu1 %v11430_v52  ;;  %v11490_v52 = vld [vmem:[#allocation5 + $0xfc8] ss:$24 sps:$4 sm:$0xff]  }
 0x2c6   :  { %8163 = vmatpush1.bf16.msra.mxu0 %v11433_v54  ;;  %7754 = vmatprep.subr.bf16.mxu1 %v11438_v56  ;;  %v11493_v54 = vld [vmem:[#allocation5 + $0x9d0] ss:$24 sps:$4 sm:$0xff]   ;;  %v1289_v56 = vrot.slane %v1284_v39, %v1288_v45 }
 0x2c7   :  { %8164 = vmatprep.subr.bf16.mxu0 %v11441_v57  ;;  %v11498_v57 = vld [vmem:[#allocation5 + $0xffc] ss:$24 sps:$4 sm:$0xff]   ;;  %v11538_v45 = vld [vmem:[#allocation5 + $0x1148] ss:$24 sps:$4 sm:$0xff]  }
 0x2c9   :  { %7755 = vmatpush1.bf16.msra.mxu1 %v11436_v59  ;;  %v11501_v59 = vld [vmem:[#allocation5 + $0xa04] ss:$24 sps:$4 sm:$0xff]  }
 0x2ca   :  { %8165 = vmatpush1.bf16.msra.mxu0 %v11439_v60  ;;  %7756 = vmatprep.subr.bf16.mxu1 %v11444_v61  ;;  %v1293_v60 = vrot.slane %v1284_v39, %v1292_v51  ;;  %v11496_v61 = vld [vmem:[#allocation5 + $0xff8] ss:$24 sps:$4 sm:$0xff]   ;;  %v11549_v51 = vld [vmem:[#allocation5 + $0xb84] ss:$24 sps:$4 sm:$0xff]  }
 0x2cb   :  { %8166 = vmatprep.subr.bf16.mxu0 %v11447_v62  ;;  %v11499_v62 = vld [vmem:[#allocation5 + $0xa00] ss:$24 sps:$4 sm:$0xff]  }
 0x2cc   :  { %v11535_v39 = vld [vmem:[#allocation5 + $0xb20] ss:$24 sps:$4 sm:$0xff]  }
 0x2cd   :  { %7757 = vmatpush1.bf16.msra.mxu1 %v11442_v63  ;;  %v10360_v63 = vadd.f32 %v12617_v55, %v1289_v56  ;;  %v11510_v55 = vld [vmem:[#allocation5 + $0x105c] ss:$24 sps:$4 sm:$0xff]   ;;  %v11552_v56 = vld [vmem:[#allocation5 + $0x11ac] ss:$24 sps:$4 sm:$0xff]  }
 0x2ce   :  { %8167 = vmatpush1.bf16.msra.mxu0 %v11445_v0  ;;  %7758 = vmatprep.subr.bf16.mxu1 %v11450_v1  ;;  %v11504_v0 = vld [vmem:[#allocation5 + $0x102c] ss:$24 sps:$4 sm:$0xff]  }
 0x2cf   :  { %8168 = vmatprep.subr.bf16.mxu0 %v11453_v4  ;;  %v11507_v1 = vld [vmem:[#allocation5 + $0xa34] ss:$24 sps:$4 sm:$0xff]   ;;  %v10362_v4 = vadd.f32 %v12619_v58, %v1293_v60  ;;  %v11511_v58 = vld [vmem:[#allocation5 + $0xa60] ss:$24 sps:$4 sm:$0xff]   ;;  %v11553_v60 = vld [vmem:[#allocation5 + $0xbb0] ss:$24 sps:$4 sm:$0xff]  }
 0x2d1   :  { %7759 = vmatpush1.bf16.msra.mxu1 %v11448_v6 }
 0x2d2   :  { %8169 = vmatpush1.bf16.msra.mxu0 %v11451_v48  ;;  %7760 = vmatprep.subr.bf16.mxu1 %v11456_v22 }
 0x2d3   :  { %8170 = vmatprep.subr.bf16.mxu0 %v11459_v7 }
 0x2d5   :  { %7761 = vmatpush1.bf16.msra.mxu1 %v11454_v12 }
 0x2d6   :  { %8171 = vmatpush1.bf16.msra.mxu0 %v11457_v13  ;;  %7762 = vmatprep.subr.bf16.mxu1 %v11462_v15  ;;  %v11502_v13 = vld [vmem:[#allocation5 + $0x1028] ss:$24 sps:$4 sm:$0xff]  }
 0x2d7   :  { %8172 = vmatprep.subr.bf16.mxu0 %v11465_v16  ;;  %v11505_v15 = vld [vmem:[#allocation5 + $0xa30] ss:$24 sps:$4 sm:$0xff]  }
 0x2d9   :  { %7763 = vmatpush1.bf16.msra.mxu1 %v11460_v28  ;;  %v11513_v28 = vld [vmem:[#allocation5 + $0xa64] ss:$24 sps:$4 sm:$0xff]  }
 0x2da   :  { %8173 = vmatpush1.bf16.msra.mxu0 %v11463_v17  ;;  %7773 = vmatprep.subr.bf16.mxu1 %v11468_v18  ;;  %v11508_v17 = vld [vmem:[#allocation5 + $0x1058] ss:$24 sps:$4 sm:$0xff]   ;;  %v11516_v18 = vld [vmem:[#allocation5 + $0x108c] ss:$24 sps:$4 sm:$0xff]  }
 0x2db   :  { %8183 = vmatprep.subr.bf16.mxu0 %v11471_v19  ;;  %v11519_v19 = vld [vmem:[#allocation5 + $0xa94] ss:$24 sps:$4 sm:$0xff]  }
 0x2dc   :  { %7765 = vmatmul.mubr.bf16.vlgmr.msra.gmra.mrb[4].mxu1 %v12589_v32 }
 0x2dd   :  { %8175 = vmatmul.mubr.bf16.vlgmr.msra.gmra.mrb[4].mxu0 %v12565_v42  ;;  %7774 = vmatpush1.bf16.msra.mxu1 %v11466_v20  ;;  %v11486_v42 = vld [vmem:[#allocation5 + $0xf9c] ss:$24 sps:$4 sm:$0xff]   ;;  %v11514_v20 = vld [vmem:[#allocation5 + $0x1088] ss:$24 sps:$4 sm:$0xff]  }
 0x2de   :  { %8184 = vmatpush1.bf16.msra.mxu0 %v11469_v21  ;;  %7775 = vmatprep.subr.bf16.mxu1 %v11474_v24  ;;  %v11517_v21 = vld [vmem:[#allocation5 + $0xa90] ss:$24 sps:$4 sm:$0xff]   ;;  %v11522_v24 = vld [vmem:[#allocation5 + $0x10bc] ss:$24 sps:$4 sm:$0xff]  }
 0x2df   :  { %8185 = vmatprep.subr.bf16.mxu0 %v11477_v25  ;;  %7805 = vmatprep.mubr.bf16.mxu1 %v12537_v53  ;;  %v11525_v25 = vld [vmem:[#allocation5 + $0xac4] ss:$24 sps:$4 sm:$0xff]  }
 0x2e0   :  { %8215 = vmatprep.mubr.bf16.mxu0 %v12569_v49  ;;  %v11492_v49 = vld [vmem:[#allocation5 + $0xfcc] ss:$24 sps:$4 sm:$0xff]  }
 0x2e1   :  { %7776 = vmatpush1.bf16.msra.mxu1 %v11472_v26  ;;  %v11520_v26 = vld [vmem:[#allocation5 + $0x10b8] ss:$24 sps:$4 sm:$0xff]  }
 0x2e2   :  { %8186 = vmatpush1.bf16.msra.mxu0 %v11475_v27  ;;  %7777 = vmatprep.subr.bf16.mxu1 %v11480_v30  ;;  %v11523_v27 = vld [vmem:[#allocation5 + $0xac0] ss:$24 sps:$4 sm:$0xff]   ;;  %v11531_v30 = vld [vmem:[#allocation5 + $0xaf4] ss:$24 sps:$4 sm:$0xff]  }
 0x2e3   :  { %8187 = vmatprep.subr.bf16.mxu0 %v11483_v10  ;;  %v11526_v10 = vld [vmem:[#allocation5 + $0x10e8] ss:$24 sps:$4 sm:$0xff]  }
 0x2e5   :  { %7778 = vmatpush1.bf16.msra.mxu1 %v11478_v31  ;;  %v11529_v31 = vld [vmem:[#allocation5 + $0xaf0] ss:$24 sps:$4 sm:$0xff]  }
 0x2e6   :  { %8188 = vmatpush1.bf16.msra.mxu0 %v11481_v35  ;;  %7779 = vmatprep.subr.bf16.mxu1 %v11486_v42  ;;  %v11534_v35 = vld [vmem:[#allocation5 + $0x111c] ss:$24 sps:$4 sm:$0xff]  }
 0x2e7   :  { %8189 = vmatprep.subr.bf16.mxu0 %v11489_v38  ;;  %v11537_v42 = vld [vmem:[#allocation5 + $0xb24] ss:$24 sps:$4 sm:$0xff]   ;;  %v11532_v38 = vld [vmem:[#allocation5 + $0x1118] ss:$24 sps:$4 sm:$0xff]  }
 0x2e9   :  { %7780 = vmatpush1.bf16.msra.mxu1 %v11484_v36  ;;  %v11540_v36 = vld [vmem:[#allocation5 + $0x114c] ss:$24 sps:$4 sm:$0xff]  }
 0x2ea   :  { %8190 = vmatpush1.bf16.msra.mxu0 %v11487_v44  ;;  %7781 = vmatprep.subr.bf16.mxu1 %v11492_v49  ;;  %v11543_v44 = vld [vmem:[#allocation5 + $0xb54] ss:$24 sps:$4 sm:$0xff]   ;;  %v11541_v49 = vld [vmem:[#allocation5 + $0xb50] ss:$24 sps:$4 sm:$0xff]  }
 0x2eb   :  { %8191 = vmatprep.subr.bf16.mxu0 %v11495_v47  ;;  %v11546_v47 = vld [vmem:[#allocation5 + $0x117c] ss:$24 sps:$4 sm:$0xff]  }
 0x2ed   :  { %7782 = vmatpush1.bf16.msra.mxu1 %v11490_v52  ;;  %v11544_v52 = vld [vmem:[#allocation5 + $0x1178] ss:$24 sps:$4 sm:$0xff]  }
 0x2ee   :  { %8192 = vmatpush1.bf16.msra.mxu0 %v11493_v54  ;;  %7783 = vmatprep.subr.bf16.mxu1 %v11498_v57  ;;  %v11547_v54 = vld [vmem:[#allocation5 + $0xb80] ss:$24 sps:$4 sm:$0xff]   ;;  %v11555_v57 = vld [vmem:[#allocation5 + $0xbb4] ss:$24 sps:$4 sm:$0xff]  }
 0x2ef   :  { %8193 = vmatprep.subr.bf16.mxu0 %v11501_v59  ;;  %v11550_v59 = vld [vmem:[#allocation5 + $0x11a8] ss:$24 sps:$4 sm:$0xff]  }
 0x2f0   :  { %v7561_v6 = vpop.f32.mrb[0].mxu0 }
 0x2f1   :  { %v12635_v48 = vadd.f32 %v10360_v63, %v7561_v6  ;;  %v7563_v22 = vpop.f32.mrb[1].mxu0  ;;  %7784 = vmatpush1.bf16.msra.mxu1 %v11496_v61  ;;  %v11558_v61 = vld [vmem:[#allocation5 + $0x11dc] ss:$24 sps:$4 sm:$0xff]   ;;  %v11556_v63 = vld [vmem:[#allocation5 + $0x11d8] ss:$24 sps:$4 sm:$0xff]  }
 0x2f2   :  { %v12637_v7 = vadd.f32 %v10362_v4, %v7563_v22  ;;  %v7565_v12 = vpop.f32.mrb[2].mxu0  ;;  %8194 = vmatpush1.bf16.msra.mxu0 %v11499_v62  ;;  %7785 = vmatprep.subr.bf16.mxu1 %v11504_v0  ;;  %v11561_v62 = vld [vmem:[#allocation5 + $0xbe4] ss:$24 sps:$4 sm:$0xff]   ;;  %v11559_v0 = vld [vmem:[#allocation5 + $0xbe0] ss:$24 sps:$4 sm:$0xff]  }
 0x2f3   :  { %v7566_v16 = vpop.f32.mrb[3].mxu0  ;;  %8195 = vmatprep.subr.bf16.mxu0 %v11507_v1  ;;  %v11564_v1 = vld [vmem:[#allocation5 + $0x120c] ss:$24 sps:$4 sm:$0xff]   ;;  %v11562_v6 = vld [vmem:[#allocation5 + $0x1208] ss:$24 sps:$4 sm:$0xff]  }
 0x2f4   :  { %v11567_v4 = vld [vmem:[#allocation5 + $0xc14] ss:$24 sps:$4 sm:$0xff]   ;;  %v11565_v22 = vld [vmem:[#allocation5 + $0xc10] ss:$24 sps:$4 sm:$0xff]   ;;  %v11571_v16 = vld [vmem:[#allocation5 + $0xc40] ss:$24 sps:$4 sm:$0xff]   ;;  %12282 = vtanh.f32 %v12637_v7 }
 0x2f5   :  { %7786 = vmatpush1.bf16.msra.mxu1 %v11502_v13  ;;  %v11570_v12 = vld [vmem:[#allocation5 + $0x123c] ss:$24 sps:$4 sm:$0xff]   ;;  %v12138_v7 = vld [vmem:[#allocation5 + $0x1e10] ss:$24 sps:$4 sm:$0xff]   ;;  %12284 = vtanh.f32 %v12635_v48 }
 0x2f6   :  { %8196 = vmatpush1.bf16.msra.mxu0 %v11505_v15  ;;  %7787 = vmatprep.subr.bf16.mxu1 %v11510_v55  ;;  %v11573_v13 = vld [vmem:[#allocation5 + $0xc44] ss:$24 sps:$4 sm:$0xff]   ;;  %v11568_v15 = vld [vmem:[#allocation5 + $0x1238] ss:$24 sps:$4 sm:$0xff]  }
 0x2f7   :  { %8197 = vmatprep.subr.bf16.mxu0 %v11513_v28  ;;  %v11576_v55 = vld [vmem:[#allocation5 + $0x126c] ss:$24 sps:$4 sm:$0xff]  }
 0x2f8   :  { %v11579_v28 = vld [vmem:[#allocation5 + $0xc74] ss:$24 sps:$4 sm:$0xff]   ;;  %v12177_v48 = vld [vmem:[#allocation8 + $0x38] sm:$0xff]  }
 0x2f9   :  { %7788 = vmatpush1.bf16.msra.mxu1 %v11508_v17  ;;  %v11574_v17 = vld [vmem:[#allocation5 + $0x1268] ss:$24 sps:$4 sm:$0xff]  }
 0x2fa   :  { %8198 = vmatpush1.bf16.msra.mxu0 %v11511_v58  ;;  %7789 = vmatprep.subr.bf16.mxu1 %v11516_v18  ;;  %v11577_v58 = vld [vmem:[#allocation5 + $0xc70] ss:$24 sps:$4 sm:$0xff]   ;;  %v11582_v18 = vld [vmem:[#allocation5 + $0x129c] ss:$24 sps:$4 sm:$0xff]  }
 0x2fb   :  { %8199 = vmatprep.subr.bf16.mxu0 %v11519_v19  ;;  %v11580_v19 = vld [vmem:[#allocation5 + $0x1298] ss:$24 sps:$4 sm:$0xff]  }
 0x2fd   :  { %7790 = vmatpush1.bf16.msra.mxu1 %v11514_v20  ;;  %v11583_v20 = vld [vmem:[#allocation5 + $0xca0] ss:$24 sps:$4 sm:$0xff]  }
 0x2fe   :  { %8200 = vmatpush1.bf16.msra.mxu0 %v11517_v21  ;;  %7791 = vmatprep.subr.bf16.mxu1 %v11522_v24  ;;  %v11588_v21 = vld [vmem:[#allocation5 + $0x12cc] ss:$24 sps:$4 sm:$0xff]  }
 0x2ff   :  { %8201 = vmatprep.subr.bf16.mxu0 %v11525_v25  ;;  %v11591_v24 = vld [vmem:[#allocation5 + $0xcd4] ss:$24 sps:$4 sm:$0xff]   ;;  %v11586_v25 = vld [vmem:[#allocation5 + $0x12c8] ss:$24 sps:$4 sm:$0xff]  }
 0x301   :  { %7792 = vmatpush1.bf16.msra.mxu1 %v11520_v26  ;;  %v11594_v26 = vld [vmem:[#allocation5 + $0x12fc] ss:$24 sps:$4 sm:$0xff]  }
 0x302   :  { %8202 = vmatpush1.bf16.msra.mxu0 %v11523_v27  ;;  %7793 = vmatprep.subr.bf16.mxu1 %v11528_v29  ;;  %v11597_v27 = vld [vmem:[#allocation5 + $0xd04] ss:$24 sps:$4 sm:$0xff]   ;;  %v11592_v29 = vld [vmem:[#allocation5 + $0x12f8] ss:$24 sps:$4 sm:$0xff]  }
 0x303   :  { %8203 = vmatprep.subr.bf16.mxu0 %v11531_v30  ;;  %v11595_v30 = vld [vmem:[#allocation5 + $0xd00] ss:$24 sps:$4 sm:$0xff]  }
 0x305   :  { %7794 = vmatpush1.bf16.msra.mxu1 %v11526_v10  ;;  %v11600_v10 = vld [vmem:[#allocation5 + $0x132c] ss:$24 sps:$4 sm:$0xff]  }
 0x306   :  { %8204 = vmatpush1.bf16.msra.mxu0 %v11529_v31  ;;  %7795 = vmatprep.subr.bf16.mxu1 %v11534_v35  ;;  %v11603_v31 = vld [vmem:[#allocation5 + $0xd34] ss:$24 sps:$4 sm:$0xff]   ;;  %v11598_v35 = vld [vmem:[#allocation5 + $0x1328] ss:$24 sps:$4 sm:$0xff]  }
 0x307   :  { %8205 = vmatprep.subr.bf16.mxu0 %v11537_v42  ;;  %v11601_v42 = vld [vmem:[#allocation5 + $0xd30] ss:$24 sps:$4 sm:$0xff]  }
 0x309   :  { %7796 = vmatpush1.bf16.msra.mxu1 %v11532_v38  ;;  %v11606_v38 = vld [vmem:[#allocation5 + $0x135c] ss:$24 sps:$4 sm:$0xff]  }
 0x30a   :  { %8206 = vmatpush1.bf16.msra.mxu0 %v11535_v39  ;;  %7797 = vmatprep.subr.bf16.mxu1 %v11540_v36  ;;  %v11609_v39 = vld [vmem:[#allocation5 + $0xd64] ss:$24 sps:$4 sm:$0xff]   ;;  %v11604_v36 = vld [vmem:[#allocation5 + $0x1358] ss:$24 sps:$4 sm:$0xff]  }
 0x30b   :  { %8207 = vmatprep.subr.bf16.mxu0 %v11543_v44  ;;  %v11607_v44 = vld [vmem:[#allocation5 + $0xd60] ss:$24 sps:$4 sm:$0xff]  }
 0x30d   :  { %7798 = vmatpush1.bf16.msra.mxu1 %v11538_v45  ;;  %v11612_v45 = vld [vmem:[#allocation5 + $0x138c] ss:$24 sps:$4 sm:$0xff]  }
 0x30e   :  { %8208 = vmatpush1.bf16.msra.mxu0 %v11541_v49  ;;  %7799 = vmatprep.subr.bf16.mxu1 %v11546_v47  ;;  %v11615_v49 = vld [vmem:[#allocation5 + $0xd94] ss:$24 sps:$4 sm:$0xff]   ;;  %v11610_v47 = vld [vmem:[#allocation5 + $0x1388] ss:$24 sps:$4 sm:$0xff]  }
 0x30f   :  { %8209 = vmatprep.subr.bf16.mxu0 %v11549_v51  ;;  %v11613_v51 = vld [vmem:[#allocation5 + $0xd90] ss:$24 sps:$4 sm:$0xff]  }
 0x311   :  { %7800 = vmatpush1.bf16.msra.mxu1 %v11544_v52  ;;  %v11618_v52 = vld [vmem:[#allocation5 + $0x13bc] ss:$24 sps:$4 sm:$0xff]  }
 0x312   :  { %8210 = vmatpush1.bf16.msra.mxu0 %v11547_v54  ;;  %7801 = vmatprep.subr.bf16.mxu1 %v11552_v56  ;;  %v11621_v54 = vld [vmem:[#allocation5 + $0xdc4] ss:$24 sps:$4 sm:$0xff]   ;;  %v11616_v56 = vld [vmem:[#allocation5 + $0x13b8] ss:$24 sps:$4 sm:$0xff]  }
 0x313   :  { %8211 = vmatprep.subr.bf16.mxu0 %v11555_v57  ;;  %v11619_v57 = vld [vmem:[#allocation5 + $0xdc0] ss:$24 sps:$4 sm:$0xff]  }
 0x315   :  { %7802 = vmatpush1.bf16.msra.mxu1 %v11550_v59  ;;  %v11624_v59 = vld [vmem:[#allocation5 + $0x13ec] ss:$24 sps:$4 sm:$0xff]  }
 0x316   :  { %8212 = vmatpush1.bf16.msra.mxu0 %v11553_v60  ;;  %7803 = vmatprep.subr.bf16.mxu1 %v11558_v61  ;;  %v11627_v60 = vld [vmem:[#allocation5 + $0xdf4] ss:$24 sps:$4 sm:$0xff]   ;;  %v11622_v61 = vld [vmem:[#allocation5 + $0x13e8] ss:$24 sps:$4 sm:$0xff]  }
 0x317   :  { %8213 = vmatprep.subr.bf16.mxu0 %v11561_v62  ;;  %v11625_v62 = vld [vmem:[#allocation5 + $0xdf0] ss:$24 sps:$4 sm:$0xff]  }
 0x319   :  { %7804 = vmatpush1.bf16.msra.mxu1 %v11556_v63  ;;  %v11630_v63 = vld [vmem:[#allocation5 + $0x141c] ss:$24 sps:$4 sm:$0xff]  }
 0x31a   :  { %8214 = vmatpush1.bf16.msra.mxu0 %v11559_v0  ;;  %7814 = vmatprep.subr.bf16.mxu1 %v11564_v1  ;;  %v11633_v0 = vld [vmem:[#allocation5 + $0xe24] ss:$24 sps:$4 sm:$0xff]   ;;  %v11628_v1 = vld [vmem:[#allocation5 + $0x1418] ss:$24 sps:$4 sm:$0xff]  }
 0x31b   :  { %8224 = vmatprep.subr.bf16.mxu0 %v11567_v4  ;;  %v11631_v4 = vld [vmem:[#allocation5 + $0xe20] ss:$24 sps:$4 sm:$0xff]  }
 0x31c   :  { %7806 = vmatmul.mubr.bf16.vlgmr.msra.gmra.mrb[4].mxu1 %v12543_v11 }
 0x31d   :  { %8216 = vmatmul.mubr.bf16.vlgmr.msra.gmra.mrb[4].mxu0 %v12577_v2  ;;  %7815 = vmatpush1.bf16.msra.mxu1 %v11562_v6  ;;  %v11585_v2 = vld [vmem:[#allocation5 + $0xca4] ss:$24 sps:$4 sm:$0xff]  }
 0x31e   :  { %8225 = vmatpush1.bf16.msra.mxu0 %v11565_v22  ;;  %7816 = vmatprep.subr.bf16.mxu1 %v11570_v12  ;;  %v11636_v6 = vld [vmem:[#allocation5 + $0x144c] ss:$24 sps:$4 sm:$0xff]   ;;  %v11634_v12 = vld [vmem:[#allocation5 + $0x1448] ss:$24 sps:$4 sm:$0xff]  }
 0x31f   :  { %8226 = vmatprep.subr.bf16.mxu0 %v11573_v13  ;;  %7846 = vmatprep.mubr.bf16.mxu1 %v12549_v41  ;;  %v11639_v22 = vld [vmem:[#allocation5 + $0xe54] ss:$24 sps:$4 sm:$0xff]   ;;  %v11637_v13 = vld [vmem:[#allocation5 + $0xe50] ss:$24 sps:$4 sm:$0xff]  }
 0x320   :  { %8256 = vmatprep.mubr.bf16.mxu0 %v12581_v8  ;;  %v11589_v8 = vld [vmem:[#allocation5 + $0xcd0] ss:$24 sps:$4 sm:$0xff]  }
 0x321   :  { %7817 = vmatpush1.bf16.msra.mxu1 %v11568_v15  ;;  %v11642_v15 = vld [vmem:[#allocation5 + $0x147c] ss:$24 sps:$4 sm:$0xff]  }
 0x322   :  { %8227 = vmatpush1.bf16.msra.mxu0 %v11571_v16  ;;  %7818 = vmatprep.subr.bf16.mxu1 %v11576_v55  ;;  %v11645_v16 = vld [vmem:[#allocation5 + $0xe84] ss:$24 sps:$4 sm:$0xff]   ;;  %v11640_v55 = vld [vmem:[#allocation5 + $0x1478] ss:$24 sps:$4 sm:$0xff]  }
 0x323   :  { %8228 = vmatprep.subr.bf16.mxu0 %v11579_v28  ;;  %v11643_v28 = vld [vmem:[#allocation5 + $0xe80] ss:$24 sps:$4 sm:$0xff]  }
 0x325   :  { %7819 = vmatpush1.bf16.msra.mxu1 %v11574_v17  ;;  %v11648_v17 = vld [vmem:[#allocation5 + $0x14ac] ss:$24 sps:$4 sm:$0xff]  }
 0x326   :  { %8229 = vmatpush1.bf16.msra.mxu0 %v11577_v58  ;;  %7820 = vmatprep.subr.bf16.mxu1 %v11582_v18  ;;  %v11651_v58 = vld [vmem:[#allocation5 + $0xeb4] ss:$24 sps:$4 sm:$0xff]   ;;  %v11646_v18 = vld [vmem:[#allocation5 + $0x14a8] ss:$24 sps:$4 sm:$0xff]  }
 0x327   :  { %8230 = vmatprep.subr.bf16.mxu0 %v11585_v2  ;;  %v11649_v2 = vld [vmem:[#allocation5 + $0xeb0] ss:$24 sps:$4 sm:$0xff]  }
 0x329   :  { %7821 = vmatpush1.bf16.msra.mxu1 %v11580_v19  ;;  %v11654_v19 = vld [vmem:[#allocation5 + $0x14dc] ss:$24 sps:$4 sm:$0xff]  }
 0x32a   :  { %8231 = vmatpush1.bf16.msra.mxu0 %v11583_v20  ;;  %7822 = vmatprep.subr.bf16.mxu1 %v11588_v21  ;;  %v11657_v20 = vld [vmem:[#allocation5 + $0xee4] ss:$24 sps:$4 sm:$0xff]   ;;  %v11652_v21 = vld [vmem:[#allocation5 + $0x14d8] ss:$24 sps:$4 sm:$0xff]  }
 0x32b   :  { %8232 = vmatprep.subr.bf16.mxu0 %v11591_v24  ;;  %v11655_v24 = vld [vmem:[#allocation5 + $0xee0] ss:$24 sps:$4 sm:$0xff]  }
 0x32d   :  { %7823 = vmatpush1.bf16.msra.mxu1 %v11586_v25  ;;  %v11660_v25 = vld [vmem:[#allocation5 + $0x150c] ss:$24 sps:$4 sm:$0xff]  }
 0x32e   :  { %8233 = vmatpush1.bf16.msra.mxu0 %v11589_v8  ;;  %7824 = vmatprep.subr.bf16.mxu1 %v11594_v26  ;;  %v11663_v8 = vld [vmem:[#allocation5 + $0xf14] ss:$24 sps:$4 sm:$0xff]   ;;  %v11658_v26 = vld [vmem:[#allocation5 + $0x1508] ss:$24 sps:$4 sm:$0xff]  }
 0x32f   :  { %8234 = vmatprep.subr.bf16.mxu0 %v11597_v27  ;;  %v11661_v27 = vld [vmem:[#allocation5 + $0xf10] ss:$24 sps:$4 sm:$0xff]  }
 0x331   :  { %7825 = vmatpush1.bf16.msra.mxu1 %v11592_v29  ;;  %v11666_v29 = vld [vmem:[#allocation5 + $0x153c] ss:$24 sps:$4 sm:$0xff]  }
 0x332   :  { %8235 = vmatpush1.bf16.msra.mxu0 %v11595_v30  ;;  %7826 = vmatprep.subr.bf16.mxu1 %v11600_v10  ;;  %v11669_v30 = vld [vmem:[#allocation5 + $0xf44] ss:$24 sps:$4 sm:$0xff]   ;;  %v11664_v10 = vld [vmem:[#allocation5 + $0x1538] ss:$24 sps:$4 sm:$0xff]  }
 0x333   :  { %8236 = vmatprep.subr.bf16.mxu0 %v11603_v31  ;;  %v11667_v31 = vld [vmem:[#allocation5 + $0xf40] ss:$24 sps:$4 sm:$0xff]  }
 0x335   :  { %7827 = vmatpush1.bf16.msra.mxu1 %v11598_v35  ;;  %v11672_v35 = vld [vmem:[#allocation5 + $0x156c] ss:$24 sps:$4 sm:$0xff]  }
 0x336   :  { %8237 = vmatpush1.bf16.msra.mxu0 %v11601_v42  ;;  %7828 = vmatprep.subr.bf16.mxu1 %v11606_v38  ;;  %v11675_v42 = vld [vmem:[#allocation5 + $0xf74] ss:$24 sps:$4 sm:$0xff]   ;;  %v11670_v38 = vld [vmem:[#allocation5 + $0x1568] ss:$24 sps:$4 sm:$0xff]  }
 0x337   :  { %8238 = vmatprep.subr.bf16.mxu0 %v11609_v39  ;;  %v11673_v39 = vld [vmem:[#allocation5 + $0xf70] ss:$24 sps:$4 sm:$0xff]  }
 0x339   :  { %7829 = vmatpush1.bf16.msra.mxu1 %v11604_v36  ;;  %v11678_v36 = vld [vmem:[#allocation5 + $0x159c] ss:$24 sps:$4 sm:$0xff]  }
 0x33a   :  { %8239 = vmatpush1.bf16.msra.mxu0 %v11607_v44  ;;  %7830 = vmatprep.subr.bf16.mxu1 %v11612_v45  ;;  %v11676_v44 = vld [vmem:[#allocation5 + $0x1598] ss:$24 sps:$4 sm:$0xff]  }
 0x33b   :  { %8240 = vmatprep.subr.bf16.mxu0 %v11615_v49  ;;  %v11679_v45 = vld [vmem:[#allocation5 + $0xfa0] ss:$24 sps:$4 sm:$0xff]   ;;  %v11684_v49 = vld [vmem:[#allocation5 + $0x15cc] ss:$24 sps:$4 sm:$0xff]  }
 0x33d   :  { %7831 = vmatpush1.bf16.msra.mxu1 %v11610_v47  ;;  %v11687_v47 = vld [vmem:[#allocation5 + $0xfd4] ss:$24 sps:$4 sm:$0xff]  }
 0x33e   :  { %8241 = vmatpush1.bf16.msra.mxu0 %v11613_v51  ;;  %7832 = vmatprep.subr.bf16.mxu1 %v11618_v52  ;;  %v11682_v51 = vld [vmem:[#allocation5 + $0x15c8] ss:$24 sps:$4 sm:$0xff]   ;;  %v11690_v52 = vld [vmem:[#allocation5 + $0x15fc] ss:$24 sps:$4 sm:$0xff]  }
 0x33f   :  { %8242 = vmatprep.subr.bf16.mxu0 %v11621_v54  ;;  %v11693_v54 = vld [vmem:[#allocation5 + $0x1004] ss:$24 sps:$4 sm:$0xff]  }
 0x341   :  { %7833 = vmatpush1.bf16.msra.mxu1 %v11616_v56  ;;  %v11688_v56 = vld [vmem:[#allocation5 + $0x15f8] ss:$24 sps:$4 sm:$0xff]  }
 0x342   :  { %8243 = vmatpush1.bf16.msra.mxu0 %v11619_v57  ;;  %7834 = vmatprep.subr.bf16.mxu1 %v11624_v59  ;;  %v11691_v57 = vld [vmem:[#allocation5 + $0x1000] ss:$24 sps:$4 sm:$0xff]   ;;  %v11696_v59 = vld [vmem:[#allocation5 + $0x162c] ss:$24 sps:$4 sm:$0xff]  }
 0x343   :  { %8244 = vmatprep.subr.bf16.mxu0 %v11627_v60  ;;  %v11699_v60 = vld [vmem:[#allocation5 + $0x1034] ss:$24 sps:$4 sm:$0xff]  }
 0x345   :  { %7835 = vmatpush1.bf16.msra.mxu1 %v11622_v61  ;;  %v11694_v61 = vld [vmem:[#allocation5 + $0x1628] ss:$24 sps:$4 sm:$0xff]  }
 0x346   :  { %8245 = vmatpush1.bf16.msra.mxu0 %v11625_v62  ;;  %7836 = vmatprep.subr.bf16.mxu1 %v11630_v63  ;;  %v11697_v62 = vld [vmem:[#allocation5 + $0x1030] ss:$24 sps:$4 sm:$0xff]   ;;  %v11702_v63 = vld [vmem:[#allocation5 + $0x165c] ss:$24 sps:$4 sm:$0xff]  }
 0x347   :  { %8246 = vmatprep.subr.bf16.mxu0 %v11633_v0  ;;  %v11705_v0 = vld [vmem:[#allocation5 + $0x1064] ss:$24 sps:$4 sm:$0xff]  }
 0x349   :  { %7837 = vmatpush1.bf16.msra.mxu1 %v11628_v1  ;;  %v11700_v1 = vld [vmem:[#allocation5 + $0x1658] ss:$24 sps:$4 sm:$0xff]  }
 0x34a   :  { %8247 = vmatpush1.bf16.msra.mxu0 %v11631_v4  ;;  %7838 = vmatprep.subr.bf16.mxu1 %v11636_v6  ;;  %v11703_v4 = vld [vmem:[#allocation5 + $0x1060] ss:$24 sps:$4 sm:$0xff]   ;;  %v11708_v6 = vld [vmem:[#allocation5 + $0x168c] ss:$24 sps:$4 sm:$0xff]  }
 0x34b   :  { %8248 = vmatprep.subr.bf16.mxu0 %v11639_v22  ;;  %v11711_v22 = vld [vmem:[#allocation5 + $0x1094] ss:$24 sps:$4 sm:$0xff]  }
 0x34d   :  { %7839 = vmatpush1.bf16.msra.mxu1 %v11634_v12  ;;  %v11706_v12 = vld [vmem:[#allocation5 + $0x1688] ss:$24 sps:$4 sm:$0xff]  }
 0x34e   :  { %8249 = vmatpush1.bf16.msra.mxu0 %v11637_v13  ;;  %7840 = vmatprep.subr.bf16.mxu1 %v11642_v15  ;;  %v11709_v13 = vld [vmem:[#allocation5 + $0x1090] ss:$24 sps:$4 sm:$0xff]   ;;  %v11714_v15 = vld [vmem:[#allocation5 + $0x16bc] ss:$24 sps:$4 sm:$0xff]  }
 0x34f   :  { %8250 = vmatprep.subr.bf16.mxu0 %v11645_v16  ;;  %v11717_v16 = vld [vmem:[#allocation5 + $0x10c4] ss:$24 sps:$4 sm:$0xff]  }
 0x351   :  { %7841 = vmatpush1.bf16.msra.mxu1 %v11640_v55  ;;  %v11712_v55 = vld [vmem:[#allocation5 + $0x16b8] ss:$24 sps:$4 sm:$0xff]  }
 0x352   :  { %8251 = vmatpush1.bf16.msra.mxu0 %v11643_v28  ;;  %7842 = vmatprep.subr.bf16.mxu1 %v11648_v17  ;;  %v11715_v28 = vld [vmem:[#allocation5 + $0x10c0] ss:$24 sps:$4 sm:$0xff]   ;;  %v11720_v17 = vld [vmem:[#allocation5 + $0x16ec] ss:$24 sps:$4 sm:$0xff]  }
 0x353   :  { %8252 = vmatprep.subr.bf16.mxu0 %v11651_v58  ;;  %v11723_v58 = vld [vmem:[#allocation5 + $0x10f4] ss:$24 sps:$4 sm:$0xff]  }
 0x355   :  { %7843 = vmatpush1.bf16.msra.mxu1 %v11646_v18  ;;  %v11718_v18 = vld [vmem:[#allocation5 + $0x16e8] ss:$24 sps:$4 sm:$0xff]  }
 0x356   :  { %8253 = vmatpush1.bf16.msra.mxu0 %v11649_v2  ;;  %7844 = vmatprep.subr.bf16.mxu1 %v11654_v19  ;;  %v11721_v2 = vld [vmem:[#allocation5 + $0x10f0] ss:$24 sps:$4 sm:$0xff]   ;;  %v11726_v19 = vld [vmem:[#allocation5 + $0x171c] ss:$24 sps:$4 sm:$0xff]  }
 0x357   :  { %8254 = vmatprep.subr.bf16.mxu0 %v11657_v20  ;;  %v11729_v20 = vld [vmem:[#allocation5 + $0x1124] ss:$24 sps:$4 sm:$0xff]  }
 0x359   :  { %7845 = vmatpush1.bf16.msra.mxu1 %v11652_v21  ;;  %v11724_v21 = vld [vmem:[#allocation5 + $0x1718] ss:$24 sps:$4 sm:$0xff]  }
 0x35a   :  { %8255 = vmatpush1.bf16.msra.mxu0 %v11655_v24  ;;  %7855 = vmatprep.subr.bf16.mxu1 %v11660_v25  ;;  %v11727_v24 = vld [vmem:[#allocation5 + $0x1120] ss:$24 sps:$4 sm:$0xff]   ;;  %v11732_v25 = vld [vmem:[#allocation5 + $0x174c] ss:$24 sps:$4 sm:$0xff]  }
 0x35b   :  { %8265 = vmatprep.subr.bf16.mxu0 %v11663_v8  ;;  %v11735_v8 = vld [vmem:[#allocation5 + $0x1154] ss:$24 sps:$4 sm:$0xff]  }
 0x35c   :  { %7847 = vmatmul.mubr.bf16.vlgmr.msra.gmra.mrb[4].mxu1 %v12555_v23 }
 0x35d   :  { %8257 = vmatmul.mubr.bf16.vlgmr.msra.gmra.mrb[4].mxu0 %v12589_v32  ;;  %7856 = vmatpush1.bf16.msra.mxu1 %v11658_v26  ;;  %v11681_v32 = vld [vmem:[#allocation5 + $0xfa4] ss:$24 sps:$4 sm:$0xff]   ;;  %v11730_v26 = vld [vmem:[#allocation5 + $0x1748] ss:$24 sps:$4 sm:$0xff]  }
 0x35e   :  { %8266 = vmatpush1.bf16.msra.mxu0 %v11661_v27  ;;  %7857 = vmatprep.subr.bf16.mxu1 %v11666_v29  ;;  %v11733_v27 = vld [vmem:[#allocation5 + $0x1150] ss:$24 sps:$4 sm:$0xff]   ;;  %v11738_v29 = vld [vmem:[#allocation5 + $0x177c] ss:$24 sps:$4 sm:$0xff]  }
 0x35f   :  { %8267 = vmatprep.subr.bf16.mxu0 %v11669_v30  ;;  %7887 = vmatprep.mubr.bf16.mxu1 %v12561_v33  ;;  %v11741_v30 = vld [vmem:[#allocation5 + $0x1184] ss:$24 sps:$4 sm:$0xff]  }
 0x360   :  { %8297 = vmatprep.mubr.bf16.mxu0 %v12537_v53  ;;  %v11685_v53 = vld [vmem:[#allocation5 + $0xfd0] ss:$24 sps:$4 sm:$0xff]  }
 0x361   :  { %7858 = vmatpush1.bf16.msra.mxu1 %v11664_v10  ;;  %v11736_v10 = vld [vmem:[#allocation5 + $0x1778] ss:$24 sps:$4 sm:$0xff]  }
 0x362   :  { %8268 = vmatpush1.bf16.msra.mxu0 %v11667_v31  ;;  %7859 = vmatprep.subr.bf16.mxu1 %v11672_v35  ;;  %v11739_v31 = vld [vmem:[#allocation5 + $0x1180] ss:$24 sps:$4 sm:$0xff]   ;;  %v11744_v35 = vld [vmem:[#allocation5 + $0x17ac] ss:$24 sps:$4 sm:$0xff]  }
 0x363   :  { %8269 = vmatprep.subr.bf16.mxu0 %v11675_v42  ;;  %v11747_v42 = vld [vmem:[#allocation5 + $0x11b4] ss:$24 sps:$4 sm:$0xff]  }
 0x365   :  { %7860 = vmatpush1.bf16.msra.mxu1 %v11670_v38  ;;  %v11742_v38 = vld [vmem:[#allocation5 + $0x17a8] ss:$24 sps:$4 sm:$0xff]  }
 0x366   :  { %8270 = vmatpush1.bf16.msra.mxu0 %v11673_v39  ;;  %7861 = vmatprep.subr.bf16.mxu1 %v11678_v36  ;;  %v11745_v39 = vld [vmem:[#allocation5 + $0x11b0] ss:$24 sps:$4 sm:$0xff]   ;;  %v11750_v36 = vld [vmem:[#allocation5 + $0x17dc] ss:$24 sps:$4 sm:$0xff]  }
 0x367   :  { %8271 = vmatprep.subr.bf16.mxu0 %v11681_v32  ;;  %v11753_v32 = vld [vmem:[#allocation5 + $0x11e4] ss:$24 sps:$4 sm:$0xff]  }
 0x369   :  { %7862 = vmatpush1.bf16.msra.mxu1 %v11676_v44  ;;  %v11748_v44 = vld [vmem:[#allocation5 + $0x17d8] ss:$24 sps:$4 sm:$0xff]  }
 0x36a   :  { %8272 = vmatpush1.bf16.msra.mxu0 %v11679_v45  ;;  %7863 = vmatprep.subr.bf16.mxu1 %v11684_v49  ;;  %v11751_v45 = vld [vmem:[#allocation5 + $0x11e0] ss:$24 sps:$4 sm:$0xff]   ;;  %v11756_v49 = vld [vmem:[#allocation5 + $0x180c] ss:$24 sps:$4 sm:$0xff]  }
 0x36b   :  { %8273 = vmatprep.subr.bf16.mxu0 %v11687_v47  ;;  %v11759_v47 = vld [vmem:[#allocation5 + $0x1214] ss:$24 sps:$4 sm:$0xff]  }
 0x36d   :  { %7864 = vmatpush1.bf16.msra.mxu1 %v11682_v51  ;;  %v11754_v51 = vld [vmem:[#allocation5 + $0x1808] ss:$24 sps:$4 sm:$0xff]  }
 0x36e   :  { %8274 = vmatpush1.bf16.msra.mxu0 %v11685_v53  ;;  %7865 = vmatprep.subr.bf16.mxu1 %v11690_v52  ;;  %v11757_v53 = vld [vmem:[#allocation5 + $0x1210] ss:$24 sps:$4 sm:$0xff]   ;;  %v11762_v52 = vld [vmem:[#allocation5 + $0x183c] ss:$24 sps:$4 sm:$0xff]  }
 0x36f   :  { %8275 = vmatprep.subr.bf16.mxu0 %v11693_v54  ;;  %v11765_v54 = vld [vmem:[#allocation5 + $0x1244] ss:$24 sps:$4 sm:$0xff]  }
 0x371   :  { %7866 = vmatpush1.bf16.msra.mxu1 %v11688_v56  ;;  %v11760_v56 = vld [vmem:[#allocation5 + $0x1838] ss:$24 sps:$4 sm:$0xff]  }
 0x372   :  { %8276 = vmatpush1.bf16.msra.mxu0 %v11691_v57  ;;  %7867 = vmatprep.subr.bf16.mxu1 %v11696_v59  ;;  %v11763_v57 = vld [vmem:[#allocation5 + $0x1240] ss:$24 sps:$4 sm:$0xff]   ;;  %v11768_v59 = vld [vmem:[#allocation5 + $0x186c] ss:$24 sps:$4 sm:$0xff]  }
 0x373   :  { %8277 = vmatprep.subr.bf16.mxu0 %v11699_v60  ;;  %v11771_v60 = vld [vmem:[#allocation5 + $0x1274] ss:$24 sps:$4 sm:$0xff]  }
 0x375   :  { %7868 = vmatpush1.bf16.msra.mxu1 %v11694_v61  ;;  %v11766_v61 = vld [vmem:[#allocation5 + $0x1868] ss:$24 sps:$4 sm:$0xff]  }
 0x376   :  { %8278 = vmatpush1.bf16.msra.mxu0 %v11697_v62  ;;  %7869 = vmatprep.subr.bf16.mxu1 %v11702_v63  ;;  %v11769_v62 = vld [vmem:[#allocation5 + $0x1270] ss:$24 sps:$4 sm:$0xff]   ;;  %v11774_v63 = vld [vmem:[#allocation5 + $0x189c] ss:$24 sps:$4 sm:$0xff]  }
 0x377   :  { %8279 = vmatprep.subr.bf16.mxu0 %v11705_v0  ;;  %v11772_v0 = vld [vmem:[#allocation5 + $0x1898] ss:$24 sps:$4 sm:$0xff]  }
 0x379   :  { %7870 = vmatpush1.bf16.msra.mxu1 %v11700_v1  ;;  %v11775_v1 = vld [vmem:[#allocation5 + $0x12a0] ss:$24 sps:$4 sm:$0xff]  }
 0x37a   :  { %8280 = vmatpush1.bf16.msra.mxu0 %v11703_v4  ;;  %7871 = vmatprep.subr.bf16.mxu1 %v11708_v6  ;;  %v11780_v4 = vld [vmem:[#allocation5 + $0x18cc] ss:$24 sps:$4 sm:$0xff]  }
 0x37b   :  { %8281 = vmatprep.subr.bf16.mxu0 %v11711_v22  ;;  %v11783_v6 = vld [vmem:[#allocation5 + $0x12d4] ss:$24 sps:$4 sm:$0xff]   ;;  %v11778_v22 = vld [vmem:[#allocation5 + $0x18c8] ss:$24 sps:$4 sm:$0xff]  }
 0x37d   :  { %7872 = vmatpush1.bf16.msra.mxu1 %v11706_v12  ;;  %v11786_v12 = vld [vmem:[#allocation5 + $0x18fc] ss:$24 sps:$4 sm:$0xff]  }
 0x37e   :  { %8282 = vmatpush1.bf16.msra.mxu0 %v11709_v13  ;;  %7873 = vmatprep.subr.bf16.mxu1 %v11714_v15  ;;  %v11789_v13 = vld [vmem:[#allocation5 + $0x1304] ss:$24 sps:$4 sm:$0xff]   ;;  %v11784_v15 = vld [vmem:[#allocation5 + $0x18f8] ss:$24 sps:$4 sm:$0xff]  }
 0x37f   :  { %8283 = vmatprep.subr.bf16.mxu0 %v11717_v16  ;;  %v11787_v16 = vld [vmem:[#allocation5 + $0x1300] ss:$24 sps:$4 sm:$0xff]  }
 0x381   :  { %7874 = vmatpush1.bf16.msra.mxu1 %v11712_v55  ;;  %v11792_v55 = vld [vmem:[#allocation5 + $0x192c] ss:$24 sps:$4 sm:$0xff]  }
 0x382   :  { %8284 = vmatpush1.bf16.msra.mxu0 %v11715_v28  ;;  %7875 = vmatprep.subr.bf16.mxu1 %v11720_v17  ;;  %v11795_v28 = vld [vmem:[#allocation5 + $0x1334] ss:$24 sps:$4 sm:$0xff]   ;;  %v11790_v17 = vld [vmem:[#allocation5 + $0x1928] ss:$24 sps:$4 sm:$0xff]  }
 0x383   :  { %8285 = vmatprep.subr.bf16.mxu0 %v11723_v58  ;;  %v11793_v58 = vld [vmem:[#allocation5 + $0x1330] ss:$24 sps:$4 sm:$0xff]  }
 0x385   :  { %7876 = vmatpush1.bf16.msra.mxu1 %v11718_v18  ;;  %v11798_v18 = vld [vmem:[#allocation5 + $0x195c] ss:$24 sps:$4 sm:$0xff]  }
 0x386   :  { %8286 = vmatpush1.bf16.msra.mxu0 %v11721_v2  ;;  %7877 = vmatprep.subr.bf16.mxu1 %v11726_v19  ;;  %v11801_v2 = vld [vmem:[#allocation5 + $0x1364] ss:$24 sps:$4 sm:$0xff]   ;;  %v11796_v19 = vld [vmem:[#allocation5 + $0x1958] ss:$24 sps:$4 sm:$0xff]  }
 0x387   :  { %8287 = vmatprep.subr.bf16.mxu0 %v11729_v20  ;;  %v11799_v20 = vld [vmem:[#allocation5 + $0x1360] ss:$24 sps:$4 sm:$0xff]  }
 0x389   :  { %7878 = vmatpush1.bf16.msra.mxu1 %v11724_v21  ;;  %v11804_v21 = vld [vmem:[#allocation5 + $0x198c] ss:$24 sps:$4 sm:$0xff]  }
 0x38a   :  { %8288 = vmatpush1.bf16.msra.mxu0 %v11727_v24  ;;  %7879 = vmatprep.subr.bf16.mxu1 %v11732_v25  ;;  %v11807_v24 = vld [vmem:[#allocation5 + $0x1394] ss:$24 sps:$4 sm:$0xff]   ;;  %v11802_v25 = vld [vmem:[#allocation5 + $0x1988] ss:$24 sps:$4 sm:$0xff]  }
 0x38b   :  { %8289 = vmatprep.subr.bf16.mxu0 %v11735_v8  ;;  %v11805_v8 = vld [vmem:[#allocation5 + $0x1390] ss:$24 sps:$4 sm:$0xff]  }
 0x38d   :  { %7880 = vmatpush1.bf16.msra.mxu1 %v11730_v26  ;;  %v11810_v26 = vld [vmem:[#allocation5 + $0x19bc] ss:$24 sps:$4 sm:$0xff]  }
 0x38e   :  { %8290 = vmatpush1.bf16.msra.mxu0 %v11733_v27  ;;  %7881 = vmatprep.subr.bf16.mxu1 %v11738_v29  ;;  %v11813_v27 = vld [vmem:[#allocation5 + $0x13c4] ss:$24 sps:$4 sm:$0xff]   ;;  %v11808_v29 = vld [vmem:[#allocation5 + $0x19b8] ss:$24 sps:$4 sm:$0xff]  }
 0x38f   :  { %8291 = vmatprep.subr.bf16.mxu0 %v11741_v30  ;;  %v11811_v30 = vld [vmem:[#allocation5 + $0x13c0] ss:$24 sps:$4 sm:$0xff]  }
 0x391   :  { %7882 = vmatpush1.bf16.msra.mxu1 %v11736_v10  ;;  %v11816_v10 = vld [vmem:[#allocation5 + $0x19ec] ss:$24 sps:$4 sm:$0xff]  }
 0x392   :  { %8292 = vmatpush1.bf16.msra.mxu0 %v11739_v31  ;;  %7883 = vmatprep.subr.bf16.mxu1 %v11744_v35  ;;  %v11819_v31 = vld [vmem:[#allocation5 + $0x13f4] ss:$24 sps:$4 sm:$0xff]   ;;  %v11814_v35 = vld [vmem:[#allocation5 + $0x19e8] ss:$24 sps:$4 sm:$0xff]  }
 0x393   :  { %8293 = vmatprep.subr.bf16.mxu0 %v11747_v42  ;;  %v11817_v42 = vld [vmem:[#allocation5 + $0x13f0] ss:$24 sps:$4 sm:$0xff]  }
 0x395   :  { %7884 = vmatpush1.bf16.msra.mxu1 %v11742_v38  ;;  %v11822_v38 = vld [vmem:[#allocation5 + $0x1a1c] ss:$24 sps:$4 sm:$0xff]  }
 0x396   :  { %8294 = vmatpush1.bf16.msra.mxu0 %v11745_v39  ;;  %7885 = vmatprep.subr.bf16.mxu1 %v11750_v36  ;;  %v11825_v39 = vld [vmem:[#allocation5 + $0x1424] ss:$24 sps:$4 sm:$0xff]   ;;  %v11820_v36 = vld [vmem:[#allocation5 + $0x1a18] ss:$24 sps:$4 sm:$0xff]  }
 0x397   :  { %8295 = vmatprep.subr.bf16.mxu0 %v11753_v32  ;;  %v11823_v32 = vld [vmem:[#allocation5 + $0x1420] ss:$24 sps:$4 sm:$0xff]  }
 0x399   :  { %7886 = vmatpush1.bf16.msra.mxu1 %v11748_v44  ;;  %v11828_v44 = vld [vmem:[#allocation5 + $0x1a4c] ss:$24 sps:$4 sm:$0xff]  }
 0x39a   :  { %8296 = vmatpush1.bf16.msra.mxu0 %v11751_v45  ;;  %7896 = vmatprep.subr.bf16.mxu1 %v11756_v49  ;;  %v11831_v45 = vld [vmem:[#allocation5 + $0x1454] ss:$24 sps:$4 sm:$0xff]   ;;  %v11826_v49 = vld [vmem:[#allocation5 + $0x1a48] ss:$24 sps:$4 sm:$0xff]  }
 0x39b   :  { %8306 = vmatprep.subr.bf16.mxu0 %v11759_v47  ;;  %v11829_v47 = vld [vmem:[#allocation5 + $0x1450] ss:$24 sps:$4 sm:$0xff]  }
 0x39c   :  { %7888 = vmatmul.mubr.bf16.vlgmr.msra.gmra.mrb[4].mxu1 %v12567_v43 }
 0x39d   :  { %8298 = vmatmul.mubr.bf16.vlgmr.msra.gmra.mrb[4].mxu0 %v12543_v11  ;;  %7897 = vmatpush1.bf16.msra.mxu1 %v11754_v51  ;;  %v11777_v11 = vld [vmem:[#allocation5 + $0x12a4] ss:$24 sps:$4 sm:$0xff]  }
 0x39e   :  { %8307 = vmatpush1.bf16.msra.mxu0 %v11757_v53  ;;  %7898 = vmatprep.subr.bf16.mxu1 %v11762_v52  ;;  %v11834_v51 = vld [vmem:[#allocation5 + $0x1a7c] ss:$24 sps:$4 sm:$0xff]   ;;  %v11832_v52 = vld [vmem:[#allocation5 + $0x1a78] ss:$24 sps:$4 sm:$0xff]  }
 0x39f   :  { %8308 = vmatprep.subr.bf16.mxu0 %v11765_v54  ;;  %7928 = vmatprep.mubr.bf16.mxu1 %v12571_v50  ;;  %v11837_v53 = vld [vmem:[#allocation5 + $0x1484] ss:$24 sps:$4 sm:$0xff]   ;;  %v11835_v54 = vld [vmem:[#allocation5 + $0x1480] ss:$24 sps:$4 sm:$0xff]  }
 0x3a0   :  { %8338 = vmatprep.mubr.bf16.mxu0 %v12549_v41  ;;  %v11781_v41 = vld [vmem:[#allocation5 + $0x12d0] ss:$24 sps:$4 sm:$0xff]  }
 0x3a1   :  { %7899 = vmatpush1.bf16.msra.mxu1 %v11760_v56  ;;  %v11840_v56 = vld [vmem:[#allocation5 + $0x1aac] ss:$24 sps:$4 sm:$0xff]  }
 0x3a2   :  { %8309 = vmatpush1.bf16.msra.mxu0 %v11763_v57  ;;  %7900 = vmatprep.subr.bf16.mxu1 %v11768_v59  ;;  %v11843_v57 = vld [vmem:[#allocation5 + $0x14b4] ss:$24 sps:$4 sm:$0xff]   ;;  %v11838_v59 = vld [vmem:[#allocation5 + $0x1aa8] ss:$24 sps:$4 sm:$0xff]  }
 0x3a3   :  { %8310 = vmatprep.subr.bf16.mxu0 %v11771_v60  ;;  %v11841_v60 = vld [vmem:[#allocation5 + $0x14b0] ss:$24 sps:$4 sm:$0xff]  }
 0x3a5   :  { %7901 = vmatpush1.bf16.msra.mxu1 %v11766_v61  ;;  %v11846_v61 = vld [vmem:[#allocation5 + $0x1adc] ss:$24 sps:$4 sm:$0xff]  }
 0x3a6   :  { %8311 = vmatpush1.bf16.msra.mxu0 %v11769_v62  ;;  %7902 = vmatprep.subr.bf16.mxu1 %v11774_v63  ;;  %v11849_v62 = vld [vmem:[#allocation5 + $0x14e4] ss:$24 sps:$4 sm:$0xff]   ;;  %v11844_v63 = vld [vmem:[#allocation5 + $0x1ad8] ss:$24 sps:$4 sm:$0xff]  }
 0x3a7   :  { %8312 = vmatprep.subr.bf16.mxu0 %v11777_v11  ;;  %v11847_v11 = vld [vmem:[#allocation5 + $0x14e0] ss:$24 sps:$4 sm:$0xff]  }
 0x3a9   :  { %7903 = vmatpush1.bf16.msra.mxu1 %v11772_v0  ;;  %v11852_v0 = vld [vmem:[#allocation5 + $0x1b0c] ss:$24 sps:$4 sm:$0xff]  }
 0x3aa   :  { %8313 = vmatpush1.bf16.msra.mxu0 %v11775_v1  ;;  %7904 = vmatprep.subr.bf16.mxu1 %v11780_v4  ;;  %v11855_v1 = vld [vmem:[#allocation5 + $0x1514] ss:$24 sps:$4 sm:$0xff]   ;;  %v11850_v4 = vld [vmem:[#allocation5 + $0x1b08] ss:$24 sps:$4 sm:$0xff]  }
 0x3ab   :  { %8314 = vmatprep.subr.bf16.mxu0 %v11783_v6  ;;  %v11853_v6 = vld [vmem:[#allocation5 + $0x1510] ss:$24 sps:$4 sm:$0xff]  }
 0x3ad   :  { %7905 = vmatpush1.bf16.msra.mxu1 %v11778_v22  ;;  %v11858_v22 = vld [vmem:[#allocation5 + $0x1b3c] ss:$24 sps:$4 sm:$0xff]  }
 0x3ae   :  { %8315 = vmatpush1.bf16.msra.mxu0 %v11781_v41  ;;  %7906 = vmatprep.subr.bf16.mxu1 %v11786_v12  ;;  %v11861_v41 = vld [vmem:[#allocation5 + $0x1544] ss:$24 sps:$4 sm:$0xff]   ;;  %v11856_v12 = vld [vmem:[#allocation5 + $0x1b38] ss:$24 sps:$4 sm:$0xff]  }
 0x3af   :  { %8316 = vmatprep.subr.bf16.mxu0 %v11789_v13  ;;  %v11859_v13 = vld [vmem:[#allocation5 + $0x1540] ss:$24 sps:$4 sm:$0xff]  }
 0x3b1   :  { %7907 = vmatpush1.bf16.msra.mxu1 %v11784_v15  ;;  %v11864_v15 = vld [vmem:[#allocation5 + $0x1b6c] ss:$24 sps:$4 sm:$0xff]  }
 0x3b2   :  { %8317 = vmatpush1.bf16.msra.mxu0 %v11787_v16  ;;  %7908 = vmatprep.subr.bf16.mxu1 %v11792_v55  ;;  %v11867_v16 = vld [vmem:[#allocation5 + $0x1574] ss:$24 sps:$4 sm:$0xff]   ;;  %v11862_v55 = vld [vmem:[#allocation5 + $0x1b68] ss:$24 sps:$4 sm:$0xff]  }
 0x3b3   :  { %8318 = vmatprep.subr.bf16.mxu0 %v11795_v28  ;;  %v11865_v28 = vld [vmem:[#allocation5 + $0x1570] ss:$24 sps:$4 sm:$0xff]  }
 0x3b5   :  { %7909 = vmatpush1.bf16.msra.mxu1 %v11790_v17  ;;  %v11870_v17 = vld [vmem:[#allocation5 + $0x1b9c] ss:$24 sps:$4 sm:$0xff]  }
 0x3b6   :  { %8319 = vmatpush1.bf16.msra.mxu0 %v11793_v58  ;;  %7910 = vmatprep.subr.bf16.mxu1 %v11798_v18  ;;  %v11868_v58 = vld [vmem:[#allocation5 + $0x1b98] ss:$24 sps:$4 sm:$0xff]  }
 0x3b7   :  { %8320 = vmatprep.subr.bf16.mxu0 %v11801_v2  ;;  %v11871_v18 = vld [vmem:[#allocation5 + $0x15a0] ss:$24 sps:$4 sm:$0xff]   ;;  %v11876_v2 = vld [vmem:[#allocation5 + $0x1bcc] ss:$24 sps:$4 sm:$0xff]  }
 0x3b9   :  { %7911 = vmatpush1.bf16.msra.mxu1 %v11796_v19  ;;  %v11879_v19 = vld [vmem:[#allocation5 + $0x15d4] ss:$24 sps:$4 sm:$0xff]  }
 0x3ba   :  { %8321 = vmatpush1.bf16.msra.mxu0 %v11799_v20  ;;  %7912 = vmatprep.subr.bf16.mxu1 %v11804_v21  ;;  %v11874_v20 = vld [vmem:[#allocation5 + $0x1bc8] ss:$24 sps:$4 sm:$0xff]   ;;  %v11882_v21 = vld [vmem:[#allocation5 + $0x1bfc] ss:$24 sps:$4 sm:$0xff]  }
 0x3bb   :  { %8322 = vmatprep.subr.bf16.mxu0 %v11807_v24  ;;  %v11885_v24 = vld [vmem:[#allocation5 + $0x1604] ss:$24 sps:$4 sm:$0xff]  }
 0x3bd   :  { %7913 = vmatpush1.bf16.msra.mxu1 %v11802_v25  ;;  %v11880_v25 = vld [vmem:[#allocation5 + $0x1bf8] ss:$24 sps:$4 sm:$0xff]  }
 0x3be   :  { %8323 = vmatpush1.bf16.msra.mxu0 %v11805_v8  ;;  %7914 = vmatprep.subr.bf16.mxu1 %v11810_v26  ;;  %v11883_v8 = vld [vmem:[#allocation5 + $0x1600] ss:$24 sps:$4 sm:$0xff]   ;;  %v11888_v26 = vld [vmem:[#allocation5 + $0x1c2c] ss:$24 sps:$4 sm:$0xff]  }
 0x3bf   :  { %8324 = vmatprep.subr.bf16.mxu0 %v11813_v27  ;;  %v11891_v27 = vld [vmem:[#allocation5 + $0x1634] ss:$24 sps:$4 sm:$0xff]  }
 0x3c1   :  { %7915 = vmatpush1.bf16.msra.mxu1 %v11808_v29  ;;  %v11886_v29 = vld [vmem:[#allocation5 + $0x1c28] ss:$24 sps:$4 sm:$0xff]  }
 0x3c2   :  { %8325 = vmatpush1.bf16.msra.mxu0 %v11811_v30  ;;  %7916 = vmatprep.subr.bf16.mxu1 %v11816_v10  ;;  %v11889_v30 = vld [vmem:[#allocation5 + $0x1630] ss:$24 sps:$4 sm:$0xff]   ;;  %v11894_v10 = vld [vmem:[#allocation5 + $0x1c5c] ss:$24 sps:$4 sm:$0xff]  }
 0x3c3   :  { %8326 = vmatprep.subr.bf16.mxu0 %v11819_v31  ;;  %v11897_v31 = vld [vmem:[#allocation5 + $0x1664] ss:$24 sps:$4 sm:$0xff]  }
 0x3c5   :  { %7917 = vmatpush1.bf16.msra.mxu1 %v11814_v35  ;;  %v11892_v35 = vld [vmem:[#allocation5 + $0x1c58] ss:$24 sps:$4 sm:$0xff]  }
 0x3c6   :  { %8327 = vmatpush1.bf16.msra.mxu0 %v11817_v42  ;;  %7918 = vmatprep.subr.bf16.mxu1 %v11822_v38  ;;  %v11895_v42 = vld [vmem:[#allocation5 + $0x1660] ss:$24 sps:$4 sm:$0xff]   ;;  %v11900_v38 = vld [vmem:[#allocation5 + $0x1c8c] ss:$24 sps:$4 sm:$0xff]  }
 0x3c7   :  { %8328 = vmatprep.subr.bf16.mxu0 %v11825_v39  ;;  %v11903_v39 = vld [vmem:[#allocation5 + $0x1694] ss:$24 sps:$4 sm:$0xff]  }
 0x3c9   :  { %7919 = vmatpush1.bf16.msra.mxu1 %v11820_v36  ;;  %v11898_v36 = vld [vmem:[#allocation5 + $0x1c88] ss:$24 sps:$4 sm:$0xff]  }
 0x3ca   :  { %8329 = vmatpush1.bf16.msra.mxu0 %v11823_v32  ;;  %7920 = vmatprep.subr.bf16.mxu1 %v11828_v44  ;;  %v11901_v32 = vld [vmem:[#allocation5 + $0x1690] ss:$24 sps:$4 sm:$0xff]   ;;  %v11906_v44 = vld [vmem:[#allocation5 + $0x1cbc] ss:$24 sps:$4 sm:$0xff]  }
 0x3cb   :  { %8330 = vmatprep.subr.bf16.mxu0 %v11831_v45  ;;  %v11909_v45 = vld [vmem:[#allocation5 + $0x16c4] ss:$24 sps:$4 sm:$0xff]  }
 0x3cd   :  { %7921 = vmatpush1.bf16.msra.mxu1 %v11826_v49  ;;  %v11904_v49 = vld [vmem:[#allocation5 + $0x1cb8] ss:$24 sps:$4 sm:$0xff]  }
 0x3ce   :  { %8331 = vmatpush1.bf16.msra.mxu0 %v11829_v47  ;;  %7922 = vmatprep.subr.bf16.mxu1 %v11834_v51  ;;  %v11907_v47 = vld [vmem:[#allocation5 + $0x16c0] ss:$24 sps:$4 sm:$0xff]   ;;  %v11912_v51 = vld [vmem:[#allocation5 + $0x1cec] ss:$24 sps:$4 sm:$0xff]  }
 0x3cf   :  { %8332 = vmatprep.subr.bf16.mxu0 %v11837_v53  ;;  %v11915_v53 = vld [vmem:[#allocation5 + $0x16f4] ss:$24 sps:$4 sm:$0xff]  }
 0x3d1   :  { %7923 = vmatpush1.bf16.msra.mxu1 %v11832_v52  ;;  %v11910_v52 = vld [vmem:[#allocation5 + $0x1ce8] ss:$24 sps:$4 sm:$0xff]  }
 0x3d2   :  { %8333 = vmatpush1.bf16.msra.mxu0 %v11835_v54  ;;  %7924 = vmatprep.subr.bf16.mxu1 %v11840_v56  ;;  %v11913_v54 = vld [vmem:[#allocation5 + $0x16f0] ss:$24 sps:$4 sm:$0xff]   ;;  %v11918_v56 = vld [vmem:[#allocation5 + $0x1d1c] ss:$24 sps:$4 sm:$0xff]  }
 0x3d3   :  { %8334 = vmatprep.subr.bf16.mxu0 %v11843_v57  ;;  %v11921_v57 = vld [vmem:[#allocation5 + $0x1724] ss:$24 sps:$4 sm:$0xff]  }
 0x3d5   :  { %7925 = vmatpush1.bf16.msra.mxu1 %v11838_v59  ;;  %v11916_v59 = vld [vmem:[#allocation5 + $0x1d18] ss:$24 sps:$4 sm:$0xff]  }
 0x3d6   :  { %8335 = vmatpush1.bf16.msra.mxu0 %v11841_v60  ;;  %7926 = vmatprep.subr.bf16.mxu1 %v11846_v61  ;;  %v11919_v60 = vld [vmem:[#allocation5 + $0x1720] ss:$24 sps:$4 sm:$0xff]   ;;  %v11924_v61 = vld [vmem:[#allocation5 + $0x1d4c] ss:$24 sps:$4 sm:$0xff]  }
 0x3d7   :  { %8336 = vmatprep.subr.bf16.mxu0 %v11849_v62  ;;  %v11927_v62 = vld [vmem:[#allocation5 + $0x1754] ss:$24 sps:$4 sm:$0xff]  }
 0x3d9   :  { %7927 = vmatpush1.bf16.msra.mxu1 %v11844_v63  ;;  %v11922_v63 = vld [vmem:[#allocation5 + $0x1d48] ss:$24 sps:$4 sm:$0xff]  }
 0x3da   :  { %8337 = vmatpush1.bf16.msra.mxu0 %v11847_v11  ;;  %7937 = vmatprep.subr.bf16.mxu1 %v11852_v0  ;;  %v11925_v11 = vld [vmem:[#allocation5 + $0x1750] ss:$24 sps:$4 sm:$0xff]   ;;  %v11930_v0 = vld [vmem:[#allocation5 + $0x1d7c] ss:$24 sps:$4 sm:$0xff]  }
 0x3db   :  { %8347 = vmatprep.subr.bf16.mxu0 %v11855_v1  ;;  %v11933_v1 = vld [vmem:[#allocation5 + $0x1784] ss:$24 sps:$4 sm:$0xff]  }
 0x3dc   :  { %7929 = vmatmul.mubr.bf16.vlgmr.msra.gmra.mrb[4].mxu1 %v12579_v3 }
 0x3dd   :  { %8339 = vmatmul.mubr.bf16.vlgmr.msra.gmra.mrb[4].mxu0 %v12555_v23  ;;  %7938 = vmatpush1.bf16.msra.mxu1 %v11850_v4  ;;  %v11873_v23 = vld [vmem:[#allocation5 + $0x15a4] ss:$24 sps:$4 sm:$0xff]   ;;  %v11928_v4 = vld [vmem:[#allocation5 + $0x1d78] ss:$24 sps:$4 sm:$0xff]  }
 0x3de   :  { %8348 = vmatpush1.bf16.msra.mxu0 %v11853_v6  ;;  %7939 = vmatprep.subr.bf16.mxu1 %v11858_v22  ;;  %v11931_v6 = vld [vmem:[#allocation5 + $0x1780] ss:$24 sps:$4 sm:$0xff]   ;;  %v11936_v22 = vld [vmem:[#allocation5 + $0x1dac] ss:$24 sps:$4 sm:$0xff]  }
 0x3df   :  { %8349 = vmatprep.subr.bf16.mxu0 %v11861_v41  ;;  %7969 = vmatprep.mubr.bf16.mxu1 %v12583_v9  ;;  %v11939_v41 = vld [vmem:[#allocation5 + $0x17b4] ss:$24 sps:$4 sm:$0xff]  }
 0x3e0   :  { %8379 = vmatprep.mubr.bf16.mxu0 %v12561_v33  ;;  %v11877_v33 = vld [vmem:[#allocation5 + $0x15d0] ss:$24 sps:$4 sm:$0xff]  }
 0x3e1   :  { %7940 = vmatpush1.bf16.msra.mxu1 %v11856_v12  ;;  %v11934_v12 = vld [vmem:[#allocation5 + $0x1da8] ss:$24 sps:$4 sm:$0xff]  }
 0x3e2   :  { %8350 = vmatpush1.bf16.msra.mxu0 %v11859_v13  ;;  %7941 = vmatprep.subr.bf16.mxu1 %v11864_v15  ;;  %v11937_v13 = vld [vmem:[#allocation5 + $0x17b0] ss:$24 sps:$4 sm:$0xff]   ;;  %v11942_v15 = vld [vmem:[#allocation5 + $0x1ddc] ss:$24 sps:$4 sm:$0xff]  }
 0x3e3   :  { %8351 = vmatprep.subr.bf16.mxu0 %v11867_v16  ;;  %v11945_v16 = vld [vmem:[#allocation5 + $0x17e4] ss:$24 sps:$4 sm:$0xff]  }
 0x3e5   :  { %7942 = vmatpush1.bf16.msra.mxu1 %v11862_v55  ;;  %v11940_v55 = vld [vmem:[#allocation5 + $0x1dd8] ss:$24 sps:$4 sm:$0xff]  }
 0x3e6   :  { %8352 = vmatpush1.bf16.msra.mxu0 %v11865_v28  ;;  %7943 = vmatprep.subr.bf16.mxu1 %v11870_v17  ;;  %v11943_v28 = vld [vmem:[#allocation5 + $0x17e0] ss:$24 sps:$4 sm:$0xff]   ;;  %v11948_v17 = vld [vmem:[#allocation5 + $0x1e0c] ss:$24 sps:$4 sm:$0xff]  }
 0x3e7   :  { %8353 = vmatprep.subr.bf16.mxu0 %v11873_v23  ;;  %v11951_v23 = vld [vmem:[#allocation5 + $0x1814] ss:$24 sps:$4 sm:$0xff]  }
 0x3e9   :  { %7944 = vmatpush1.bf16.msra.mxu1 %v11868_v58  ;;  %v11946_v58 = vld [vmem:[#allocation5 + $0x1e08] ss:$24 sps:$4 sm:$0xff]  }
 0x3ea   :  { %8354 = vmatpush1.bf16.msra.mxu0 %v11871_v18  ;;  %7945 = vmatprep.subr.bf16.mxu1 %v11876_v2  ;;  %v11949_v18 = vld [vmem:[#allocation5 + $0x1810] ss:$24 sps:$4 sm:$0xff]   ;;  %v11954_v2 = vld [vmem:[#allocation5 + $0x1e3c] ss:$24 sps:$4 sm:$0xff]  }
 0x3eb   :  { %8355 = vmatprep.subr.bf16.mxu0 %v11879_v19  ;;  %v11957_v19 = vld [vmem:[#allocation5 + $0x1844] ss:$24 sps:$4 sm:$0xff]  }
 0x3ed   :  { %7946 = vmatpush1.bf16.msra.mxu1 %v11874_v20  ;;  %v11952_v20 = vld [vmem:[#allocation5 + $0x1e38] ss:$24 sps:$4 sm:$0xff]  }
 0x3ee   :  { %8356 = vmatpush1.bf16.msra.mxu0 %v11877_v33  ;;  %7947 = vmatprep.subr.bf16.mxu1 %v11882_v21  ;;  %v11955_v33 = vld [vmem:[#allocation5 + $0x1840] ss:$24 sps:$4 sm:$0xff]   ;;  %v11960_v21 = vld [vmem:[#allocation5 + $0x1e6c] ss:$24 sps:$4 sm:$0xff]  }
 0x3ef   :  { %8357 = vmatprep.subr.bf16.mxu0 %v11885_v24  ;;  %v11963_v24 = vld [vmem:[#allocation5 + $0x1874] ss:$24 sps:$4 sm:$0xff]  }
 0x3f1   :  { %7948 = vmatpush1.bf16.msra.mxu1 %v11880_v25  ;;  %v11958_v25 = vld [vmem:[#allocation5 + $0x1e68] ss:$24 sps:$4 sm:$0xff]  }
 0x3f2   :  { %8358 = vmatpush1.bf16.msra.mxu0 %v11883_v8  ;;  %7949 = vmatprep.subr.bf16.mxu1 %v11888_v26  ;;  %v11961_v8 = vld [vmem:[#allocation5 + $0x1870] ss:$24 sps:$4 sm:$0xff]   ;;  %v11966_v26 = vld [vmem:[#allocation5 + $0x1e9c] ss:$24 sps:$4 sm:$0xff]  }
 0x3f3   :  { %8359 = vmatprep.subr.bf16.mxu0 %v11891_v27  ;;  %v11964_v27 = vld [vmem:[#allocation5 + $0x1e98] ss:$24 sps:$4 sm:$0xff]  }
 0x3f5   :  { %7950 = vmatpush1.bf16.msra.mxu1 %v11886_v29  ;;  %v11967_v29 = vld [vmem:[#allocation5 + $0x18a0] ss:$24 sps:$4 sm:$0xff]  }
 0x3f6   :  { %8360 = vmatpush1.bf16.msra.mxu0 %v11889_v30  ;;  %7951 = vmatprep.subr.bf16.mxu1 %v11894_v10  ;;  %v11972_v30 = vld [vmem:[#allocation5 + $0x1ecc] ss:$24 sps:$4 sm:$0xff]  }
 0x3f7   :  { %8361 = vmatprep.subr.bf16.mxu0 %v11897_v31  ;;  %v11975_v10 = vld [vmem:[#allocation5 + $0x18d4] ss:$24 sps:$4 sm:$0xff]   ;;  %v11970_v31 = vld [vmem:[#allocation5 + $0x1ec8] ss:$24 sps:$4 sm:$0xff]  }
 0x3f9   :  { %7952 = vmatpush1.bf16.msra.mxu1 %v11892_v35  ;;  %v11978_v35 = vld [vmem:[#allocation5 + $0x1efc] ss:$24 sps:$4 sm:$0xff]  }
 0x3fa   :  { %8362 = vmatpush1.bf16.msra.mxu0 %v11895_v42  ;;  %7953 = vmatprep.subr.bf16.mxu1 %v11900_v38  ;;  %v11981_v42 = vld [vmem:[#allocation5 + $0x1904] ss:$24 sps:$4 sm:$0xff]   ;;  %v11976_v38 = vld [vmem:[#allocation5 + $0x1ef8] ss:$24 sps:$4 sm:$0xff]  }
 0x3fb   :  { %8363 = vmatprep.subr.bf16.mxu0 %v11903_v39  ;;  %v11979_v39 = vld [vmem:[#allocation5 + $0x1900] ss:$24 sps:$4 sm:$0xff]  }
 0x3fd   :  { %7954 = vmatpush1.bf16.msra.mxu1 %v11898_v36  ;;  %v11984_v36 = vld [vmem:[#allocation5 + $0x1f2c] ss:$24 sps:$4 sm:$0xff]  }
 0x3fe   :  { %8364 = vmatpush1.bf16.msra.mxu0 %v11901_v32  ;;  %7955 = vmatprep.subr.bf16.mxu1 %v11906_v44  ;;  %v11987_v32 = vld [vmem:[#allocation5 + $0x1934] ss:$24 sps:$4 sm:$0xff]   ;;  %v11982_v44 = vld [vmem:[#allocation5 + $0x1f28] ss:$24 sps:$4 sm:$0xff]  }
 0x3ff   :  { %8365 = vmatprep.subr.bf16.mxu0 %v11909_v45  ;;  %v11985_v45 = vld [vmem:[#allocation5 + $0x1930] ss:$24 sps:$4 sm:$0xff]  }
 0x401   :  { %7956 = vmatpush1.bf16.msra.mxu1 %v11904_v49  ;;  %v11990_v49 = vld [vmem:[#allocation5 + $0x1f5c] ss:$24 sps:$4 sm:$0xff]  }
 0x402   :  { %8366 = vmatpush1.bf16.msra.mxu0 %v11907_v47  ;;  %7957 = vmatprep.subr.bf16.mxu1 %v11912_v51  ;;  %v11993_v47 = vld [vmem:[#allocation5 + $0x1964] ss:$24 sps:$4 sm:$0xff]   ;;  %v11988_v51 = vld [vmem:[#allocation5 + $0x1f58] ss:$24 sps:$4 sm:$0xff]  }
 0x403   :  { %8367 = vmatprep.subr.bf16.mxu0 %v11915_v53  ;;  %v11991_v53 = vld [vmem:[#allocation5 + $0x1960] ss:$24 sps:$4 sm:$0xff]  }
 0x405   :  { %7958 = vmatpush1.bf16.msra.mxu1 %v11910_v52  ;;  %v11996_v52 = vld [vmem:[#allocation5 + $0x1f8c] ss:$24 sps:$4 sm:$0xff]  }
 0x406   :  { %8368 = vmatpush1.bf16.msra.mxu0 %v11913_v54  ;;  %7959 = vmatprep.subr.bf16.mxu1 %v11918_v56  ;;  %v11999_v54 = vld [vmem:[#allocation5 + $0x1994] ss:$24 sps:$4 sm:$0xff]   ;;  %v11994_v56 = vld [vmem:[#allocation5 + $0x1f88] ss:$24 sps:$4 sm:$0xff]  }
 0x407   :  { %8369 = vmatprep.subr.bf16.mxu0 %v11921_v57  ;;  %v11997_v57 = vld [vmem:[#allocation5 + $0x1990] ss:$24 sps:$4 sm:$0xff]  }
 0x409   :  { %7960 = vmatpush1.bf16.msra.mxu1 %v11916_v59  ;;  %v12002_v59 = vld [vmem:[#allocation5 + $0x1fbc] ss:$24 sps:$4 sm:$0xff]  }
 0x40a   :  { %8370 = vmatpush1.bf16.msra.mxu0 %v11919_v60  ;;  %7961 = vmatprep.subr.bf16.mxu1 %v11924_v61  ;;  %v12005_v60 = vld [vmem:[#allocation5 + $0x19c4] ss:$24 sps:$4 sm:$0xff]   ;;  %v12000_v61 = vld [vmem:[#allocation5 + $0x1fb8] ss:$24 sps:$4 sm:$0xff]  }
 0x40b   :  { %8371 = vmatprep.subr.bf16.mxu0 %v11927_v62  ;;  %v12003_v62 = vld [vmem:[#allocation5 + $0x19c0] ss:$24 sps:$4 sm:$0xff]  }
 0x40d   :  { %7962 = vmatpush1.bf16.msra.mxu1 %v11922_v63  ;;  %v12008_v63 = vld [vmem:[#allocation5 + $0x1fec] ss:$24 sps:$4 sm:$0xff]  }
 0x40e   :  { %8372 = vmatpush1.bf16.msra.mxu0 %v11925_v11  ;;  %7963 = vmatprep.subr.bf16.mxu1 %v11930_v0  ;;  %v12011_v11 = vld [vmem:[#allocation5 + $0x19f4] ss:$24 sps:$4 sm:$0xff]   ;;  %v12006_v0 = vld [vmem:[#allocation5 + $0x1fe8] ss:$24 sps:$4 sm:$0xff]  }
 0x40f   :  { %8373 = vmatprep.subr.bf16.mxu0 %v11933_v1  ;;  %v12009_v1 = vld [vmem:[#allocation5 + $0x19f0] ss:$24 sps:$4 sm:$0xff]  }
 0x411   :  { %7964 = vmatpush1.bf16.msra.mxu1 %v11928_v4  ;;  %v12014_v4 = vld [vmem:[#allocation5 + $0x201c] ss:$24 sps:$4 sm:$0xff]  }
 0x412   :  { %8374 = vmatpush1.bf16.msra.mxu0 %v11931_v6  ;;  %7965 = vmatprep.subr.bf16.mxu1 %v11936_v22  ;;  %v12017_v6 = vld [vmem:[#allocation5 + $0x1a24] ss:$24 sps:$4 sm:$0xff]   ;;  %v12012_v22 = vld [vmem:[#allocation5 + $0x2018] ss:$24 sps:$4 sm:$0xff]  }
 0x413   :  { %8375 = vmatprep.subr.bf16.mxu0 %v11939_v41  ;;  %v12015_v41 = vld [vmem:[#allocation5 + $0x1a20] ss:$24 sps:$4 sm:$0xff]  }
 0x415   :  { %7966 = vmatpush1.bf16.msra.mxu1 %v11934_v12  ;;  %v12020_v12 = vld [vmem:[#allocation5 + $0x204c] ss:$24 sps:$4 sm:$0xff]  }
 0x416   :  { %8376 = vmatpush1.bf16.msra.mxu0 %v11937_v13  ;;  %7967 = vmatprep.subr.bf16.mxu1 %v11942_v15  ;;  %v12023_v13 = vld [vmem:[#allocation5 + $0x1a54] ss:$24 sps:$4 sm:$0xff]   ;;  %v12018_v15 = vld [vmem:[#allocation5 + $0x2048] ss:$24 sps:$4 sm:$0xff]  }
 0x417   :  { %8377 = vmatprep.subr.bf16.mxu0 %v11945_v16  ;;  %v12021_v16 = vld [vmem:[#allocation5 + $0x1a50] ss:$24 sps:$4 sm:$0xff]  }
 0x419   :  { %7968 = vmatpush1.bf16.msra.mxu1 %v11940_v55  ;;  %v12026_v55 = vld [vmem:[#allocation5 + $0x207c] ss:$24 sps:$4 sm:$0xff]  }
 0x41a   :  { %8378 = vmatpush1.bf16.msra.mxu0 %v11943_v28  ;;  %7978 = vmatprep.subr.bf16.mxu1 %v11948_v17  ;;  %v12029_v28 = vld [vmem:[#allocation5 + $0x1a84] ss:$24 sps:$4 sm:$0xff]   ;;  %v12024_v17 = vld [vmem:[#allocation5 + $0x2078] ss:$24 sps:$4 sm:$0xff]  }
 0x41b   :  { %8388 = vmatprep.subr.bf16.mxu0 %v11951_v23  ;;  %v12027_v23 = vld [vmem:[#allocation5 + $0x1a80] ss:$24 sps:$4 sm:$0xff]  }
 0x41c   :  { %7970 = vmatmul.mubr.bf16.vlgmr.msra.gmra.mrb[4].mxu1 %v12591_v34 }
 0x41d   :  { %8380 = vmatmul.mubr.bf16.vlgmr.msra.gmra.mrb[4].mxu0 %v12567_v43  ;;  %7979 = vmatpush1.bf16.msra.mxu1 %v11946_v58  ;;  %v11969_v43 = vld [vmem:[#allocation5 + $0x18a4] ss:$24 sps:$4 sm:$0xff]  }
 0x41e   :  { %8389 = vmatpush1.bf16.msra.mxu0 %v11949_v18  ;;  %7980 = vmatprep.subr.bf16.mxu1 %v11954_v2  ;;  %v12032_v58 = vld [vmem:[#allocation5 + $0x20ac] ss:$24 sps:$4 sm:$0xff]   ;;  %v12030_v2 = vld [vmem:[#allocation5 + $0x20a8] ss:$24 sps:$4 sm:$0xff]  }
 0x41f   :  { %8390 = vmatprep.subr.bf16.mxu0 %v11957_v19  ;;  %8010 = vmatprep.mubr.bf16.mxu1 %v12593_v40  ;;  %v12035_v18 = vld [vmem:[#allocation5 + $0x1ab4] ss:$24 sps:$4 sm:$0xff]   ;;  %v12033_v19 = vld [vmem:[#allocation5 + $0x1ab0] ss:$24 sps:$4 sm:$0xff]  }
 0x420   :  { %8420 = vmatprep.mubr.bf16.mxu0 %v12571_v50  ;;  %v11973_v50 = vld [vmem:[#allocation5 + $0x18d0] ss:$24 sps:$4 sm:$0xff]  }
 0x421   :  { %7981 = vmatpush1.bf16.msra.mxu1 %v11952_v20  ;;  %v12038_v20 = vld [vmem:[#allocation5 + $0x20dc] ss:$24 sps:$4 sm:$0xff]  }
 0x422   :  { %8391 = vmatpush1.bf16.msra.mxu0 %v11955_v33  ;;  %7982 = vmatprep.subr.bf16.mxu1 %v11960_v21  ;;  %v12041_v33 = vld [vmem:[#allocation5 + $0x1ae4] ss:$24 sps:$4 sm:$0xff]   ;;  %v12036_v21 = vld [vmem:[#allocation5 + $0x20d8] ss:$24 sps:$4 sm:$0xff]  }
 0x423   :  { %8392 = vmatprep.subr.bf16.mxu0 %v11963_v24  ;;  %v12039_v24 = vld [vmem:[#allocation5 + $0x1ae0] ss:$24 sps:$4 sm:$0xff]  }
 0x425   :  { %7983 = vmatpush1.bf16.msra.mxu1 %v11958_v25  ;;  %v12044_v25 = vld [vmem:[#allocation5 + $0x210c] ss:$24 sps:$4 sm:$0xff]  }
 0x426   :  { %8393 = vmatpush1.bf16.msra.mxu0 %v11961_v8  ;;  %7984 = vmatprep.subr.bf16.mxu1 %v11966_v26  ;;  %v12047_v8 = vld [vmem:[#allocation5 + $0x1b14] ss:$24 sps:$4 sm:$0xff]   ;;  %v12042_v26 = vld [vmem:[#allocation5 + $0x2108] ss:$24 sps:$4 sm:$0xff]  }
 0x427   :  { %8394 = vmatprep.subr.bf16.mxu0 %v11969_v43  ;;  %v12045_v43 = vld [vmem:[#allocation5 + $0x1b10] ss:$24 sps:$4 sm:$0xff]  }
 0x429   :  { %7985 = vmatpush1.bf16.msra.mxu1 %v11964_v27  ;;  %v12050_v27 = vld [vmem:[#allocation5 + $0x213c] ss:$24 sps:$4 sm:$0xff]  }
 0x42a   :  { %8395 = vmatpush1.bf16.msra.mxu0 %v11967_v29  ;;  %7986 = vmatprep.subr.bf16.mxu1 %v11972_v30  ;;  %v12053_v29 = vld [vmem:[#allocation5 + $0x1b44] ss:$24 sps:$4 sm:$0xff]   ;;  %v12048_v30 = vld [vmem:[#allocation5 + $0x2138] ss:$24 sps:$4 sm:$0xff]  }
 0x42b   :  { %8396 = vmatprep.subr.bf16.mxu0 %v11975_v10  ;;  %v12051_v10 = vld [vmem:[#allocation5 + $0x1b40] ss:$24 sps:$4 sm:$0xff]  }
 0x42d   :  { %7987 = vmatpush1.bf16.msra.mxu1 %v11970_v31  ;;  %v12056_v31 = vld [vmem:[#allocation5 + $0x216c] ss:$24 sps:$4 sm:$0xff]  }
 0x42e   :  { %8397 = vmatpush1.bf16.msra.mxu0 %v11973_v50  ;;  %7988 = vmatprep.subr.bf16.mxu1 %v11978_v35  ;;  %v12059_v50 = vld [vmem:[#allocation5 + $0x1b74] ss:$24 sps:$4 sm:$0xff]   ;;  %v12054_v35 = vld [vmem:[#allocation5 + $0x2168] ss:$24 sps:$4 sm:$0xff]  }
 0x42f   :  { %8398 = vmatprep.subr.bf16.mxu0 %v11981_v42  ;;  %v12057_v42 = vld [vmem:[#allocation5 + $0x1b70] ss:$24 sps:$4 sm:$0xff]  }
 0x431   :  { %7989 = vmatpush1.bf16.msra.mxu1 %v11976_v38  ;;  %v12062_v38 = vld [vmem:[#allocation5 + $0x219c] ss:$24 sps:$4 sm:$0xff]  }
 0x432   :  { %8399 = vmatpush1.bf16.msra.mxu0 %v11979_v39  ;;  %7990 = vmatprep.subr.bf16.mxu1 %v11984_v36  ;;  %v12060_v39 = vld [vmem:[#allocation5 + $0x2198] ss:$24 sps:$4 sm:$0xff]  }
 0x433   :  { %8400 = vmatprep.subr.bf16.mxu0 %v11987_v32  ;;  %v12063_v36 = vld [vmem:[#allocation5 + $0x1ba0] ss:$24 sps:$4 sm:$0xff]   ;;  %v12068_v32 = vld [vmem:[#allocation5 + $0x21cc] ss:$24 sps:$4 sm:$0xff]  }
 0x435   :  { %7991 = vmatpush1.bf16.msra.mxu1 %v11982_v44  ;;  %v12071_v44 = vld [vmem:[#allocation5 + $0x1bd4] ss:$24 sps:$4 sm:$0xff]  }
 0x436   :  { %8401 = vmatpush1.bf16.msra.mxu0 %v11985_v45  ;;  %7992 = vmatprep.subr.bf16.mxu1 %v11990_v49  ;;  %v12066_v45 = vld [vmem:[#allocation5 + $0x21c8] ss:$24 sps:$4 sm:$0xff]   ;;  %v12074_v49 = vld [vmem:[#allocation5 + $0x21fc] ss:$24 sps:$4 sm:$0xff]  }
 0x437   :  { %8402 = vmatprep.subr.bf16.mxu0 %v11993_v47  ;;  %v12077_v47 = vld [vmem:[#allocation5 + $0x1c04] ss:$24 sps:$4 sm:$0xff]  }
 0x439   :  { %7993 = vmatpush1.bf16.msra.mxu1 %v11988_v51  ;;  %v12072_v51 = vld [vmem:[#allocation5 + $0x21f8] ss:$24 sps:$4 sm:$0xff]  }
 0x43a   :  { %8403 = vmatpush1.bf16.msra.mxu0 %v11991_v53  ;;  %7994 = vmatprep.subr.bf16.mxu1 %v11996_v52  ;;  %v12075_v53 = vld [vmem:[#allocation5 + $0x1c00] ss:$24 sps:$4 sm:$0xff]   ;;  %v12080_v52 = vld [vmem:[#allocation5 + $0x222c] ss:$24 sps:$4 sm:$0xff]  }
 0x43b   :  { %8404 = vmatprep.subr.bf16.mxu0 %v11999_v54  ;;  %v12083_v54 = vld [vmem:[#allocation5 + $0x1c34] ss:$24 sps:$4 sm:$0xff]  }
 0x43d   :  { %7995 = vmatpush1.bf16.msra.mxu1 %v11994_v56  ;;  %v12078_v56 = vld [vmem:[#allocation5 + $0x2228] ss:$24 sps:$4 sm:$0xff]  }
 0x43e   :  { %8405 = vmatpush1.bf16.msra.mxu0 %v11997_v57  ;;  %7996 = vmatprep.subr.bf16.mxu1 %v12002_v59  ;;  %v12081_v57 = vld [vmem:[#allocation5 + $0x1c30] ss:$24 sps:$4 sm:$0xff]   ;;  %v12086_v59 = vld [vmem:[#allocation5 + $0x225c] ss:$24 sps:$4 sm:$0xff]  }
 0x43f   :  { %8406 = vmatprep.subr.bf16.mxu0 %v12005_v60  ;;  %v12089_v60 = vld [vmem:[#allocation5 + $0x1c64] ss:$24 sps:$4 sm:$0xff]  }
 0x441   :  { %7997 = vmatpush1.bf16.msra.mxu1 %v12000_v61  ;;  %v12084_v61 = vld [vmem:[#allocation5 + $0x2258] ss:$24 sps:$4 sm:$0xff]  }
 0x442   :  { %8407 = vmatpush1.bf16.msra.mxu0 %v12003_v62  ;;  %7998 = vmatprep.subr.bf16.mxu1 %v12008_v63  ;;  %v12087_v62 = vld [vmem:[#allocation5 + $0x1c60] ss:$24 sps:$4 sm:$0xff]   ;;  %v12092_v63 = vld [vmem:[#allocation5 + $0x228c] ss:$24 sps:$4 sm:$0xff]  }
 0x443   :  { %8408 = vmatprep.subr.bf16.mxu0 %v12011_v11  ;;  %v12095_v11 = vld [vmem:[#allocation5 + $0x1c94] ss:$24 sps:$4 sm:$0xff]  }
 0x445   :  { %7999 = vmatpush1.bf16.msra.mxu1 %v12006_v0  ;;  %v12090_v0 = vld [vmem:[#allocation5 + $0x2288] ss:$24 sps:$4 sm:$0xff]  }
 0x446   :  { %8409 = vmatpush1.bf16.msra.mxu0 %v12009_v1  ;;  %8000 = vmatprep.subr.bf16.mxu1 %v12014_v4  ;;  %v12093_v1 = vld [vmem:[#allocation5 + $0x1c90] ss:$24 sps:$4 sm:$0xff]   ;;  %v12098_v4 = vld [vmem:[#allocation5 + $0x22bc] ss:$24 sps:$4 sm:$0xff]  }
 0x447   :  { %8410 = vmatprep.subr.bf16.mxu0 %v12017_v6  ;;  %v12101_v6 = vld [vmem:[#allocation5 + $0x1cc4] ss:$24 sps:$4 sm:$0xff]  }
 0x449   :  { %8001 = vmatpush1.bf16.msra.mxu1 %v12012_v22  ;;  %v12096_v22 = vld [vmem:[#allocation5 + $0x22b8] ss:$24 sps:$4 sm:$0xff]  }
 0x44a   :  { %8411 = vmatpush1.bf16.msra.mxu0 %v12015_v41  ;;  %8002 = vmatprep.subr.bf16.mxu1 %v12020_v12  ;;  %v12099_v41 = vld [vmem:[#allocation5 + $0x1cc0] ss:$24 sps:$4 sm:$0xff]   ;;  %v12104_v12 = vld [vmem:[#allocation5 + $0x22ec] ss:$24 sps:$4 sm:$0xff]  }
 0x44b   :  { %8412 = vmatprep.subr.bf16.mxu0 %v12023_v13  ;;  %v12107_v13 = vld [vmem:[#allocation5 + $0x1cf4] ss:$24 sps:$4 sm:$0xff]  }
 0x44d   :  { %8003 = vmatpush1.bf16.msra.mxu1 %v12018_v15  ;;  %v12102_v15 = vld [vmem:[#allocation5 + $0x22e8] ss:$24 sps:$4 sm:$0xff]  }
 0x44e   :  { %8413 = vmatpush1.bf16.msra.mxu0 %v12021_v16  ;;  %8004 = vmatprep.subr.bf16.mxu1 %v12026_v55  ;;  %v12105_v16 = vld [vmem:[#allocation5 + $0x1cf0] ss:$24 sps:$4 sm:$0xff]   ;;  %v12110_v55 = vld [vmem:[#allocation5 + $0x231c] ss:$24 sps:$4 sm:$0xff]  }
 0x44f   :  { %8414 = vmatprep.subr.bf16.mxu0 %v12029_v28  ;;  %v12113_v28 = vld [vmem:[#allocation5 + $0x1d24] ss:$24 sps:$4 sm:$0xff]  }
 0x451   :  { %8005 = vmatpush1.bf16.msra.mxu1 %v12024_v17  ;;  %v12108_v17 = vld [vmem:[#allocation5 + $0x2318] ss:$24 sps:$4 sm:$0xff]  }
 0x452   :  { %8415 = vmatpush1.bf16.msra.mxu0 %v12027_v23  ;;  %8006 = vmatprep.subr.bf16.mxu1 %v12032_v58  ;;  %v12111_v23 = vld [vmem:[#allocation5 + $0x1d20] ss:$24 sps:$4 sm:$0xff]   ;;  %v12116_v58 = vld [vmem:[#allocation5 + $0x234c] ss:$24 sps:$4 sm:$0xff]  }
 0x453   :  { %8416 = vmatprep.subr.bf16.mxu0 %v12035_v18  ;;  %v12119_v18 = vld [vmem:[#allocation5 + $0x1d54] ss:$24 sps:$4 sm:$0xff]  }
 0x455   :  { %8007 = vmatpush1.bf16.msra.mxu1 %v12030_v2  ;;  %v12114_v2 = vld [vmem:[#allocation5 + $0x2348] ss:$24 sps:$4 sm:$0xff]  }
 0x456   :  { %8417 = vmatpush1.bf16.msra.mxu0 %v12033_v19  ;;  %8008 = vmatprep.subr.bf16.mxu1 %v12038_v20  ;;  %v12117_v19 = vld [vmem:[#allocation5 + $0x1d50] ss:$24 sps:$4 sm:$0xff]   ;;  %v12122_v20 = vld [vmem:[#allocation5 + $0x237c] ss:$24 sps:$4 sm:$0xff]  }
 0x457   :  { %8418 = vmatprep.subr.bf16.mxu0 %v12041_v33  ;;  %v12125_v33 = vld [vmem:[#allocation5 + $0x1d84] ss:$24 sps:$4 sm:$0xff]  }
 0x459   :  { %8009 = vmatpush1.bf16.msra.mxu1 %v12036_v21  ;;  %v12120_v21 = vld [vmem:[#allocation5 + $0x2378] ss:$24 sps:$4 sm:$0xff]  }
 0x45a   :  { %8419 = vmatpush1.bf16.msra.mxu0 %v12039_v24  ;;  %8019 = vmatprep.subr.bf16.mxu1 %v12044_v25  ;;  %v12123_v24 = vld [vmem:[#allocation5 + $0x1d80] ss:$24 sps:$4 sm:$0xff]   ;;  %v12128_v25 = vld [vmem:[#allocation5 + $0x23ac] ss:$24 sps:$4 sm:$0xff]  }
 0x45b   :  { %8429 = vmatprep.subr.bf16.mxu0 %v12047_v8  ;;  %v12131_v8 = vld [vmem:[#allocation5 + $0x1db4] ss:$24 sps:$4 sm:$0xff]  }
 0x45c   :  { %8011 = vmatmul.mubr.bf16.vlgmr.msra.gmra.mrb[4].mxu1 %v12599_v5 }
 0x45d   :  { %8421 = vmatmul.mubr.bf16.vlgmr.msra.gmra.mrb[4].mxu0 %v12579_v3  ;;  %8020 = vmatpush1.bf16.msra.mxu1 %v12042_v26  ;;  %v12065_v3 = vld [vmem:[#allocation5 + $0x1ba4] ss:$24 sps:$4 sm:$0xff]   ;;  %v12126_v26 = vld [vmem:[#allocation5 + $0x23a8] ss:$24 sps:$4 sm:$0xff]  }
 0x45e   :  { %8430 = vmatpush1.bf16.msra.mxu0 %v12045_v43  ;;  %8021 = vmatprep.subr.bf16.mxu1 %v12050_v27  ;;  %v12129_v43 = vld [vmem:[#allocation5 + $0x1db0] ss:$24 sps:$4 sm:$0xff]   ;;  %v12134_v27 = vld [vmem:[#allocation5 + $0x23dc] ss:$24 sps:$4 sm:$0xff]  }
 0x45f   :  { %8431 = vmatprep.subr.bf16.mxu0 %v12053_v29  ;;  %8051 = vmatprep.mubr.bf16.mxu1 %v12601_v14  ;;  %v12137_v29 = vld [vmem:[#allocation5 + $0x1de4] ss:$24 sps:$4 sm:$0xff]  }
 0x460   :  { %8461 = vmatprep.mubr.bf16.mxu0 %v12583_v9  ;;  %v12069_v9 = vld [vmem:[#allocation5 + $0x1bd0] ss:$24 sps:$4 sm:$0xff]  }
 0x461   :  { %8022 = vmatpush1.bf16.msra.mxu1 %v12048_v30  ;;  %v12132_v30 = vld [vmem:[#allocation5 + $0x23d8] ss:$24 sps:$4 sm:$0xff]  }
 0x462   :  { %8432 = vmatpush1.bf16.msra.mxu0 %v12051_v10  ;;  %8023 = vmatprep.subr.bf16.mxu1 %v12056_v31  ;;  %v12135_v10 = vld [vmem:[#allocation5 + $0x1de0] ss:$24 sps:$4 sm:$0xff]   ;;  %v12140_v31 = vld [vmem:[#allocation5 + $0x1e14] ss:$24 sps:$4 sm:$0xff]  }
 0x463   :  { %8433 = vmatprep.subr.bf16.mxu0 %v12059_v50  ;;  %v12141_v50 = vld [vmem:[#allocation8 + $0x40] sm:$0xff]  }
 0x465   :  { %8024 = vmatpush1.bf16.msra.mxu1 %v12054_v35  ;;  %v12283_v35 = vpop.eup %12282 }
 0x466   :  { %8434 = vmatpush1.bf16.msra.mxu0 %v12057_v42  ;;  %8025 = vmatprep.subr.bf16.mxu1 %v12062_v38  ;;  %v12142_v42 = vld [vmem:[#allocation8] sm:$0xff]  }
 0x467   :  { %8435 = vmatprep.subr.bf16.mxu0 %v12065_v3  ;;  %v12145_v38 = vld [vmem:[#allocation5 + $0x1e44] ss:$24 sps:$4 sm:$0xff]   ;;  %v12146_v3 = vld [vmem:[#allocation8 + $0x48] sm:$0xff]  }
 0x469   :  { %8026 = vmatpush1.bf16.msra.mxu1 %v12060_v39  ;;  %v8559_v39 = vpack.c.bf16 %v12283_v35, %v12283_v35  ;;  %v12207_v35 = vld [vmem:[#allocation5 + $0x2144] ss:$24 sps:$4 sm:$0xff]  }
 0x46a   :  { %8436 = vmatpush1.bf16.msra.mxu0 %v12063_v36  ;;  %8027 = vmatprep.subr.bf16.mxu1 %v12068_v32  ;;  %v12143_v36 = vld [vmem:[#allocation5 + $0x1e40] ss:$24 sps:$4 sm:$0xff]   ;;  %v12147_v32 = vld [vmem:[#allocation8 + $0x8] sm:$0xff]  }
 0x46b   :  { %8437 = vmatprep.subr.bf16.mxu0 %v12071_v44  ;;  %v12150_v44 = vld [vmem:[#allocation5 + $0x1e74] ss:$24 sps:$4 sm:$0xff]  }
 0x46d   :  { %8028 = vmatpush1.bf16.msra.mxu1 %v12066_v45  ;;  %v12151_v45 = vld [vmem:[#allocation8 + $0x50] sm:$0xff]  }
 0x46e   :  { %8438 = vmatpush1.bf16.msra.mxu0 %v12069_v9  ;;  %8029 = vmatprep.subr.bf16.mxu1 %v12074_v49  ;;  %v12148_v9 = vld [vmem:[#allocation5 + $0x1e70] ss:$24 sps:$4 sm:$0xff]   ;;  %v12152_v49 = vld [vmem:[#allocation8 + $0x10] sm:$0xff]  }
 0x46f   :  { %8439 = vmatprep.subr.bf16.mxu0 %v12077_v47  ;;  %v12155_v47 = vld [vmem:[#allocation5 + $0x1ea4] ss:$24 sps:$4 sm:$0xff]  }
 0x471   :  { %8030 = vmatpush1.bf16.msra.mxu1 %v12072_v51  ;;  %v12156_v51 = vld [vmem:[#allocation8 + $0x58] sm:$0xff]  }
 0x472   :  { %8440 = vmatpush1.bf16.msra.mxu0 %v12075_v53  ;;  %8031 = vmatprep.subr.bf16.mxu1 %v12080_v52  ;;  %v12157_v53 = vld [vmem:[#allocation8 + $0x18] sm:$0xff]   ;;  %v12160_v52 = vld [vmem:[#allocation5 + $0x1ed4] ss:$24 sps:$4 sm:$0xff]  }
 0x473   :  { %8441 = vmatprep.subr.bf16.mxu0 %v12083_v54  ;;  %v12161_v54 = vld [vmem:[#allocation8 + $0x60] sm:$0xff]  }
 0x475   :  { %8032 = vmatpush1.bf16.msra.mxu1 %v12078_v56  ;;  %v12158_v56 = vld [vmem:[#allocation5 + $0x1ed0] ss:$24 sps:$4 sm:$0xff]  }
 0x476   :  { %8442 = vmatpush1.bf16.msra.mxu0 %v12081_v57  ;;  %8033 = vmatprep.subr.bf16.mxu1 %v12086_v59  ;;  %v12165_v57 = vld [vmem:[#allocation5 + $0x1f04] ss:$24 sps:$4 sm:$0xff]   ;;  %v12166_v59 = vld [vmem:[#allocation8 + $0x68] sm:$0xff]  }
 0x477   :  { %8443 = vmatprep.subr.bf16.mxu0 %v12089_v60  ;;  %v12163_v60 = vld [vmem:[#allocation5 + $0x1f00] ss:$24 sps:$4 sm:$0xff]  }
 0x479   :  { %8034 = vmatpush1.bf16.msra.mxu1 %v12084_v61  ;;  %v12167_v61 = vld [vmem:[#allocation8 + $0x28] sm:$0xff]  }
 0x47a   :  { %8444 = vmatpush1.bf16.msra.mxu0 %v12087_v62  ;;  %8035 = vmatprep.subr.bf16.mxu1 %v12092_v63  ;;  %v12170_v62 = vld [vmem:[#allocation5 + $0x1f34] ss:$24 sps:$4 sm:$0xff]  }
 0x47b   :  { %8445 = vmatprep.subr.bf16.mxu0 %v12095_v11  ;;  %v12171_v63 = vld [vmem:[#allocation8 + $0x70] sm:$0xff]   ;;  %v12168_v11 = vld [vmem:[#allocation5 + $0x1f30] ss:$24 sps:$4 sm:$0xff]  }
 0x47d   :  { %8036 = vmatpush1.bf16.msra.mxu1 %v12090_v0  ;;  %v12172_v0 = vld [vmem:[#allocation8 + $0x30] sm:$0xff]  }
 0x47e   :  { %8446 = vmatpush1.bf16.msra.mxu0 %v12093_v1  ;;  %8037 = vmatprep.subr.bf16.mxu1 %v12098_v4  ;;  %v12175_v1 = vld [vmem:[#allocation5 + $0x1f64] ss:$24 sps:$4 sm:$0xff]  }
 0x47f   :  { %8447 = vmatprep.subr.bf16.mxu0 %v12101_v6  ;;  %v12176_v4 = vld [vmem:[#allocation8 + $0x78] sm:$0xff]  }
 0x480   :  { %v12173_v6 = vld [vmem:[#allocation5 + $0x1f60] ss:$24 sps:$4 sm:$0xff]  }
 0x481   :  { %8038 = vmatpush1.bf16.msra.mxu1 %v12096_v22  ;;  %v12180_v22 = vld [vmem:[#allocation5 + $0x1f94] ss:$24 sps:$4 sm:$0xff]  }
 0x482   :  { %8448 = vmatpush1.bf16.msra.mxu0 %v12099_v41  ;;  %8039 = vmatprep.subr.bf16.mxu1 %v12104_v12  ;;  %v12250_v41 = vld [vmem:[#allocation8 + $0xc0] sm:$0xff]   ;;  %v12285_v12 = vpop.eup %12284 }
 0x483   :  { %8449 = vmatprep.subr.bf16.mxu0 %v12107_v13  ;;  %v12178_v13 = vld [vmem:[#allocation5 + $0x1f90] ss:$24 sps:$4 sm:$0xff]  }
 0x485   :  { %8040 = vmatpush1.bf16.msra.mxu1 %v12102_v15  ;;  %v12251_v15 = vld [vmem:[#allocation8 + $0x80] sm:$0xff]  }
 0x486   :  { %8450 = vmatpush1.bf16.msra.mxu0 %v12105_v16  ;;  %8041 = vmatprep.subr.bf16.mxu1 %v12110_v55  ;;  %v8558_v16 = vpack.c.bf16 %v12285_v12, %v12285_v12  ;;  %v12183_v55 = vld [vmem:[#allocation5 + $0x1fc4] ss:$24 sps:$4 sm:$0xff]  }
 0x487   :  { %8451 = vmatprep.subr.bf16.mxu0 %v12113_v28  ;;  %v12252_v28 = vld [vmem:[#allocation8 + $0xc8] sm:$0xff]   ;;  %v12249_v12 = vld [vmem:[#allocation5 + $0x23e4] ss:$24 sps:$4 sm:$0xff]  }
 0x489   :  { %8042 = vmatpush1.bf16.msra.mxu1 %v12108_v17  ;;  %v12181_v17 = vld [vmem:[#allocation5 + $0x1fc0] ss:$24 sps:$4 sm:$0xff]  }
 0x48a   :  { %8452 = vmatpush1.bf16.msra.mxu0 %v12111_v23  ;;  %8043 = vmatprep.subr.bf16.mxu1 %v12116_v58  ;;  %v12253_v23 = vld [vmem:[#allocation8 + $0x88] sm:$0xff]  }
 0x48b   :  { %8453 = vmatprep.subr.bf16.mxu0 %v12119_v18  ;;  %v12186_v58 = vld [vmem:[#allocation5 + $0x1ff4] ss:$24 sps:$4 sm:$0xff]  }
 0x48c   :  { %v12254_v18 = vld [vmem:[#allocation8 + $0xd0] sm:$0xff]  }
 0x48d   :  { %8044 = vmatpush1.bf16.msra.mxu1 %v12114_v2  ;;  %v12184_v2 = vld [vmem:[#allocation5 + $0x1ff0] ss:$24 sps:$4 sm:$0xff]  }
 0x48e   :  { %8454 = vmatpush1.bf16.msra.mxu0 %v12117_v19  ;;  %8045 = vmatprep.subr.bf16.mxu1 %v12122_v20  ;;  %v12255_v19 = vld [vmem:[#allocation8 + $0x90] sm:$0xff]  }
 0x48f   :  { %8455 = vmatprep.subr.bf16.mxu0 %v12125_v33  ;;  %v12189_v20 = vld [vmem:[#allocation5 + $0x2024] ss:$24 sps:$4 sm:$0xff]  }
 0x490   :  { %v12256_v33 = vld [vmem:[#allocation8 + $0xd8] sm:$0xff]  }
 0x491   :  { %8046 = vmatpush1.bf16.msra.mxu1 %v12120_v21  ;;  %v12187_v21 = vld [vmem:[#allocation5 + $0x2020] ss:$24 sps:$4 sm:$0xff]  }
 0x492   :  { %8456 = vmatpush1.bf16.msra.mxu0 %v12123_v24  ;;  %8047 = vmatprep.subr.bf16.mxu1 %v12128_v25  ;;  %v12257_v24 = vld [vmem:[#allocation8 + $0x98] sm:$0xff]   ;;  %v12192_v25 = vld [vmem:[#allocation5 + $0x2054] ss:$24 sps:$4 sm:$0xff]  }
 0x493   :  { %8457 = vmatprep.subr.bf16.mxu0 %v12131_v8  ;;  %v12190_v8 = vld [vmem:[#allocation5 + $0x2050] ss:$24 sps:$4 sm:$0xff]  }
 0x495   :  { %8048 = vmatpush1.bf16.msra.mxu1 %v12126_v26  ;;  %v12195_v26 = vld [vmem:[#allocation5 + $0x2084] ss:$24 sps:$4 sm:$0xff]  }
 0x496   :  { %8458 = vmatpush1.bf16.msra.mxu0 %v12129_v43  ;;  %8049 = vmatprep.subr.bf16.mxu1 %v12134_v27  ;;  %v12193_v43 = vld [vmem:[#allocation5 + $0x2080] ss:$24 sps:$4 sm:$0xff]   ;;  %v12198_v27 = vld [vmem:[#allocation5 + $0x20b4] ss:$24 sps:$4 sm:$0xff]  }
 0x497   :  { %8459 = vmatprep.subr.bf16.mxu0 %v12137_v29  ;;  %v12196_v29 = vld [vmem:[#allocation5 + $0x20b0] ss:$24 sps:$4 sm:$0xff]  }
 0x499   :  { %8050 = vmatpush1.bf16.msra.mxu1 %v12132_v30  ;;  %v12201_v30 = vld [vmem:[#allocation5 + $0x20e4] ss:$24 sps:$4 sm:$0xff]  }
 0x49a   :  { %8460 = vmatpush1.bf16.msra.mxu0 %v12135_v10  ;;  %10294 = vmatprep.subr.bf16.mxu1 %v12141_v50  ;;  %v12199_v10 = vld [vmem:[#allocation5 + $0x20e0] ss:$24 sps:$4 sm:$0xff]   ;;  %v12202_v50 = vld [vmem:[#allocation5 + $0x2110] ss:$24 sps:$4 sm:$0xff]  }
 0x49b   :  { %8470 = vmatprep.subr.bf16.mxu0 %v12140_v31  ;;  %v12204_v31 = vld [vmem:[#allocation5 + $0x2114] ss:$24 sps:$4 sm:$0xff]  }
 0x49c   :  { %8052 = vmatmul.mubr.bf16.vlgmr.msra.gmra.mrb[4].mxu1 %v12607_v46 }
 0x49d   :  { %8462 = vmatmul.mubr.bf16.vlgmr.msra.gmra.mrb[4].mxu0 %v12591_v34  ;;  %10295 = vmatpush3.bf16.msra.mxu1 %v12142_v42  ;;  %v12153_v34 = vld [vmem:[#allocation5 + $0x1ea0] ss:$24 sps:$4 sm:$0xff]   ;;  %v12210_v42 = vld [vmem:[#allocation5 + $0x2174] ss:$24 sps:$4 sm:$0xff]  }
 0x49e   :  { %8471 = vmatpush1.bf16.msra.mxu0 %v12138_v7  ;;  %8987 = vmatprep.mubr.bf16.mxu1 %v8559_v39  ;;  %v12205_v7 = vld [vmem:[#allocation5 + $0x2140] ss:$24 sps:$4 sm:$0xff]  }
 0x49f   :  { %8472 = vmatprep.subr.bf16.mxu0 %v12145_v38  ;;  %10296 = vmatprep.subr.bf16.mxu1 %v12146_v3  ;;  %v12208_v38 = vld [vmem:[#allocation5 + $0x2170] ss:$24 sps:$4 sm:$0xff]   ;;  %v12213_v3 = vld [vmem:[#allocation5 + $0x21a4] ss:$24 sps:$4 sm:$0xff]   ;;  %v12211_v39 = vld [vmem:[#allocation5 + $0x21a0] ss:$24 sps:$4 sm:$0xff]  }
 0x4a0   :  { %8502 = vmatprep.mubr.bf16.mxu0 %v12593_v40  ;;  %v12162_v40 = vld [vmem:[#allocation8 + $0x20] sm:$0xff]  }
 0x4a1   :  { %10297 = vmatpush3.bf16.msra.mxu1 %v12147_v32  ;;  %v12214_v32 = vld [vmem:[#allocation5 + $0x21d0] ss:$24 sps:$4 sm:$0xff]  }
 0x4a2   :  { %8473 = vmatpush1.bf16.msra.mxu0 %v12143_v36  ;;  %10298 = vmatprep.subr.bf16.mxu1 %v12151_v45  ;;  %v12216_v36 = vld [vmem:[#allocation5 + $0x21d4] ss:$24 sps:$4 sm:$0xff]  }
 0x4a3   :  { %8474 = vmatprep.subr.bf16.mxu0 %v12150_v44  ;;  %v12219_v44 = vld [vmem:[#allocation5 + $0x2204] ss:$24 sps:$4 sm:$0xff]   ;;  %v12222_v45 = vld [vmem:[#allocation5 + $0x2234] ss:$24 sps:$4 sm:$0xff]  }
 0x4a5   :  { %10299 = vmatpush3.bf16.msra.mxu1 %v12152_v49  ;;  %v12259_v49 = vld [vmem:[#allocation8 + $0xa0] sm:$0xff]  }
 0x4a6   :  { %8475 = vmatpush1.bf16.msra.mxu0 %v12148_v9  ;;  %10300 = vmatprep.subr.bf16.mxu1 %v12156_v51  ;;  %v12258_v9 = vld [vmem:[#allocation8 + $0xe0] sm:$0xff]   ;;  %v12260_v51 = vld [vmem:[#allocation8 + $0xe8] sm:$0xff]  }
 0x4a7   :  { %8476 = vmatprep.subr.bf16.mxu0 %v12155_v47  ;;  %v12225_v47 = vld [vmem:[#allocation5 + $0x2264] ss:$24 sps:$4 sm:$0xff]  }
 0x4a9   :  { %10301 = vmatpush3.bf16.msra.mxu1 %v12157_v53  ;;  %v12261_v53 = vld [vmem:[#allocation8 + $0xa8] sm:$0xff]  }
 0x4aa   :  { %8477 = vmatpush1.bf16.msra.mxu0 %v12153_v34  ;;  %10302 = vmatprep.subr.bf16.mxu1 %v12161_v54  ;;  %v12223_v34 = vld [vmem:[#allocation5 + $0x2260] ss:$24 sps:$4 sm:$0xff]  }
 0x4ab   :  { %8478 = vmatprep.subr.bf16.mxu0 %v12160_v52  ;;  %v12228_v52 = vld [vmem:[#allocation5 + $0x2294] ss:$24 sps:$4 sm:$0xff]  }
 0x4ac   :  { %v12262_v54 = vld [vmem:[#allocation8 + $0xf0] sm:$0xff]  }
 0x4ad   :  { %10303 = vmatpush3.bf16.msra.mxu1 %v12162_v40  ;;  %v12263_v40 = vld [vmem:[#allocation8 + $0xb0] sm:$0xff]  }
 0x4ae   :  { %8479 = vmatpush1.bf16.msra.mxu0 %v12158_v56  ;;  %10304 = vmatprep.subr.bf16.mxu1 %v12166_v59  ;;  %v12226_v56 = vld [vmem:[#allocation5 + $0x2290] ss:$24 sps:$4 sm:$0xff]   ;;  %v12264_v59 = vld [vmem:[#allocation8 + $0xf8] sm:$0xff]  }
 0x4af   :  { %8480 = vmatprep.subr.bf16.mxu0 %v12165_v57  ;;  %v12231_v57 = vld [vmem:[#allocation5 + $0x22c4] ss:$24 sps:$4 sm:$0xff]  }
 0x4b1   :  { %10305 = vmatpush3.bf16.msra.mxu1 %v12167_v61  ;;  %v12265_v61 = vld [vmem:[#allocation8 + $0xb8] sm:$0xff]  }
 0x4b2   :  { %8481 = vmatpush1.bf16.msra.mxu0 %v12163_v60  ;;  %10306 = vmatprep.subr.bf16.mxu1 %v12171_v63  ;;  %v12229_v60 = vld [vmem:[#allocation5 + $0x22c0] ss:$24 sps:$4 sm:$0xff]   ;;  %v12232_v63 = vld [vmem:[#allocation5 + $0x22f0] ss:$24 sps:$4 sm:$0xff]  }
 0x4b3   :  { %8482 = vmatprep.subr.bf16.mxu0 %v12170_v62  ;;  %v12234_v62 = vld [vmem:[#allocation5 + $0x22f4] ss:$24 sps:$4 sm:$0xff]  }
 0x4b5   :  { %10307 = vmatpush3.bf16.msra.mxu1 %v12172_v0  ;;  %v12235_v0 = vld [vmem:[#allocation5 + $0x2320] ss:$24 sps:$4 sm:$0xff]  }
 0x4b6   :  { %8483 = vmatpush1.bf16.msra.mxu0 %v12168_v11  ;;  %10308 = vmatprep.subr.bf16.mxu1 %v12176_v4  ;;  %v12237_v11 = vld [vmem:[#allocation5 + $0x2324] ss:$24 sps:$4 sm:$0xff]   ;;  %v12238_v4 = vld [vmem:[#allocation5 + $0x2350] ss:$24 sps:$4 sm:$0xff]  }
 0x4b7   :  { %8484 = vmatprep.subr.bf16.mxu0 %v12175_v1  ;;  %v12240_v1 = vld [vmem:[#allocation5 + $0x2354] ss:$24 sps:$4 sm:$0xff]  }
 0x4b9   :  { %10309 = vmatpush3.bf16.msra.mxu1 %v12177_v48  ;;  %v12241_v48 = vld [vmem:[#allocation5 + $0x2380] ss:$24 sps:$4 sm:$0xff]  }
 0x4ba   :  { %8485 = vmatpush1.bf16.msra.mxu0 %v12173_v6  ;;  %10316 = vmatprep.subr.bf16.mxu1 %v12250_v41  ;;  %v12243_v6 = vld [vmem:[#allocation5 + $0x2384] ss:$24 sps:$4 sm:$0xff]   ;;  %v12244_v41 = vld [vmem:[#allocation5 + $0x23b0] ss:$24 sps:$4 sm:$0xff]  }
 0x4bb   :  { %8486 = vmatprep.subr.bf16.mxu0 %v12180_v22  ;;  %v12246_v22 = vld [vmem:[#allocation5 + $0x23b4] ss:$24 sps:$4 sm:$0xff]  }
 0x4bc   :  { %8988 = vmatmul.mubr.bf16.vlgmr.msra.gmra.mrb[8].mxu1 %v8558_v16  ;;  %v1296_v16 = vsub.s32 2, %v12629_v37 }
 0x4bd   :  { %10317 = vmatpush3.bf16.msra.mxu1 %v12251_v15  ;;  %v12247_v15 = vld [vmem:[#allocation5 + $0x23e0] ss:$24 sps:$4 sm:$0xff]  }
 0x4be   :  { %8487 = vmatpush1.bf16.msra.mxu0 %v12178_v13  ;;  %10318 = vmatprep.subr.bf16.mxu1 %v12252_v28  ;;  %v12266_v13 = vld [vmem:[#allocation8 + $0x140] sm:$0xff]   ;;  %v12294_v28 = vld [vmem:[#allocation7] sm:$0x3f] }
 0x4bf   :  { %8488 = vmatprep.subr.bf16.mxu0 %v12183_v55  ;;  %v1300_v55 = vsub.s32 3, %v12629_v37 }
 0x4c1   :  { %10319 = vmatpush3.bf16.msra.mxu1 %v12253_v23  ;;  %v1301_v23 = vrot.slane %v12294_v28, %v1300_v55 }
 0x4c2   :  { %8489 = vmatpush1.bf16.msra.mxu0 %v12181_v17  ;;  %10320 = vmatprep.subr.bf16.mxu1 %v12254_v18  ;;  %v1297_v17 = vrot.slane %v12294_v28, %v1296_v16 }
 0x4c3   :  { %8490 = vmatprep.subr.bf16.mxu0 %v12186_v58 }
 0x4c5   :  { %10321 = vmatpush3.bf16.msra.mxu1 %v12255_v19 }
 0x4c6   :  { %8491 = vmatpush1.bf16.msra.mxu0 %v12184_v2  ;;  %10322 = vmatprep.subr.bf16.mxu1 %v12256_v33 }
 0x4c7   :  { %8492 = vmatprep.subr.bf16.mxu0 %v12189_v20 }
 0x4c9   :  { %10323 = vmatpush3.bf16.msra.mxu1 %v12257_v24 }
 0x4ca   :  { %8493 = vmatpush1.bf16.msra.mxu0 %v12187_v21  ;;  %10324 = vmatprep.subr.bf16.mxu1 %v12258_v9  ;;  %v1304_v9 = vsub.s32 4, %v12629_v37 }
 0x4cb   :  { %8494 = vmatprep.subr.bf16.mxu0 %v12192_v25 }
 0x4cd   :  { %10325 = vmatpush3.bf16.msra.mxu1 %v12259_v49  ;;  %v1305_v49 = vrot.slane %v12294_v28, %v1304_v9 }
 0x4ce   :  { %8495 = vmatpush1.bf16.msra.mxu0 %v12190_v8  ;;  %10326 = vmatprep.subr.bf16.mxu1 %v12260_v51  ;;  %v12267_v8 = vld [vmem:[#allocation8 + $0x100] sm:$0xff]  }
 0x4cf   :  { %8496 = vmatprep.subr.bf16.mxu0 %v12195_v26  ;;  %v12268_v26 = vld [vmem:[#allocation8 + $0x148] sm:$0xff]  }
 0x4d1   :  { %10327 = vmatpush3.bf16.msra.mxu1 %v12261_v53 }
 0x4d2   :  { %8497 = vmatpush1.bf16.msra.mxu0 %v12193_v43  ;;  %10328 = vmatprep.subr.bf16.mxu1 %v12262_v54  ;;  %v12269_v43 = vld [vmem:[#allocation8 + $0x108] sm:$0xff]  }
 0x4d3   :  { %8498 = vmatprep.subr.bf16.mxu0 %v12198_v27  ;;  %v12270_v27 = vld [vmem:[#allocation8 + $0x150] sm:$0xff]  }
 0x4d5   :  { %10329 = vmatpush3.bf16.msra.mxu1 %v12263_v40 }
 0x4d6   :  { %8499 = vmatpush1.bf16.msra.mxu0 %v12196_v29  ;;  %10330 = vmatprep.subr.bf16.mxu1 %v12264_v59  ;;  %v12271_v29 = vld [vmem:[#allocation8 + $0x110] sm:$0xff]  }
 0x4d7   :  { %8500 = vmatprep.subr.bf16.mxu0 %v12201_v30  ;;  %v12272_v30 = vld [vmem:[#allocation8 + $0x158] sm:$0xff]  }
 0x4d9   :  { %10331 = vmatpush3.bf16.msra.mxu1 %v12265_v61  ;;  %v10245_v61 = vld [vmem:[#allocation10] ss:$0 sm:$0xff] }
 0x4da   :  { %8501 = vmatpush1.bf16.msra.mxu0 %v12199_v10  ;;  %10338 = vmatprep.subr.bf16.mxu1 %v12266_v13  ;;  %v12273_v10 = vld [vmem:[#allocation8 + $0x118] sm:$0xff]  }
 0x4db   :  { %8511 = vmatprep.subr.bf16.mxu0 %v12204_v31  ;;  %v12274_v31 = vld [vmem:[#allocation8 + $0x160] sm:$0xff]  }
 0x4dd   :  { %8503 = vmatmul.mubr.bf16.vlgmr.msra.gmra.mrb[4].mxu0 %v12599_v5  ;;  %v12217_v5 = vld [vmem:[#allocation5 + $0x2200] ss:$24 sps:$4 sm:$0xff]  }
 0x4de   :  { %8512 = vmatpush1.bf16.msra.mxu0 %v12202_v50  ;;  %8543 = vmatprep.mubr.bf16.mxu0 %v12601_v14  ;;  %v12220_v14 = vld [vmem:[#allocation5 + $0x2230] ss:$24 sps:$4 sm:$0xff]  }
 0x4df   :  { %8513 = vmatprep.subr.bf16.mxu0 %v12207_v35  ;;  %v12275_v50 = vld [vmem:[#allocation8 + $0x120] sm:$0xff]  }
 0x4e2   :  { %8514 = vmatpush1.bf16.msra.mxu0 %v12205_v7  ;;  %v12276_v7 = vld [vmem:[#allocation8 + $0x168] sm:$0xff]  }
 0x4e3   :  { %8515 = vmatprep.subr.bf16.mxu0 %v12210_v42 }
 0x4e6   :  { %8516 = vmatpush1.bf16.msra.mxu0 %v12208_v38 }
 0x4e7   :  { %8517 = vmatprep.subr.bf16.mxu0 %v12213_v3 }
 0x4ea   :  { %8518 = vmatpush1.bf16.msra.mxu0 %v12211_v39 }
 0x4eb   :  { %8519 = vmatprep.subr.bf16.mxu0 %v12216_v36  ;;  %v12277_v36 = vld [vmem:[#allocation8 + $0x128] sm:$0xff]  }
 0x4ee   :  { %8520 = vmatpush1.bf16.msra.mxu0 %v12214_v32  ;;  %v12278_v32 = vld [vmem:[#allocation8 + $0x170] sm:$0xff]  }
 0x4ef   :  { %8521 = vmatprep.subr.bf16.mxu0 %v12219_v44  ;;  %v12279_v44 = vld [vmem:[#allocation8 + $0x130] sm:$0xff]  }
 0x4f2   :  { %8522 = vmatpush1.bf16.msra.mxu0 %v12217_v5  ;;  %v12280_v5 = vld [vmem:[#allocation8 + $0x178] sm:$0xff]  }
 0x4f3   :  { %8523 = vmatprep.subr.bf16.mxu0 %v12222_v45  ;;  %v12281_v45 = vld [vmem:[#allocation8 + $0x138] sm:$0xff]  }
 0x4f6   :  { %8524 = vmatpush1.bf16.msra.mxu0 %v12220_v14  ;;  %v1308_v14 = vsub.s32 5, %v12629_v37 }
 0x4f7   :  { %8525 = vmatprep.subr.bf16.mxu0 %v12225_v47 }
 0x4f8   :  { %v1309_v47 = vrot.slane %v12294_v28, %v1308_v14 }
 0x4fa   :  { %8526 = vmatpush1.bf16.msra.mxu0 %v12223_v34 }
 0x4fb   :  { %8527 = vmatprep.subr.bf16.mxu0 %v12228_v52 }
 0x4fe   :  { %8528 = vmatpush1.bf16.msra.mxu0 %v12226_v56 }
 0x4ff   :  { %8529 = vmatprep.subr.bf16.mxu0 %v12231_v57 }
 0x502   :  { %8530 = vmatpush1.bf16.msra.mxu0 %v12229_v60 }
 0x503   :  { %8531 = vmatprep.subr.bf16.mxu0 %v12234_v62 }
 0x506   :  { %8532 = vmatpush1.bf16.msra.mxu0 %v12232_v63 }
 0x507   :  { %8533 = vmatprep.subr.bf16.mxu0 %v12237_v11 }
 0x50a   :  { %8534 = vmatpush1.bf16.msra.mxu0 %v12235_v0 }
 0x50b   :  { %8535 = vmatprep.subr.bf16.mxu0 %v12240_v1 }
 0x50e   :  { %8536 = vmatpush1.bf16.msra.mxu0 %v12238_v4 }
 0x50f   :  { %8537 = vmatprep.subr.bf16.mxu0 %v12243_v6 }
 0x512   :  { %8538 = vmatpush1.bf16.msra.mxu0 %v12241_v48 }
 0x513   :  { %8539 = vmatprep.subr.bf16.mxu0 %v12246_v22 }
 0x516   :  { %8540 = vmatpush1.bf16.msra.mxu0 %v12244_v41 }
 0x517   :  { %8541 = vmatprep.subr.bf16.mxu0 %v12249_v12 }
 0x51a   :  { %8542 = vmatpush1.bf16.msra.mxu0 %v12247_v15 }
 0x51d   :  { %8544 = vmatmul.mubr.bf16.vlgmr.msra.gmra.mrb[4].mxu0 %v12607_v46 }
 0x56f   :  { %v8053_v58 = vpop.f32.mrb[4].mxu1 }
 0x570   :  { %v10364_v18 = vadd.f32 %v8053_v58, %v1297_v17  ;;  %v8055_v2 = vpop.f32.mrb[5].mxu1 }
 0x571   :  { %v10365_v19 = vadd.f32 %v8055_v2, %v1301_v23  ;;  %v8057_v20 = vpop.f32.mrb[6].mxu1 }
 0x572   :  { %12286 = vtanh.f32 %v10364_v18  ;;  %v8058_v33 = vpop.f32.mrb[7].mxu1 }
 0x573   :  { %12288 = vtanh.f32 %v10365_v19 }
 0x57c   :  { %v12287_v21 = vpop.eup %12286 }
 0x57d   :  { %v12289_v24 = vpop.eup %12288  ;;  %v8560_v46 = vpack.c.bf16 %v12287_v21, %v12287_v21 }
 0x57e   :  { %v8561_v25 = vpack.c.bf16 %v12289_v24, %v12289_v24 }
 0x580   :  { %9027 = vmatprep.mubr.bf16.mxu1 %v8561_v25 }
 0x581   :  { %9028 = vmatmul.mubr.bf16.vlgmr.msra.gmra.mrb[12].mxu1 %v8560_v46 }
 0x582   :  { %10339 = vmatpush3.bf16.msra.mxu1 %v12267_v8 }
 0x583   :  { %10340 = vmatprep.subr.bf16.mxu1 %v12268_v26 }
 0x586   :  { %10341 = vmatpush3.bf16.msra.mxu1 %v12269_v43 }
 0x587   :  { %10342 = vmatprep.subr.bf16.mxu1 %v12270_v27 }
 0x58a   :  { %10343 = vmatpush3.bf16.msra.mxu1 %v12271_v29 }
 0x58b   :  { %10344 = vmatprep.subr.bf16.mxu1 %v12272_v30 }
 0x58e   :  { %10345 = vmatpush3.bf16.msra.mxu1 %v12273_v10 }
 0x58f   :  { %v10310_v35 = vpop.f32.mrb[8].mxu1  ;;  %10346 = vmatprep.subr.bf16.mxu1 %v12274_v31 }
 0x590   :  { %v10311_v42 = vpop.f32.mrb[9].mxu1 }
 0x591   :  { %v10312_v38 = vadd.f32 %v10311_v42, %v10310_v35  ;;  %v10313_v3 = vpop.f32.mrb[10].mxu1 }
 0x592   :  { %v10314_v39 = vpop.f32.mrb[11].mxu1  ;;  %10347 = vmatpush3.bf16.msra.mxu1 %v12275_v50 }
 0x593   :  { %10348 = vmatprep.subr.bf16.mxu1 %v12276_v7  ;;  %v8990_v37 = vadd.f32 %v10312_v38, %v10245_v61 }
 0x596   :  { %10349 = vmatpush3.bf16.msra.mxu1 %v12277_v36 }
 0x597   :  { %10350 = vmatprep.subr.bf16.mxu1 %v12278_v32 }
 0x59a   :  { %10351 = vmatpush3.bf16.msra.mxu1 %v12279_v44 }
 0x59b   :  { %10352 = vmatprep.subr.bf16.mxu1 %v12280_v5 }
 0x59e   :  { %10353 = vmatpush3.bf16.msra.mxu1 %v12281_v45 }
 0x5f0   :  { %v8545_v51 = vpop.f32.mrb[4].mxu0 }
 0x5f1   :  { %v10366_v34 = vadd.f32 %v8545_v51, %v1305_v49  ;;  %v8547_v53 = vpop.f32.mrb[5].mxu0 }
 0x5f2   :  { %v10367_v52 = vadd.f32 %v8547_v53, %v1309_v47  ;;  %v8549_v54 = vpop.f32.mrb[6].mxu0 }
 0x5f3   :  { %12290 = vtanh.f32 %v10366_v34  ;;  %v8550_v56 = vpop.f32.mrb[7].mxu0 }
 0x5f4   :  { %12292 = vtanh.f32 %v10367_v52 }
 0x5fd   :  { %v12291_v40 = vpop.eup %12290 }
 0x5fe   :  { %v12293_v57 = vpop.eup %12292  ;;  %v8562_v60 = vpack.c.bf16 %v12291_v40, %v12291_v40 }
 0x5ff   :  { %v8563_v59 = vpack.c.bf16 %v12293_v57, %v12293_v57 }
 0x601   :  { %9067 = vmatprep.mubr.bf16.mxu1 %v8563_v59 }
 0x602   :  { %9068 = vmatmul.mubr.bf16.vlgmr.msra.gmra.mrb[16].mxu1 %v8562_v60 }
 0x654   :  { %v10332_v62 = vpop.f32.mrb[12].mxu1 }
 0x655   :  { %v10333_v63 = vpop.f32.mrb[13].mxu1 }
 0x656   :  { %v10334_v11 = vadd.f32 %v10333_v63, %v10332_v62  ;;  %v10335_v0 = vpop.f32.mrb[14].mxu1 }
 0x657   :  { %v10336_v1 = vpop.f32.mrb[15].mxu1 }
 0x658   :  { %v9030_v4 = vadd.f32 %v10334_v11, %v8990_v37 }
 0x6d5   :  { %v10354_v6 = vpop.f32.mrb[16].mxu1 }
 0x6d6   :  { %v10355_v48 = vpop.f32.mrb[17].mxu1 }
 0x6d7   :  { %v10356_v22 = vadd.f32 %v10355_v48, %v10354_v6  ;;  %v10357_v41 = vpop.f32.mrb[18].mxu1 }
 0x6d8   :  { %v10358_v12 = vpop.f32.mrb[19].mxu1 }
 0x6d9   :  { %v9070_v13 = vadd.f32 %v10356_v22, %v9030_v4 }
 0x6db   :  { %9075 = vst [vmem:[#allocation11] sm:$0xff] %v9070_v13 }
 0x6dc   :  { %12416 = shalt.err (!%p12413_p2)
}
 0x6dd   :  { %s12417_s6 = scalar_lea.hbm %s12692_s5, 128 }
 0x6de   :  { %p12418_p3 = scmp.ne.s32.totalorder %s12692_s5, %s12417_s6  ;;  %p12421_p4 = scmp.lt.u32.totalorder %s12417_s6, %s12692_s5 }
 0x6e0   :  { %p12423_p5 = pnand %p12421_p4, %p12418_p3 }
 0x6e2   :  { %12426 = shalt.err (!%p12423_p5)
}
 0x6e3   :  { %9085 = dma.vmem_to_hbm [thread:$0]  %s9083_s28, 128, %s12692_s5, [#allocation4]  }
 0x6e4   :  { %12433 = dma.done.wait [#allocation4], 128  }
 0x6e5   :  { %12434 = vsyncadd [#allocation4], 4294967168 }
 0x6e6   :  { %9089 = vsyncpa [#allocation3], 1 }
 0x6e7   :  { %9090 = vsyncpa [#allocation6], 1 }
 0x6e8   :  { %9091 = vsyncpa [#allocation9], 1 }
 0x6e9   :  { %9092 = vsyncpa [#allocation4], 1 }

</bundles_post_ra>
